<compile_context>
chip_gen: v5e
topology: v5e:2x2
jax: 0.10.0
libtpu: 0.0.40
codegen_flags: <defaults>
</compile_context>

<pallas_src>
import jax
import jax.numpy as jnp
from jax.experimental import pallas as pl
from jax.experimental.pallas import tpu as pltpu

# ----------------------------- model config ---------------------------------
B = 2          # batch
C = 3          # input channels
IMG = 16       # spatial size
PATCH = 4      # patch size
N_PATCH = (IMG // PATCH) ** 2          # 16 patches
SEQ = N_PATCH + 1                      # +1 CLS token = 17
S_PAD = 24                             # padded sequence (multiple of 8 sublanes)
CPP = C * PATCH * PATCH                # flattened patch size = 48
EMBED = 32                             # token embedding dim (768 in real model)
HEADS = 4
HEAD_DIM = EMBED // HEADS
MLP = 4 * EMBED
HIDDEN = 64                            # classifier hidden (512 in real model)
NUM_CLASSES = 2
DEPTH = 2                              # 12 in the real model


# ----------------------------- in-kernel helpers -----------------------------
def _ln(x, g, b, eps):
    mu = jnp.mean(x, axis=-1, keepdims=True)
    var = jnp.mean(jnp.square(x - mu), axis=-1, keepdims=True)
    return (x - mu) * jax.lax.rsqrt(var + eps) * g + b


def _gelu(x):
    # TODO(synk): timm ViT uses exact erf-GELU; tanh-approx kept for Mosaic-safe lowering.
    c = jnp.sqrt(2.0 / jnp.pi).astype(x.dtype)
    return 0.5 * x * (1.0 + jnp.tanh(c * (x + 0.044715 * x * x * x)))


# ----------------------------- fused kernel ----------------------------------
def _vit_kernel(x_ref, prefix_ref, patch_w_ref,
                ln1_g_ref, ln1_b_ref, qkv_w_ref, qkv_b_ref,
                proj_w_ref, proj_b_ref, ln2_g_ref, ln2_b_ref,
                fc1_w_ref, fc1_b_ref, fc2_w_ref, fc2_b_ref,
                norm_g_ref, norm_b_ref, attn_w_ref, attn_b_ref,
                cls_ln_g_ref, cls_ln_b_ref, hfc1_w_ref, hfc1_b_ref,
                hfc2_w_ref, hfc2_b_ref,
                logits_ref, attnw_ref):
    # --- patch embedding + CLS + positional (prefix pre-combines cls/pos/patch_b) ---
    xp = x_ref[0]                                                     # [S_PAD, CPP]
    tokens = jnp.dot(xp, patch_w_ref[...],
                     preferred_element_type=jnp.float32) + prefix_ref[...]   # [S_PAD, EMBED]

    key_mask = jax.lax.broadcasted_iota(jnp.int32, (S_PAD, S_PAD), 1) < SEQ
    scale = 1.0 / float(HEAD_DIM) ** 0.5

    # --- transformer blocks (static unroll, everything stays on-chip) ---
    for d in range(DEPTH):
        h = _ln(tokens, ln1_g_ref[d], ln1_b_ref[d], 1e-6)
        qkv = jnp.dot(h, qkv_w_ref[d],
                      preferred_element_type=jnp.float32) + qkv_b_ref[d]     # [S_PAD, 3*EMBED]

        heads = []
        for hd in range(HEADS):
            lo = hd * HEAD_DIM
            qh = qkv[:, lo:lo + HEAD_DIM]                              # [S_PAD, HEAD_DIM]
            kh = qkv[:, EMBED + lo:EMBED + lo + HEAD_DIM]
            vh = qkv[:, 2 * EMBED + lo:2 * EMBED + lo + HEAD_DIM]
            s = jnp.dot(qh, kh.T, preferred_element_type=jnp.float32) * scale
            s = jnp.where(key_mask, s, -1e30)                          # mask padded keys
            s = s - jnp.max(s, axis=-1, keepdims=True)
            p = jnp.exp(s)
            p = p * pl.reciprocal(jnp.sum(p, axis=-1, keepdims=True), approx=True)
            heads.append(jnp.dot(p, vh, preferred_element_type=jnp.float32))
        a = jnp.concatenate(heads, axis=-1)                            # [S_PAD, EMBED]

        proj = jnp.dot(a, proj_w_ref[d],
                       preferred_element_type=jnp.float32) + proj_b_ref[d]
        tokens = tokens + proj                                         # fused residual

        h2 = _ln(tokens, ln2_g_ref[d], ln2_b_ref[d], 1e-6)
        m1 = _gelu(jnp.dot(h2, fc1_w_ref[d],
                           preferred_element_type=jnp.float32) + fc1_b_ref[d])
        m2 = jnp.dot(m1, fc2_w_ref[d],
                     preferred_element_type=jnp.float32) + fc2_b_ref[d]
        tokens = tokens + m2                                           # fused residual

    tokens = _ln(tokens, norm_g_ref[...], norm_b_ref[...], 1e-6)

    # --- attention pooling (attention_layer linear fused in) ---
    cls_tok = tokens[0:1, :]                                           # [1, EMBED]
    patch_tok = tokens[1:SEQ, :]                                       # [N_PATCH, EMBED]

    sc = jnp.sum(patch_tok * attn_w_ref[...], axis=-1,
                 keepdims=True) + attn_b_ref[...]                      # [N_PATCH, 1]
    sc = sc - jnp.max(sc, axis=0, keepdims=True)
    e = jnp.exp(sc)
    wts = e / jnp.sum(e, axis=0, keepdims=True)                        # exact: sums to 1
    weighted = jnp.sum(wts * patch_tok, axis=0, keepdims=True)         # [1, EMBED]

    combined = jnp.concatenate([cls_tok, weighted], axis=-1)           # [1, 2*EMBED]

    # --- classifier head: LN -> (Dropout=id) -> Linear -> ReLU -> (Dropout=id) -> Linear
    hc = _ln(combined, cls_ln_g_ref[...], cls_ln_b_ref[...], 1e-5)
    h1 = jnp.maximum(jnp.dot(hc, hfc1_w_ref[...],
                             preferred_element_type=jnp.float32) + hfc1_b_ref[...], 0.0)
    logits = jnp.dot(h1, hfc2_w_ref[...],
                     preferred_element_type=jnp.float32) + hfc2_b_ref[...]   # [1, NUM_CLASSES]

    logits_ref[0] = logits
    attnw_ref[0] = wts


# ----------------------------- wrapper ---------------------------------------
def enhanced_vit_forward(p, x):
    Bb = x.shape[0]
    hp = wp = IMG // PATCH

    # Conv2d(kernel=stride=PATCH) == per-patch flatten (c, ph, pw order) then matmul.
    xp = x.reshape(Bb, C, hp, PATCH, wp, PATCH).transpose(0, 2, 4, 1, 3, 5)
    xp = xp.reshape(Bb, N_PATCH, CPP)
    # pad: row 0 = CLS slot (zeros), rows SEQ..S_PAD-1 = padding (zeros)
    xp = jnp.pad(xp, ((0, 0), (1, S_PAD - SEQ), (0, 0)))               # [B, S_PAD, CPP]

    # prefix combines cls token, positional embedding and patch bias, padded to S_PAD.
    pos = p["pos_embed"][0]                                            # [SEQ, EMBED]
    prefix = jnp.concatenate([
        p["cls_token"].reshape(1, EMBED) + pos[:1],
        pos[1:] + p["patch_b"].reshape(1, EMBED),
        jnp.zeros((S_PAD - SEQ, EMBED), jnp.float32)], axis=0)         # [S_PAD, EMBED]

    row = lambda a: a.reshape(1, -1)
    stack = lambda name: jnp.stack([blk[name] for blk in p["blocks"]])
    rowstack = lambda name: jnp.stack([row(blk[name]) for blk in p["blocks"]])

    inputs = [
        xp, prefix, p["patch_w"],
        rowstack("ln1_g"), rowstack("ln1_b"),
        stack("qkv_w"), rowstack("qkv_b"),
        stack("proj_w"), rowstack("proj_b"),
        rowstack("ln2_g"), rowstack("ln2_b"),
        stack("fc1_w"), rowstack("fc1_b"),
        stack("fc2_w"), rowstack("fc2_b"),
        row(p["norm_g"]), row(p["norm_b"]),
        p["attn_w"].reshape(1, EMBED),          # (EMBED,1) -> row vector
        p["attn_b"].reshape(1, 1),
        row(p["cls_ln_g"]), row(p["cls_ln_b"]),
        p["head_fc1_w"], row(p["head_fc1_b"]),
        p["head_fc2_w"], row(p["head_fc2_b"]),
    ]

    def const_spec(a):
        nd = a.ndim
        return pl.BlockSpec(a.shape, lambda b, _nd=nd: (0,) * _nd)

    in_specs = [pl.BlockSpec((1, S_PAD, CPP), lambda b: (b, 0, 0))]
    in_specs += [const_spec(a) for a in inputs[1:]]

    out_shapes = (jax.ShapeDtypeStruct((Bb, 1, NUM_CLASSES), jnp.float32),
                  jax.ShapeDtypeStruct((Bb, N_PATCH, 1), jnp.float32))
    out_specs = (pl.BlockSpec((1, 1, NUM_CLASSES), lambda b: (b, 0, 0)),
                 pl.BlockSpec((1, N_PATCH, 1), lambda b: (b, 0, 0)))

    logits, attn_w = pl.pallas_call(
        _vit_kernel,
        out_shape=out_shapes,
        grid=(Bb,),
        in_specs=in_specs,
        out_specs=out_specs,
        compiler_params=pltpu.CompilerParams(dimension_semantics=("parallel",)),
    )(*inputs)
    return logits.reshape(Bb, NUM_CLASSES), attn_w


# ----------------------------- deterministic init ---------------------------
def init_params(key):
    keys = iter(jax.random.split(key, 128))

    def nrm(shape, scale=0.02):
        return jax.random.normal(next(keys), shape, dtype=jnp.float32) * scale

    zeros = lambda s: jnp.zeros(s, jnp.float32)
    ones = lambda s: jnp.ones(s, jnp.float32)

    blocks = []
    for _ in range(DEPTH):
        blocks.append(dict(
            ln1_g=ones((EMBED,)), ln1_b=zeros((EMBED,)),
            qkv_w=nrm((EMBED, 3 * EMBED)), qkv_b=zeros((3 * EMBED,)),
            proj_w=nrm((EMBED, EMBED)), proj_b=zeros((EMBED,)),
            ln2_g=ones((EMBED,)), ln2_b=zeros((EMBED,)),
            fc1_w=nrm((EMBED, MLP)), fc1_b=zeros((MLP,)),
            fc2_w=nrm((MLP, EMBED)), fc2_b=zeros((EMBED,)),
        ))

    return dict(
        patch_w=nrm((CPP, EMBED)), patch_b=zeros((EMBED,)),
        cls_token=nrm((1, 1, EMBED)),
        pos_embed=nrm((1, SEQ, EMBED)),
        blocks=blocks,
        norm_g=ones((EMBED,)), norm_b=zeros((EMBED,)),
        attn_w=nrm((EMBED, 1)), attn_b=zeros((1,)),
        cls_ln_g=ones((2 * EMBED,)), cls_ln_b=zeros((2 * EMBED,)),
        head_fc1_w=nrm((2 * EMBED, HIDDEN)), head_fc1_b=zeros((HIDDEN,)),
        head_fc2_w=nrm((HIDDEN, NUM_CLASSES)), head_fc2_b=zeros((NUM_CLASSES,)),
    )


# ----------------------------- main ------------------------------------------
if __name__ == "__main__":
    key = jax.random.PRNGKey(0)
    pkey, xkey = jax.random.split(key)
    params = init_params(pkey)
    x = jax.random.normal(xkey, (B, C, IMG, IMG), dtype=jnp.float32)

    fwd = jax.jit(enhanced_vit_forward)
    logits, attn_weights = fwd(params, x)
    jax.block_until_ready((logits, attn_weights))

    assert logits.shape == (B, NUM_CLASSES), logits.shape
    assert attn_weights.shape == (B, N_PATCH, 1), attn_weights.shape
    assert bool(jnp.all(jnp.isfinite(logits)))
    # attention weights are a softmax over patches -> sum to 1 per image
    assert bool(jnp.allclose(jnp.sum(attn_weights, axis=1), 1.0, atol=1e-5))

    print("KERNEL_OK")
</pallas_src>

<mosaic_0001>
module attributes {stable_mosaic.version = 11 : i64} {
  func.func @_vit_kernel(%arg0: i32, %arg1: memref<1x24x48xf32, #tpu.memory_space<vmem>>, %arg2: memref<24x32xf32, #tpu.memory_space<vmem>>, %arg3: memref<48x32xf32, #tpu.memory_space<vmem>>, %arg4: memref<2x1x32xf32, #tpu.memory_space<vmem>>, %arg5: memref<2x1x32xf32, #tpu.memory_space<vmem>>, %arg6: memref<2x32x96xf32, #tpu.memory_space<vmem>>, %arg7: memref<2x1x96xf32, #tpu.memory_space<vmem>>, %arg8: memref<2x32x32xf32, #tpu.memory_space<vmem>>, %arg9: memref<2x1x32xf32, #tpu.memory_space<vmem>>, %arg10: memref<2x1x32xf32, #tpu.memory_space<vmem>>, %arg11: memref<2x1x32xf32, #tpu.memory_space<vmem>>, %arg12: memref<2x32x128xf32, #tpu.memory_space<vmem>>, %arg13: memref<2x1x128xf32, #tpu.memory_space<vmem>>, %arg14: memref<2x128x32xf32, #tpu.memory_space<vmem>>, %arg15: memref<2x1x32xf32, #tpu.memory_space<vmem>>, %arg16: memref<1x32xf32, #tpu.memory_space<vmem>>, %arg17: memref<1x32xf32, #tpu.memory_space<vmem>>, %arg18: memref<1x32xf32, #tpu.memory_space<vmem>>, %arg19: memref<1x1xf32, #tpu.memory_space<vmem>>, %arg20: memref<1x64xf32, #tpu.memory_space<vmem>>, %arg21: memref<1x64xf32, #tpu.memory_space<vmem>>, %arg22: memref<64x64xf32, #tpu.memory_space<vmem>>, %arg23: memref<1x64xf32, #tpu.memory_space<vmem>>, %arg24: memref<64x2xf32, #tpu.memory_space<vmem>>, %arg25: memref<1x2xf32, #tpu.memory_space<vmem>>, %arg26: memref<1x1x2xf32, #tpu.memory_space<vmem>>, %arg27: memref<1x16x1xf32, #tpu.memory_space<vmem>>) attributes {dimension_semantics = [#tpu.dimension_semantics<parallel>], iteration_bounds = array<i64: 2>, scalar_prefetch = 0 : i64, scratch_operands = 0 : i64, tpu.core_type = #tpu.core_type<tc>, window_params = [{transform_indices = @transform_0, window_bounds = array<i64: 1, 24, 48>}, {pipeline_mode = #tpu.pipeline_mode<synchronous>, transform_indices = @transform_1, window_bounds = array<i64: 24, 32>}, {pipeline_mode = #tpu.pipeline_mode<synchronous>, transform_indices = @transform_2, window_bounds = array<i64: 48, 32>}, {pipeline_mode = #tpu.pipeline_mode<synchronous>, transform_indices = @transform_3, window_bounds = array<i64: 2, 1, 32>}, {pipeline_mode = #tpu.pipeline_mode<synchronous>, transform_indices = @transform_4, window_bounds = array<i64: 2, 1, 32>}, {pipeline_mode = #tpu.pipeline_mode<synchronous>, transform_indices = @transform_5, window_bounds = array<i64: 2, 32, 96>}, {pipeline_mode = #tpu.pipeline_mode<synchronous>, transform_indices = @transform_6, window_bounds = array<i64: 2, 1, 96>}, {pipeline_mode = #tpu.pipeline_mode<synchronous>, transform_indices = @transform_7, window_bounds = array<i64: 2, 32, 32>}, {pipeline_mode = #tpu.pipeline_mode<synchronous>, transform_indices = @transform_8, window_bounds = array<i64: 2, 1, 32>}, {pipeline_mode = #tpu.pipeline_mode<synchronous>, transform_indices = @transform_9, window_bounds = array<i64: 2, 1, 32>}, {pipeline_mode = #tpu.pipeline_mode<synchronous>, transform_indices = @transform_10, window_bounds = array<i64: 2, 1, 32>}, {pipeline_mode = #tpu.pipeline_mode<synchronous>, transform_indices = @transform_11, window_bounds = array<i64: 2, 32, 128>}, {pipeline_mode = #tpu.pipeline_mode<synchronous>, transform_indices = @transform_12, window_bounds = array<i64: 2, 1, 128>}, {pipeline_mode = #tpu.pipeline_mode<synchronous>, transform_indices = @transform_13, window_bounds = array<i64: 2, 128, 32>}, {pipeline_mode = #tpu.pipeline_mode<synchronous>, transform_indices = @transform_14, window_bounds = array<i64: 2, 1, 32>}, {pipeline_mode = #tpu.pipeline_mode<synchronous>, transform_indices = @transform_15, window_bounds = array<i64: 1, 32>}, {pipeline_mode = #tpu.pipeline_mode<synchronous>, transform_indices = @transform_16, window_bounds = array<i64: 1, 32>}, {pipeline_mode = #tpu.pipeline_mode<synchronous>, transform_indices = @transform_17, window_bounds = array<i64: 1, 32>}, {pipeline_mode = #tpu.pipeline_mode<synchronous>, transform_indices = @transform_18, window_bounds = array<i64: 1, 1>}, {pipeline_mode = #tpu.pipeline_mode<synchronous>, transform_indices = @transform_19, window_bounds = array<i64: 1, 64>}, {pipeline_mode = #tpu.pipeline_mode<synchronous>, transform_indices = @transform_20, window_bounds = array<i64: 1, 64>}, {pipeline_mode = #tpu.pipeline_mode<synchronous>, transform_indices = @transform_21, window_bounds = array<i64: 64, 64>}, {pipeline_mode = #tpu.pipeline_mode<synchronous>, transform_indices = @transform_22, window_bounds = array<i64: 1, 64>}, {pipeline_mode = #tpu.pipeline_mode<synchronous>, transform_indices = @transform_23, window_bounds = array<i64: 64, 2>}, {pipeline_mode = #tpu.pipeline_mode<synchronous>, transform_indices = @transform_24, window_bounds = array<i64: 1, 2>}, {transform_indices = @transform_25, window_bounds = array<i64: 1, 1, 2>}, {transform_indices = @transform_26, window_bounds = array<i64: 1, 16, 1>}]} {
    %c0 = arith.constant 0 : index
    %c0_0 = arith.constant 0 : index
    %c0_1 = arith.constant 0 : index
    %0 = vector.load %arg1[%c0, %c0_0, %c0_1] : memref<1x24x48xf32, #tpu.memory_space<vmem>>, vector<1x24x48xf32>
    %1 = vector.shape_cast %0 : vector<1x24x48xf32> to vector<24x48xf32>
    %c0_2 = arith.constant 0 : index
    %c0_3 = arith.constant 0 : index
    %2 = vector.load %arg3[%c0_2, %c0_3] : memref<48x32xf32, #tpu.memory_space<vmem>>, vector<48x32xf32>
    %cst = arith.constant dense<0.000000e+00> : vector<24x32xf32>
    %3 = tpu.matmul %1, %2, %cst {dimension_numbers = #tpu.dot_dimension_numbers<[1], [0], [0], [1], [0, 0, 1, 1], [], []>} : vector<24x48xf32>, vector<48x32xf32>, vector<24x32xf32> -> vector<24x32xf32>
    %c0_4 = arith.constant 0 : index
    %c0_5 = arith.constant 0 : index
    %4 = vector.load %arg2[%c0_4, %c0_5] : memref<24x32xf32, #tpu.memory_space<vmem>>, vector<24x32xf32>
    %5 = arith.addf %3, %4 : vector<24x32xf32>
    %6 = tpu.iota {dimensions = array<i32: 1>} : vector<24x24xi32>
    %c17_i32 = arith.constant 17 : i32
    %7 = vector.broadcast %c17_i32 : i32 to vector<24x24xi32>
    %8 = arith.cmpi slt, %6, %7 : vector<24x24xi32>
    %c0_6 = arith.constant 0 : index
    %c0_7 = arith.constant 0 : index
    %c0_8 = arith.constant 0 : index
    %9 = vector.load %arg4[%c0_6, %c0_7, %c0_8] : memref<2x1x32xf32, #tpu.memory_space<vmem>>, vector<1x1x32xf32>
    %10 = vector.shape_cast %9 : vector<1x1x32xf32> to vector<1x32xf32>
    %c0_9 = arith.constant 0 : index
    %c0_10 = arith.constant 0 : index
    %c0_11 = arith.constant 0 : index
    %11 = vector.load %arg5[%c0_9, %c0_10, %c0_11] : memref<2x1x32xf32, #tpu.memory_space<vmem>>, vector<1x1x32xf32>
    %12 = vector.shape_cast %11 : vector<1x1x32xf32> to vector<1x32xf32>
    %cst_12 = arith.constant dense<0.000000e+00> : vector<24xf32>
    %13 = vector.multi_reduction <add>, %5, %cst_12 [1] : vector<24x32xf32> to vector<24xf32>
    %14 = vector.shape_cast %13 : vector<24xf32> to vector<24x1xf32>
    %cst_13 = arith.constant 3.200000e+01 : f32
    %15 = vector.broadcast %cst_13 : f32 to vector<24x1xf32>
    %16 = arith.divf %14, %15 : vector<24x1xf32>
    %17 = vector.broadcast %16 : vector<24x1xf32> to vector<24x32xf32>
    %18 = arith.subf %5, %17 : vector<24x32xf32>
    %19 = arith.mulf %18, %18 : vector<24x32xf32>
    %cst_14 = arith.constant dense<0.000000e+00> : vector<24xf32>
    %20 = vector.multi_reduction <add>, %19, %cst_14 [1] : vector<24x32xf32> to vector<24xf32>
    %21 = vector.shape_cast %20 : vector<24xf32> to vector<24x1xf32>
    %cst_15 = arith.constant 3.200000e+01 : f32
    %22 = vector.broadcast %cst_15 : f32 to vector<24x1xf32>
    %23 = arith.divf %21, %22 : vector<24x1xf32>
    %24 = vector.broadcast %16 : vector<24x1xf32> to vector<24x32xf32>
    %25 = arith.subf %5, %24 : vector<24x32xf32>
    %cst_16 = arith.constant 9.99999997E-7 : f32
    %26 = vector.broadcast %cst_16 : f32 to vector<24x1xf32>
    %27 = arith.addf %23, %26 : vector<24x1xf32>
    %28 = math.rsqrt %27 : vector<24x1xf32>
    %29 = vector.broadcast %28 : vector<24x1xf32> to vector<24x32xf32>
    %30 = arith.mulf %25, %29 : vector<24x32xf32>
    %31 = vector.broadcast %10 : vector<1x32xf32> to vector<24x32xf32>
    %32 = arith.mulf %30, %31 : vector<24x32xf32>
    %33 = vector.broadcast %12 : vector<1x32xf32> to vector<24x32xf32>
    %34 = arith.addf %32, %33 : vector<24x32xf32>
    %c0_17 = arith.constant 0 : index
    %c0_18 = arith.constant 0 : index
    %c0_19 = arith.constant 0 : index
    %35 = vector.load %arg6[%c0_17, %c0_18, %c0_19] : memref<2x32x96xf32, #tpu.memory_space<vmem>>, vector<1x32x96xf32>
    %36 = vector.shape_cast %35 : vector<1x32x96xf32> to vector<32x96xf32>
    %cst_20 = arith.constant dense<0.000000e+00> : vector<24x96xf32>
    %37 = tpu.matmul %34, %36, %cst_20 {dimension_numbers = #tpu.dot_dimension_numbers<[1], [0], [0], [1], [0, 0, 1, 1], [], []>} : vector<24x32xf32>, vector<32x96xf32>, vector<24x96xf32> -> vector<24x96xf32>
    %c0_21 = arith.constant 0 : index
    %c0_22 = arith.constant 0 : index
    %c0_23 = arith.constant 0 : index
    %38 = vector.load %arg7[%c0_21, %c0_22, %c0_23] : memref<2x1x96xf32, #tpu.memory_space<vmem>>, vector<1x1x96xf32>
    %39 = vector.shape_cast %38 : vector<1x1x96xf32> to vector<1x96xf32>
    %40 = vector.broadcast %39 : vector<1x96xf32> to vector<24x96xf32>
    %41 = arith.addf %37, %40 : vector<24x96xf32>
    %42 = vector.extract_strided_slice %41 {offsets = [0, 0], sizes = [24, 8], strides = [1, 1]} : vector<24x96xf32> to vector<24x8xf32>
    %43 = vector.extract_strided_slice %41 {offsets = [0, 32], sizes = [24, 8], strides = [1, 1]} : vector<24x96xf32> to vector<24x8xf32>
    %44 = vector.extract_strided_slice %41 {offsets = [0, 64], sizes = [24, 8], strides = [1, 1]} : vector<24x96xf32> to vector<24x8xf32>
    %45 = tpu.transpose %43, [1, 0] : vector<24x8xf32> -> vector<8x24xf32>
    %cst_24 = arith.constant dense<0.000000e+00> : vector<24x24xf32>
    %46 = tpu.matmul %42, %45, %cst_24 {dimension_numbers = #tpu.dot_dimension_numbers<[1], [0], [0], [1], [0, 0, 1, 1], [], []>} : vector<24x8xf32>, vector<8x24xf32>, vector<24x24xf32> -> vector<24x24xf32>
    %cst_25 = arith.constant 0.353553385 : f32
    %47 = vector.broadcast %cst_25 : f32 to vector<24x24xf32>
    %48 = arith.mulf %46, %47 : vector<24x24xf32>
    %cst_26 = arith.constant -1.000000e+30 : f32
    %49 = vector.broadcast %cst_26 : f32 to vector<24x24xf32>
    %50 = arith.select %8, %48, %49 : vector<24x24xi1>, vector<24x24xf32>
    %cst_27 = arith.constant dense<0xFF800000> : vector<24xf32>
    %51 = vector.multi_reduction <maximumf>, %50, %cst_27 [1] : vector<24x24xf32> to vector<24xf32>
    %52 = vector.shape_cast %51 : vector<24xf32> to vector<24x1xf32>
    %53 = vector.broadcast %52 : vector<24x1xf32> to vector<24x24xf32>
    %54 = arith.subf %50, %53 : vector<24x24xf32>
    %55 = math.exp %54 : vector<24x24xf32>
    %cst_28 = arith.constant dense<0.000000e+00> : vector<24xf32>
    %56 = vector.multi_reduction <add>, %55, %cst_28 [1] : vector<24x24xf32> to vector<24xf32>
    %57 = vector.shape_cast %56 : vector<24xf32> to vector<24x1xf32>
    %58 = tpu.reciprocal %57 {approx = true} : vector<24x1xf32> -> vector<24x1xf32>
    %59 = vector.broadcast %58 : vector<24x1xf32> to vector<24x24xf32>
    %60 = arith.mulf %55, %59 : vector<24x24xf32>
    %cst_29 = arith.constant dense<0.000000e+00> : vector<24x8xf32>
    %61 = tpu.matmul %60, %44, %cst_29 {dimension_numbers = #tpu.dot_dimension_numbers<[1], [0], [0], [1], [0, 0, 1, 1], [], []>} : vector<24x24xf32>, vector<24x8xf32>, vector<24x8xf32> -> vector<24x8xf32>
    %62 = vector.extract_strided_slice %41 {offsets = [0, 8], sizes = [24, 8], strides = [1, 1]} : vector<24x96xf32> to vector<24x8xf32>
    %63 = vector.extract_strided_slice %41 {offsets = [0, 40], sizes = [24, 8], strides = [1, 1]} : vector<24x96xf32> to vector<24x8xf32>
    %64 = vector.extract_strided_slice %41 {offsets = [0, 72], sizes = [24, 8], strides = [1, 1]} : vector<24x96xf32> to vector<24x8xf32>
    %65 = tpu.transpose %63, [1, 0] : vector<24x8xf32> -> vector<8x24xf32>
    %cst_30 = arith.constant dense<0.000000e+00> : vector<24x24xf32>
    %66 = tpu.matmul %62, %65, %cst_30 {dimension_numbers = #tpu.dot_dimension_numbers<[1], [0], [0], [1], [0, 0, 1, 1], [], []>} : vector<24x8xf32>, vector<8x24xf32>, vector<24x24xf32> -> vector<24x24xf32>
    %cst_31 = arith.constant 0.353553385 : f32
    %67 = vector.broadcast %cst_31 : f32 to vector<24x24xf32>
    %68 = arith.mulf %66, %67 : vector<24x24xf32>
    %cst_32 = arith.constant -1.000000e+30 : f32
    %69 = vector.broadcast %cst_32 : f32 to vector<24x24xf32>
    %70 = arith.select %8, %68, %69 : vector<24x24xi1>, vector<24x24xf32>
    %cst_33 = arith.constant dense<0xFF800000> : vector<24xf32>
    %71 = vector.multi_reduction <maximumf>, %70, %cst_33 [1] : vector<24x24xf32> to vector<24xf32>
    %72 = vector.shape_cast %71 : vector<24xf32> to vector<24x1xf32>
    %73 = vector.broadcast %72 : vector<24x1xf32> to vector<24x24xf32>
    %74 = arith.subf %70, %73 : vector<24x24xf32>
    %75 = math.exp %74 : vector<24x24xf32>
    %cst_34 = arith.constant dense<0.000000e+00> : vector<24xf32>
    %76 = vector.multi_reduction <add>, %75, %cst_34 [1] : vector<24x24xf32> to vector<24xf32>
    %77 = vector.shape_cast %76 : vector<24xf32> to vector<24x1xf32>
    %78 = tpu.reciprocal %77 {approx = true} : vector<24x1xf32> -> vector<24x1xf32>
    %79 = vector.broadcast %78 : vector<24x1xf32> to vector<24x24xf32>
    %80 = arith.mulf %75, %79 : vector<24x24xf32>
    %cst_35 = arith.constant dense<0.000000e+00> : vector<24x8xf32>
    %81 = tpu.matmul %80, %64, %cst_35 {dimension_numbers = #tpu.dot_dimension_numbers<[1], [0], [0], [1], [0, 0, 1, 1], [], []>} : vector<24x24xf32>, vector<24x8xf32>, vector<24x8xf32> -> vector<24x8xf32>
    %82 = vector.extract_strided_slice %41 {offsets = [0, 16], sizes = [24, 8], strides = [1, 1]} : vector<24x96xf32> to vector<24x8xf32>
    %83 = vector.extract_strided_slice %41 {offsets = [0, 48], sizes = [24, 8], strides = [1, 1]} : vector<24x96xf32> to vector<24x8xf32>
    %84 = vector.extract_strided_slice %41 {offsets = [0, 80], sizes = [24, 8], strides = [1, 1]} : vector<24x96xf32> to vector<24x8xf32>
    %85 = tpu.transpose %83, [1, 0] : vector<24x8xf32> -> vector<8x24xf32>
    %cst_36 = arith.constant dense<0.000000e+00> : vector<24x24xf32>
    %86 = tpu.matmul %82, %85, %cst_36 {dimension_numbers = #tpu.dot_dimension_numbers<[1], [0], [0], [1], [0, 0, 1, 1], [], []>} : vector<24x8xf32>, vector<8x24xf32>, vector<24x24xf32> -> vector<24x24xf32>
    %cst_37 = arith.constant 0.353553385 : f32
    %87 = vector.broadcast %cst_37 : f32 to vector<24x24xf32>
    %88 = arith.mulf %86, %87 : vector<24x24xf32>
    %cst_38 = arith.constant -1.000000e+30 : f32
    %89 = vector.broadcast %cst_38 : f32 to vector<24x24xf32>
    %90 = arith.select %8, %88, %89 : vector<24x24xi1>, vector<24x24xf32>
    %cst_39 = arith.constant dense<0xFF800000> : vector<24xf32>
    %91 = vector.multi_reduction <maximumf>, %90, %cst_39 [1] : vector<24x24xf32> to vector<24xf32>
    %92 = vector.shape_cast %91 : vector<24xf32> to vector<24x1xf32>
    %93 = vector.broadcast %92 : vector<24x1xf32> to vector<24x24xf32>
    %94 = arith.subf %90, %93 : vector<24x24xf32>
    %95 = math.exp %94 : vector<24x24xf32>
    %cst_40 = arith.constant dense<0.000000e+00> : vector<24xf32>
    %96 = vector.multi_reduction <add>, %95, %cst_40 [1] : vector<24x24xf32> to vector<24xf32>
    %97 = vector.shape_cast %96 : vector<24xf32> to vector<24x1xf32>
    %98 = tpu.reciprocal %97 {approx = true} : vector<24x1xf32> -> vector<24x1xf32>
    %99 = vector.broadcast %98 : vector<24x1xf32> to vector<24x24xf32>
    %100 = arith.mulf %95, %99 : vector<24x24xf32>
    %cst_41 = arith.constant dense<0.000000e+00> : vector<24x8xf32>
    %101 = tpu.matmul %100, %84, %cst_41 {dimension_numbers = #tpu.dot_dimension_numbers<[1], [0], [0], [1], [0, 0, 1, 1], [], []>} : vector<24x24xf32>, vector<24x8xf32>, vector<24x8xf32> -> vector<24x8xf32>
    %102 = vector.extract_strided_slice %41 {offsets = [0, 24], sizes = [24, 8], strides = [1, 1]} : vector<24x96xf32> to vector<24x8xf32>
    %103 = vector.extract_strided_slice %41 {offsets = [0, 56], sizes = [24, 8], strides = [1, 1]} : vector<24x96xf32> to vector<24x8xf32>
    %104 = vector.extract_strided_slice %41 {offsets = [0, 88], sizes = [24, 8], strides = [1, 1]} : vector<24x96xf32> to vector<24x8xf32>
    %105 = tpu.transpose %103, [1, 0] : vector<24x8xf32> -> vector<8x24xf32>
    %cst_42 = arith.constant dense<0.000000e+00> : vector<24x24xf32>
    %106 = tpu.matmul %102, %105, %cst_42 {dimension_numbers = #tpu.dot_dimension_numbers<[1], [0], [0], [1], [0, 0, 1, 1], [], []>} : vector<24x8xf32>, vector<8x24xf32>, vector<24x24xf32> -> vector<24x24xf32>
    %cst_43 = arith.constant 0.353553385 : f32
    %107 = vector.broadcast %cst_43 : f32 to vector<24x24xf32>
    %108 = arith.mulf %106, %107 : vector<24x24xf32>
    %cst_44 = arith.constant -1.000000e+30 : f32
    %109 = vector.broadcast %cst_44 : f32 to vector<24x24xf32>
    %110 = arith.select %8, %108, %109 : vector<24x24xi1>, vector<24x24xf32>
    %cst_45 = arith.constant dense<0xFF800000> : vector<24xf32>
    %111 = vector.multi_reduction <maximumf>, %110, %cst_45 [1] : vector<24x24xf32> to vector<24xf32>
    %112 = vector.shape_cast %111 : vector<24xf32> to vector<24x1xf32>
    %113 = vector.broadcast %112 : vector<24x1xf32> to vector<24x24xf32>
    %114 = arith.subf %110, %113 : vector<24x24xf32>
    %115 = math.exp %114 : vector<24x24xf32>
    %cst_46 = arith.constant dense<0.000000e+00> : vector<24xf32>
    %116 = vector.multi_reduction <add>, %115, %cst_46 [1] : vector<24x24xf32> to vector<24xf32>
    %117 = vector.shape_cast %116 : vector<24xf32> to vector<24x1xf32>
    %118 = tpu.reciprocal %117 {approx = true} : vector<24x1xf32> -> vector<24x1xf32>
    %119 = vector.broadcast %118 : vector<24x1xf32> to vector<24x24xf32>
    %120 = arith.mulf %115, %119 : vector<24x24xf32>
    %cst_47 = arith.constant dense<0.000000e+00> : vector<24x8xf32>
    %121 = tpu.matmul %120, %104, %cst_47 {dimension_numbers = #tpu.dot_dimension_numbers<[1], [0], [0], [1], [0, 0, 1, 1], [], []>} : vector<24x24xf32>, vector<24x8xf32>, vector<24x8xf32> -> vector<24x8xf32>
    %122 = tpu.concatenate %61, %81, %101, %121 in 1 : vector<24x8xf32>, vector<24x8xf32>, vector<24x8xf32>, vector<24x8xf32> -> vector<24x32xf32>
    %c0_48 = arith.constant 0 : index
    %c0_49 = arith.constant 0 : index
    %c0_50 = arith.constant 0 : index
    %123 = vector.load %arg8[%c0_48, %c0_49, %c0_50] : memref<2x32x32xf32, #tpu.memory_space<vmem>>, vector<1x32x32xf32>
    %124 = vector.shape_cast %123 : vector<1x32x32xf32> to vector<32x32xf32>
    %cst_51 = arith.constant dense<0.000000e+00> : vector<24x32xf32>
    %125 = tpu.matmul %122, %124, %cst_51 {dimension_numbers = #tpu.dot_dimension_numbers<[1], [0], [0], [1], [0, 0, 1, 1], [], []>} : vector<24x32xf32>, vector<32x32xf32>, vector<24x32xf32> -> vector<24x32xf32>
    %c0_52 = arith.constant 0 : index
    %c0_53 = arith.constant 0 : index
    %c0_54 = arith.constant 0 : index
    %126 = vector.load %arg9[%c0_52, %c0_53, %c0_54] : memref<2x1x32xf32, #tpu.memory_space<vmem>>, vector<1x1x32xf32>
    %127 = vector.shape_cast %126 : vector<1x1x32xf32> to vector<1x32xf32>
    %128 = vector.broadcast %127 : vector<1x32xf32> to vector<24x32xf32>
    %129 = arith.addf %125, %128 : vector<24x32xf32>
    %130 = arith.addf %5, %129 : vector<24x32xf32>
    %c0_55 = arith.constant 0 : index
    %c0_56 = arith.constant 0 : index
    %c0_57 = arith.constant 0 : index
    %131 = vector.load %arg10[%c0_55, %c0_56, %c0_57] : memref<2x1x32xf32, #tpu.memory_space<vmem>>, vector<1x1x32xf32>
    %132 = vector.shape_cast %131 : vector<1x1x32xf32> to vector<1x32xf32>
    %c0_58 = arith.constant 0 : index
    %c0_59 = arith.constant 0 : index
    %c0_60 = arith.constant 0 : index
    %133 = vector.load %arg11[%c0_58, %c0_59, %c0_60] : memref<2x1x32xf32, #tpu.memory_space<vmem>>, vector<1x1x32xf32>
    %134 = vector.shape_cast %133 : vector<1x1x32xf32> to vector<1x32xf32>
    %cst_61 = arith.constant dense<0.000000e+00> : vector<24xf32>
    %135 = vector.multi_reduction <add>, %130, %cst_61 [1] : vector<24x32xf32> to vector<24xf32>
    %136 = vector.shape_cast %135 : vector<24xf32> to vector<24x1xf32>
    %cst_62 = arith.constant 3.200000e+01 : f32
    %137 = vector.broadcast %cst_62 : f32 to vector<24x1xf32>
    %138 = arith.divf %136, %137 : vector<24x1xf32>
    %139 = vector.broadcast %138 : vector<24x1xf32> to vector<24x32xf32>
    %140 = arith.subf %130, %139 : vector<24x32xf32>
    %141 = arith.mulf %140, %140 : vector<24x32xf32>
    %cst_63 = arith.constant dense<0.000000e+00> : vector<24xf32>
    %142 = vector.multi_reduction <add>, %141, %cst_63 [1] : vector<24x32xf32> to vector<24xf32>
    %143 = vector.shape_cast %142 : vector<24xf32> to vector<24x1xf32>
    %cst_64 = arith.constant 3.200000e+01 : f32
    %144 = vector.broadcast %cst_64 : f32 to vector<24x1xf32>
    %145 = arith.divf %143, %144 : vector<24x1xf32>
    %146 = vector.broadcast %138 : vector<24x1xf32> to vector<24x32xf32>
    %147 = arith.subf %130, %146 : vector<24x32xf32>
    %cst_65 = arith.constant 9.99999997E-7 : f32
    %148 = vector.broadcast %cst_65 : f32 to vector<24x1xf32>
    %149 = arith.addf %145, %148 : vector<24x1xf32>
    %150 = math.rsqrt %149 : vector<24x1xf32>
    %151 = vector.broadcast %150 : vector<24x1xf32> to vector<24x32xf32>
    %152 = arith.mulf %147, %151 : vector<24x32xf32>
    %153 = vector.broadcast %132 : vector<1x32xf32> to vector<24x32xf32>
    %154 = arith.mulf %152, %153 : vector<24x32xf32>
    %155 = vector.broadcast %134 : vector<1x32xf32> to vector<24x32xf32>
    %156 = arith.addf %154, %155 : vector<24x32xf32>
    %c0_66 = arith.constant 0 : index
    %c0_67 = arith.constant 0 : index
    %c0_68 = arith.constant 0 : index
    %157 = vector.load %arg12[%c0_66, %c0_67, %c0_68] : memref<2x32x128xf32, #tpu.memory_space<vmem>>, vector<1x32x128xf32>
    %158 = vector.shape_cast %157 : vector<1x32x128xf32> to vector<32x128xf32>
    %cst_69 = arith.constant dense<0.000000e+00> : vector<24x128xf32>
    %159 = tpu.matmul %156, %158, %cst_69 {dimension_numbers = #tpu.dot_dimension_numbers<[1], [0], [0], [1], [0, 0, 1, 1], [], []>} : vector<24x32xf32>, vector<32x128xf32>, vector<24x128xf32> -> vector<24x128xf32>
    %c0_70 = arith.constant 0 : index
    %c0_71 = arith.constant 0 : index
    %c0_72 = arith.constant 0 : index
    %160 = vector.load %arg13[%c0_70, %c0_71, %c0_72] : memref<2x1x128xf32, #tpu.memory_space<vmem>>, vector<1x1x128xf32>
    %161 = vector.shape_cast %160 : vector<1x1x128xf32> to vector<1x128xf32>
    %162 = vector.broadcast %161 : vector<1x128xf32> to vector<24x128xf32>
    %163 = arith.addf %159, %162 : vector<24x128xf32>
    %cst_73 = arith.constant 0.636619746 : f32
    %164 = math.sqrt %cst_73 : f32
    %cst_74 = arith.constant 5.000000e-01 : f32
    %165 = vector.broadcast %cst_74 : f32 to vector<24x128xf32>
    %166 = arith.mulf %165, %163 : vector<24x128xf32>
    %cst_75 = arith.constant 4.471500e-02 : f32
    %167 = vector.broadcast %cst_75 : f32 to vector<24x128xf32>
    %168 = arith.mulf %167, %163 : vector<24x128xf32>
    %169 = arith.mulf %168, %163 : vector<24x128xf32>
    %170 = arith.mulf %169, %163 : vector<24x128xf32>
    %171 = arith.addf %163, %170 : vector<24x128xf32>
    %172 = vector.broadcast %164 : f32 to vector<24x128xf32>
    %173 = arith.mulf %172, %171 : vector<24x128xf32>
    %174 = math.tanh %173 : vector<24x128xf32>
    %cst_76 = arith.constant 1.000000e+00 : f32
    %175 = vector.broadcast %cst_76 : f32 to vector<24x128xf32>
    %176 = arith.addf %175, %174 : vector<24x128xf32>
    %177 = arith.mulf %166, %176 : vector<24x128xf32>
    %c0_77 = arith.constant 0 : index
    %c0_78 = arith.constant 0 : index
    %c0_79 = arith.constant 0 : index
    %178 = vector.load %arg14[%c0_77, %c0_78, %c0_79] : memref<2x128x32xf32, #tpu.memory_space<vmem>>, vector<1x128x32xf32>
    %179 = vector.shape_cast %178 : vector<1x128x32xf32> to vector<128x32xf32>
    %cst_80 = arith.constant dense<0.000000e+00> : vector<24x32xf32>
    %180 = tpu.matmul %177, %179, %cst_80 {dimension_numbers = #tpu.dot_dimension_numbers<[1], [0], [0], [1], [0, 0, 1, 1], [], []>} : vector<24x128xf32>, vector<128x32xf32>, vector<24x32xf32> -> vector<24x32xf32>
    %c0_81 = arith.constant 0 : index
    %c0_82 = arith.constant 0 : index
    %c0_83 = arith.constant 0 : index
    %181 = vector.load %arg15[%c0_81, %c0_82, %c0_83] : memref<2x1x32xf32, #tpu.memory_space<vmem>>, vector<1x1x32xf32>
    %182 = vector.shape_cast %181 : vector<1x1x32xf32> to vector<1x32xf32>
    %183 = vector.broadcast %182 : vector<1x32xf32> to vector<24x32xf32>
    %184 = arith.addf %180, %183 : vector<24x32xf32>
    %185 = arith.addf %130, %184 : vector<24x32xf32>
    %c1 = arith.constant 1 : index
    %c0_84 = arith.constant 0 : index
    %c0_85 = arith.constant 0 : index
    %186 = vector.load %arg4[%c1, %c0_84, %c0_85] : memref<2x1x32xf32, #tpu.memory_space<vmem>>, vector<1x1x32xf32>
    %187 = vector.shape_cast %186 : vector<1x1x32xf32> to vector<1x32xf32>
    %c1_86 = arith.constant 1 : index
    %c0_87 = arith.constant 0 : index
    %c0_88 = arith.constant 0 : index
    %188 = vector.load %arg5[%c1_86, %c0_87, %c0_88] : memref<2x1x32xf32, #tpu.memory_space<vmem>>, vector<1x1x32xf32>
    %189 = vector.shape_cast %188 : vector<1x1x32xf32> to vector<1x32xf32>
    %cst_89 = arith.constant dense<0.000000e+00> : vector<24xf32>
    %190 = vector.multi_reduction <add>, %185, %cst_89 [1] : vector<24x32xf32> to vector<24xf32>
    %191 = vector.shape_cast %190 : vector<24xf32> to vector<24x1xf32>
    %cst_90 = arith.constant 3.200000e+01 : f32
    %192 = vector.broadcast %cst_90 : f32 to vector<24x1xf32>
    %193 = arith.divf %191, %192 : vector<24x1xf32>
    %194 = vector.broadcast %193 : vector<24x1xf32> to vector<24x32xf32>
    %195 = arith.subf %185, %194 : vector<24x32xf32>
    %196 = arith.mulf %195, %195 : vector<24x32xf32>
    %cst_91 = arith.constant dense<0.000000e+00> : vector<24xf32>
    %197 = vector.multi_reduction <add>, %196, %cst_91 [1] : vector<24x32xf32> to vector<24xf32>
    %198 = vector.shape_cast %197 : vector<24xf32> to vector<24x1xf32>
    %cst_92 = arith.constant 3.200000e+01 : f32
    %199 = vector.broadcast %cst_92 : f32 to vector<24x1xf32>
    %200 = arith.divf %198, %199 : vector<24x1xf32>
    %201 = vector.broadcast %193 : vector<24x1xf32> to vector<24x32xf32>
    %202 = arith.subf %185, %201 : vector<24x32xf32>
    %cst_93 = arith.constant 9.99999997E-7 : f32
    %203 = vector.broadcast %cst_93 : f32 to vector<24x1xf32>
    %204 = arith.addf %200, %203 : vector<24x1xf32>
    %205 = math.rsqrt %204 : vector<24x1xf32>
    %206 = vector.broadcast %205 : vector<24x1xf32> to vector<24x32xf32>
    %207 = arith.mulf %202, %206 : vector<24x32xf32>
    %208 = vector.broadcast %187 : vector<1x32xf32> to vector<24x32xf32>
    %209 = arith.mulf %207, %208 : vector<24x32xf32>
    %210 = vector.broadcast %189 : vector<1x32xf32> to vector<24x32xf32>
    %211 = arith.addf %209, %210 : vector<24x32xf32>
    %c1_94 = arith.constant 1 : index
    %c0_95 = arith.constant 0 : index
    %c0_96 = arith.constant 0 : index
    %212 = vector.load %arg6[%c1_94, %c0_95, %c0_96] : memref<2x32x96xf32, #tpu.memory_space<vmem>>, vector<1x32x96xf32>
    %213 = vector.shape_cast %212 : vector<1x32x96xf32> to vector<32x96xf32>
    %cst_97 = arith.constant dense<0.000000e+00> : vector<24x96xf32>
    %214 = tpu.matmul %211, %213, %cst_97 {dimension_numbers = #tpu.dot_dimension_numbers<[1], [0], [0], [1], [0, 0, 1, 1], [], []>} : vector<24x32xf32>, vector<32x96xf32>, vector<24x96xf32> -> vector<24x96xf32>
    %c1_98 = arith.constant 1 : index
    %c0_99 = arith.constant 0 : index
    %c0_100 = arith.constant 0 : index
    %215 = vector.load %arg7[%c1_98, %c0_99, %c0_100] : memref<2x1x96xf32, #tpu.memory_space<vmem>>, vector<1x1x96xf32>
    %216 = vector.shape_cast %215 : vector<1x1x96xf32> to vector<1x96xf32>
    %217 = vector.broadcast %216 : vector<1x96xf32> to vector<24x96xf32>
    %218 = arith.addf %214, %217 : vector<24x96xf32>
    %219 = vector.extract_strided_slice %218 {offsets = [0, 0], sizes = [24, 8], strides = [1, 1]} : vector<24x96xf32> to vector<24x8xf32>
    %220 = vector.extract_strided_slice %218 {offsets = [0, 32], sizes = [24, 8], strides = [1, 1]} : vector<24x96xf32> to vector<24x8xf32>
    %221 = vector.extract_strided_slice %218 {offsets = [0, 64], sizes = [24, 8], strides = [1, 1]} : vector<24x96xf32> to vector<24x8xf32>
    %222 = tpu.transpose %220, [1, 0] : vector<24x8xf32> -> vector<8x24xf32>
    %cst_101 = arith.constant dense<0.000000e+00> : vector<24x24xf32>
    %223 = tpu.matmul %219, %222, %cst_101 {dimension_numbers = #tpu.dot_dimension_numbers<[1], [0], [0], [1], [0, 0, 1, 1], [], []>} : vector<24x8xf32>, vector<8x24xf32>, vector<24x24xf32> -> vector<24x24xf32>
    %cst_102 = arith.constant 0.353553385 : f32
    %224 = vector.broadcast %cst_102 : f32 to vector<24x24xf32>
    %225 = arith.mulf %223, %224 : vector<24x24xf32>
    %cst_103 = arith.constant -1.000000e+30 : f32
    %226 = vector.broadcast %cst_103 : f32 to vector<24x24xf32>
    %227 = arith.select %8, %225, %226 : vector<24x24xi1>, vector<24x24xf32>
    %cst_104 = arith.constant dense<0xFF800000> : vector<24xf32>
    %228 = vector.multi_reduction <maximumf>, %227, %cst_104 [1] : vector<24x24xf32> to vector<24xf32>
    %229 = vector.shape_cast %228 : vector<24xf32> to vector<24x1xf32>
    %230 = vector.broadcast %229 : vector<24x1xf32> to vector<24x24xf32>
    %231 = arith.subf %227, %230 : vector<24x24xf32>
    %232 = math.exp %231 : vector<24x24xf32>
    %cst_105 = arith.constant dense<0.000000e+00> : vector<24xf32>
    %233 = vector.multi_reduction <add>, %232, %cst_105 [1] : vector<24x24xf32> to vector<24xf32>
    %234 = vector.shape_cast %233 : vector<24xf32> to vector<24x1xf32>
    %235 = tpu.reciprocal %234 {approx = true} : vector<24x1xf32> -> vector<24x1xf32>
    %236 = vector.broadcast %235 : vector<24x1xf32> to vector<24x24xf32>
    %237 = arith.mulf %232, %236 : vector<24x24xf32>
    %cst_106 = arith.constant dense<0.000000e+00> : vector<24x8xf32>
    %238 = tpu.matmul %237, %221, %cst_106 {dimension_numbers = #tpu.dot_dimension_numbers<[1], [0], [0], [1], [0, 0, 1, 1], [], []>} : vector<24x24xf32>, vector<24x8xf32>, vector<24x8xf32> -> vector<24x8xf32>
    %239 = vector.extract_strided_slice %218 {offsets = [0, 8], sizes = [24, 8], strides = [1, 1]} : vector<24x96xf32> to vector<24x8xf32>
    %240 = vector.extract_strided_slice %218 {offsets = [0, 40], sizes = [24, 8], strides = [1, 1]} : vector<24x96xf32> to vector<24x8xf32>
    %241 = vector.extract_strided_slice %218 {offsets = [0, 72], sizes = [24, 8], strides = [1, 1]} : vector<24x96xf32> to vector<24x8xf32>
    %242 = tpu.transpose %240, [1, 0] : vector<24x8xf32> -> vector<8x24xf32>
    %cst_107 = arith.constant dense<0.000000e+00> : vector<24x24xf32>
    %243 = tpu.matmul %239, %242, %cst_107 {dimension_numbers = #tpu.dot_dimension_numbers<[1], [0], [0], [1], [0, 0, 1, 1], [], []>} : vector<24x8xf32>, vector<8x24xf32>, vector<24x24xf32> -> vector<24x24xf32>
    %cst_108 = arith.constant 0.353553385 : f32
    %244 = vector.broadcast %cst_108 : f32 to vector<24x24xf32>
    %245 = arith.mulf %243, %244 : vector<24x24xf32>
    %cst_109 = arith.constant -1.000000e+30 : f32
    %246 = vector.broadcast %cst_109 : f32 to vector<24x24xf32>
    %247 = arith.select %8, %245, %246 : vector<24x24xi1>, vector<24x24xf32>
    %cst_110 = arith.constant dense<0xFF800000> : vector<24xf32>
    %248 = vector.multi_reduction <maximumf>, %247, %cst_110 [1] : vector<24x24xf32> to vector<24xf32>
    %249 = vector.shape_cast %248 : vector<24xf32> to vector<24x1xf32>
    %250 = vector.broadcast %249 : vector<24x1xf32> to vector<24x24xf32>
    %251 = arith.subf %247, %250 : vector<24x24xf32>
    %252 = math.exp %251 : vector<24x24xf32>
    %cst_111 = arith.constant dense<0.000000e+00> : vector<24xf32>
    %253 = vector.multi_reduction <add>, %252, %cst_111 [1] : vector<24x24xf32> to vector<24xf32>
    %254 = vector.shape_cast %253 : vector<24xf32> to vector<24x1xf32>
    %255 = tpu.reciprocal %254 {approx = true} : vector<24x1xf32> -> vector<24x1xf32>
    %256 = vector.broadcast %255 : vector<24x1xf32> to vector<24x24xf32>
    %257 = arith.mulf %252, %256 : vector<24x24xf32>
    %cst_112 = arith.constant dense<0.000000e+00> : vector<24x8xf32>
    %258 = tpu.matmul %257, %241, %cst_112 {dimension_numbers = #tpu.dot_dimension_numbers<[1], [0], [0], [1], [0, 0, 1, 1], [], []>} : vector<24x24xf32>, vector<24x8xf32>, vector<24x8xf32> -> vector<24x8xf32>
    %259 = vector.extract_strided_slice %218 {offsets = [0, 16], sizes = [24, 8], strides = [1, 1]} : vector<24x96xf32> to vector<24x8xf32>
    %260 = vector.extract_strided_slice %218 {offsets = [0, 48], sizes = [24, 8], strides = [1, 1]} : vector<24x96xf32> to vector<24x8xf32>
    %261 = vector.extract_strided_slice %218 {offsets = [0, 80], sizes = [24, 8], strides = [1, 1]} : vector<24x96xf32> to vector<24x8xf32>
    %262 = tpu.transpose %260, [1, 0] : vector<24x8xf32> -> vector<8x24xf32>
    %cst_113 = arith.constant dense<0.000000e+00> : vector<24x24xf32>
    %263 = tpu.matmul %259, %262, %cst_113 {dimension_numbers = #tpu.dot_dimension_numbers<[1], [0], [0], [1], [0, 0, 1, 1], [], []>} : vector<24x8xf32>, vector<8x24xf32>, vector<24x24xf32> -> vector<24x24xf32>
    %cst_114 = arith.constant 0.353553385 : f32
    %264 = vector.broadcast %cst_114 : f32 to vector<24x24xf32>
    %265 = arith.mulf %263, %264 : vector<24x24xf32>
    %cst_115 = arith.constant -1.000000e+30 : f32
    %266 = vector.broadcast %cst_115 : f32 to vector<24x24xf32>
    %267 = arith.select %8, %265, %266 : vector<24x24xi1>, vector<24x24xf32>
    %cst_116 = arith.constant dense<0xFF800000> : vector<24xf32>
    %268 = vector.multi_reduction <maximumf>, %267, %cst_116 [1] : vector<24x24xf32> to vector<24xf32>
    %269 = vector.shape_cast %268 : vector<24xf32> to vector<24x1xf32>
    %270 = vector.broadcast %269 : vector<24x1xf32> to vector<24x24xf32>
    %271 = arith.subf %267, %270 : vector<24x24xf32>
    %272 = math.exp %271 : vector<24x24xf32>
    %cst_117 = arith.constant dense<0.000000e+00> : vector<24xf32>
    %273 = vector.multi_reduction <add>, %272, %cst_117 [1] : vector<24x24xf32> to vector<24xf32>
    %274 = vector.shape_cast %273 : vector<24xf32> to vector<24x1xf32>
    %275 = tpu.reciprocal %274 {approx = true} : vector<24x1xf32> -> vector<24x1xf32>
    %276 = vector.broadcast %275 : vector<24x1xf32> to vector<24x24xf32>
    %277 = arith.mulf %272, %276 : vector<24x24xf32>
    %cst_118 = arith.constant dense<0.000000e+00> : vector<24x8xf32>
    %278 = tpu.matmul %277, %261, %cst_118 {dimension_numbers = #tpu.dot_dimension_numbers<[1], [0], [0], [1], [0, 0, 1, 1], [], []>} : vector<24x24xf32>, vector<24x8xf32>, vector<24x8xf32> -> vector<24x8xf32>
    %279 = vector.extract_strided_slice %218 {offsets = [0, 24], sizes = [24, 8], strides = [1, 1]} : vector<24x96xf32> to vector<24x8xf32>
    %280 = vector.extract_strided_slice %218 {offsets = [0, 56], sizes = [24, 8], strides = [1, 1]} : vector<24x96xf32> to vector<24x8xf32>
    %281 = vector.extract_strided_slice %218 {offsets = [0, 88], sizes = [24, 8], strides = [1, 1]} : vector<24x96xf32> to vector<24x8xf32>
    %282 = tpu.transpose %280, [1, 0] : vector<24x8xf32> -> vector<8x24xf32>
    %cst_119 = arith.constant dense<0.000000e+00> : vector<24x24xf32>
    %283 = tpu.matmul %279, %282, %cst_119 {dimension_numbers = #tpu.dot_dimension_numbers<[1], [0], [0], [1], [0, 0, 1, 1], [], []>} : vector<24x8xf32>, vector<8x24xf32>, vector<24x24xf32> -> vector<24x24xf32>
    %cst_120 = arith.constant 0.353553385 : f32
    %284 = vector.broadcast %cst_120 : f32 to vector<24x24xf32>
    %285 = arith.mulf %283, %284 : vector<24x24xf32>
    %cst_121 = arith.constant -1.000000e+30 : f32
    %286 = vector.broadcast %cst_121 : f32 to vector<24x24xf32>
    %287 = arith.select %8, %285, %286 : vector<24x24xi1>, vector<24x24xf32>
    %cst_122 = arith.constant dense<0xFF800000> : vector<24xf32>
    %288 = vector.multi_reduction <maximumf>, %287, %cst_122 [1] : vector<24x24xf32> to vector<24xf32>
    %289 = vector.shape_cast %288 : vector<24xf32> to vector<24x1xf32>
    %290 = vector.broadcast %289 : vector<24x1xf32> to vector<24x24xf32>
    %291 = arith.subf %287, %290 : vector<24x24xf32>
    %292 = math.exp %291 : vector<24x24xf32>
    %cst_123 = arith.constant dense<0.000000e+00> : vector<24xf32>
    %293 = vector.multi_reduction <add>, %292, %cst_123 [1] : vector<24x24xf32> to vector<24xf32>
    %294 = vector.shape_cast %293 : vector<24xf32> to vector<24x1xf32>
    %295 = tpu.reciprocal %294 {approx = true} : vector<24x1xf32> -> vector<24x1xf32>
    %296 = vector.broadcast %295 : vector<24x1xf32> to vector<24x24xf32>
    %297 = arith.mulf %292, %296 : vector<24x24xf32>
    %cst_124 = arith.constant dense<0.000000e+00> : vector<24x8xf32>
    %298 = tpu.matmul %297, %281, %cst_124 {dimension_numbers = #tpu.dot_dimension_numbers<[1], [0], [0], [1], [0, 0, 1, 1], [], []>} : vector<24x24xf32>, vector<24x8xf32>, vector<24x8xf32> -> vector<24x8xf32>
    %299 = tpu.concatenate %238, %258, %278, %298 in 1 : vector<24x8xf32>, vector<24x8xf32>, vector<24x8xf32>, vector<24x8xf32> -> vector<24x32xf32>
    %c1_125 = arith.constant 1 : index
    %c0_126 = arith.constant 0 : index
    %c0_127 = arith.constant 0 : index
    %300 = vector.load %arg8[%c1_125, %c0_126, %c0_127] : memref<2x32x32xf32, #tpu.memory_space<vmem>>, vector<1x32x32xf32>
    %301 = vector.shape_cast %300 : vector<1x32x32xf32> to vector<32x32xf32>
    %cst_128 = arith.constant dense<0.000000e+00> : vector<24x32xf32>
    %302 = tpu.matmul %299, %301, %cst_128 {dimension_numbers = #tpu.dot_dimension_numbers<[1], [0], [0], [1], [0, 0, 1, 1], [], []>} : vector<24x32xf32>, vector<32x32xf32>, vector<24x32xf32> -> vector<24x32xf32>
    %c1_129 = arith.constant 1 : index
    %c0_130 = arith.constant 0 : index
    %c0_131 = arith.constant 0 : index
    %303 = vector.load %arg9[%c1_129, %c0_130, %c0_131] : memref<2x1x32xf32, #tpu.memory_space<vmem>>, vector<1x1x32xf32>
    %304 = vector.shape_cast %303 : vector<1x1x32xf32> to vector<1x32xf32>
    %305 = vector.broadcast %304 : vector<1x32xf32> to vector<24x32xf32>
    %306 = arith.addf %302, %305 : vector<24x32xf32>
    %307 = arith.addf %185, %306 : vector<24x32xf32>
    %c1_132 = arith.constant 1 : index
    %c0_133 = arith.constant 0 : index
    %c0_134 = arith.constant 0 : index
    %308 = vector.load %arg10[%c1_132, %c0_133, %c0_134] : memref<2x1x32xf32, #tpu.memory_space<vmem>>, vector<1x1x32xf32>
    %309 = vector.shape_cast %308 : vector<1x1x32xf32> to vector<1x32xf32>
    %c1_135 = arith.constant 1 : index
    %c0_136 = arith.constant 0 : index
    %c0_137 = arith.constant 0 : index
    %310 = vector.load %arg11[%c1_135, %c0_136, %c0_137] : memref<2x1x32xf32, #tpu.memory_space<vmem>>, vector<1x1x32xf32>
    %311 = vector.shape_cast %310 : vector<1x1x32xf32> to vector<1x32xf32>
    %cst_138 = arith.constant dense<0.000000e+00> : vector<24xf32>
    %312 = vector.multi_reduction <add>, %307, %cst_138 [1] : vector<24x32xf32> to vector<24xf32>
    %313 = vector.shape_cast %312 : vector<24xf32> to vector<24x1xf32>
    %cst_139 = arith.constant 3.200000e+01 : f32
    %314 = vector.broadcast %cst_139 : f32 to vector<24x1xf32>
    %315 = arith.divf %313, %314 : vector<24x1xf32>
    %316 = vector.broadcast %315 : vector<24x1xf32> to vector<24x32xf32>
    %317 = arith.subf %307, %316 : vector<24x32xf32>
    %318 = arith.mulf %317, %317 : vector<24x32xf32>
    %cst_140 = arith.constant dense<0.000000e+00> : vector<24xf32>
    %319 = vector.multi_reduction <add>, %318, %cst_140 [1] : vector<24x32xf32> to vector<24xf32>
    %320 = vector.shape_cast %319 : vector<24xf32> to vector<24x1xf32>
    %cst_141 = arith.constant 3.200000e+01 : f32
    %321 = vector.broadcast %cst_141 : f32 to vector<24x1xf32>
    %322 = arith.divf %320, %321 : vector<24x1xf32>
    %323 = vector.broadcast %315 : vector<24x1xf32> to vector<24x32xf32>
    %324 = arith.subf %307, %323 : vector<24x32xf32>
    %cst_142 = arith.constant 9.99999997E-7 : f32
    %325 = vector.broadcast %cst_142 : f32 to vector<24x1xf32>
    %326 = arith.addf %322, %325 : vector<24x1xf32>
    %327 = math.rsqrt %326 : vector<24x1xf32>
    %328 = vector.broadcast %327 : vector<24x1xf32> to vector<24x32xf32>
    %329 = arith.mulf %324, %328 : vector<24x32xf32>
    %330 = vector.broadcast %309 : vector<1x32xf32> to vector<24x32xf32>
    %331 = arith.mulf %329, %330 : vector<24x32xf32>
    %332 = vector.broadcast %311 : vector<1x32xf32> to vector<24x32xf32>
    %333 = arith.addf %331, %332 : vector<24x32xf32>
    %c1_143 = arith.constant 1 : index
    %c0_144 = arith.constant 0 : index
    %c0_145 = arith.constant 0 : index
    %334 = vector.load %arg12[%c1_143, %c0_144, %c0_145] : memref<2x32x128xf32, #tpu.memory_space<vmem>>, vector<1x32x128xf32>
    %335 = vector.shape_cast %334 : vector<1x32x128xf32> to vector<32x128xf32>
    %cst_146 = arith.constant dense<0.000000e+00> : vector<24x128xf32>
    %336 = tpu.matmul %333, %335, %cst_146 {dimension_numbers = #tpu.dot_dimension_numbers<[1], [0], [0], [1], [0, 0, 1, 1], [], []>} : vector<24x32xf32>, vector<32x128xf32>, vector<24x128xf32> -> vector<24x128xf32>
    %c1_147 = arith.constant 1 : index
    %c0_148 = arith.constant 0 : index
    %c0_149 = arith.constant 0 : index
    %337 = vector.load %arg13[%c1_147, %c0_148, %c0_149] : memref<2x1x128xf32, #tpu.memory_space<vmem>>, vector<1x1x128xf32>
    %338 = vector.shape_cast %337 : vector<1x1x128xf32> to vector<1x128xf32>
    %339 = vector.broadcast %338 : vector<1x128xf32> to vector<24x128xf32>
    %340 = arith.addf %336, %339 : vector<24x128xf32>
    %cst_150 = arith.constant 0.636619746 : f32
    %341 = math.sqrt %cst_150 : f32
    %cst_151 = arith.constant 5.000000e-01 : f32
    %342 = vector.broadcast %cst_151 : f32 to vector<24x128xf32>
    %343 = arith.mulf %342, %340 : vector<24x128xf32>
    %cst_152 = arith.constant 4.471500e-02 : f32
    %344 = vector.broadcast %cst_152 : f32 to vector<24x128xf32>
    %345 = arith.mulf %344, %340 : vector<24x128xf32>
    %346 = arith.mulf %345, %340 : vector<24x128xf32>
    %347 = arith.mulf %346, %340 : vector<24x128xf32>
    %348 = arith.addf %340, %347 : vector<24x128xf32>
    %349 = vector.broadcast %341 : f32 to vector<24x128xf32>
    %350 = arith.mulf %349, %348 : vector<24x128xf32>
    %351 = math.tanh %350 : vector<24x128xf32>
    %cst_153 = arith.constant 1.000000e+00 : f32
    %352 = vector.broadcast %cst_153 : f32 to vector<24x128xf32>
    %353 = arith.addf %352, %351 : vector<24x128xf32>
    %354 = arith.mulf %343, %353 : vector<24x128xf32>
    %c1_154 = arith.constant 1 : index
    %c0_155 = arith.constant 0 : index
    %c0_156 = arith.constant 0 : index
    %355 = vector.load %arg14[%c1_154, %c0_155, %c0_156] : memref<2x128x32xf32, #tpu.memory_space<vmem>>, vector<1x128x32xf32>
    %356 = vector.shape_cast %355 : vector<1x128x32xf32> to vector<128x32xf32>
    %cst_157 = arith.constant dense<0.000000e+00> : vector<24x32xf32>
    %357 = tpu.matmul %354, %356, %cst_157 {dimension_numbers = #tpu.dot_dimension_numbers<[1], [0], [0], [1], [0, 0, 1, 1], [], []>} : vector<24x128xf32>, vector<128x32xf32>, vector<24x32xf32> -> vector<24x32xf32>
    %c1_158 = arith.constant 1 : index
    %c0_159 = arith.constant 0 : index
    %c0_160 = arith.constant 0 : index
    %358 = vector.load %arg15[%c1_158, %c0_159, %c0_160] : memref<2x1x32xf32, #tpu.memory_space<vmem>>, vector<1x1x32xf32>
    %359 = vector.shape_cast %358 : vector<1x1x32xf32> to vector<1x32xf32>
    %360 = vector.broadcast %359 : vector<1x32xf32> to vector<24x32xf32>
    %361 = arith.addf %357, %360 : vector<24x32xf32>
    %362 = arith.addf %307, %361 : vector<24x32xf32>
    %c0_161 = arith.constant 0 : index
    %c0_162 = arith.constant 0 : index
    %363 = vector.load %arg16[%c0_161, %c0_162] : memref<1x32xf32, #tpu.memory_space<vmem>>, vector<1x32xf32>
    %c0_163 = arith.constant 0 : index
    %c0_164 = arith.constant 0 : index
    %364 = vector.load %arg17[%c0_163, %c0_164] : memref<1x32xf32, #tpu.memory_space<vmem>>, vector<1x32xf32>
    %cst_165 = arith.constant dense<0.000000e+00> : vector<24xf32>
    %365 = vector.multi_reduction <add>, %362, %cst_165 [1] : vector<24x32xf32> to vector<24xf32>
    %366 = vector.shape_cast %365 : vector<24xf32> to vector<24x1xf32>
    %cst_166 = arith.constant 3.200000e+01 : f32
    %367 = vector.broadcast %cst_166 : f32 to vector<24x1xf32>
    %368 = arith.divf %366, %367 : vector<24x1xf32>
    %369 = vector.broadcast %368 : vector<24x1xf32> to vector<24x32xf32>
    %370 = arith.subf %362, %369 : vector<24x32xf32>
    %371 = arith.mulf %370, %370 : vector<24x32xf32>
    %cst_167 = arith.constant dense<0.000000e+00> : vector<24xf32>
    %372 = vector.multi_reduction <add>, %371, %cst_167 [1] : vector<24x32xf32> to vector<24xf32>
    %373 = vector.shape_cast %372 : vector<24xf32> to vector<24x1xf32>
    %cst_168 = arith.constant 3.200000e+01 : f32
    %374 = vector.broadcast %cst_168 : f32 to vector<24x1xf32>
    %375 = arith.divf %373, %374 : vector<24x1xf32>
    %376 = vector.broadcast %368 : vector<24x1xf32> to vector<24x32xf32>
    %377 = arith.subf %362, %376 : vector<24x32xf32>
    %cst_169 = arith.constant 9.99999997E-7 : f32
    %378 = vector.broadcast %cst_169 : f32 to vector<24x1xf32>
    %379 = arith.addf %375, %378 : vector<24x1xf32>
    %380 = math.rsqrt %379 : vector<24x1xf32>
    %381 = vector.broadcast %380 : vector<24x1xf32> to vector<24x32xf32>
    %382 = arith.mulf %377, %381 : vector<24x32xf32>
    %383 = vector.broadcast %363 : vector<1x32xf32> to vector<24x32xf32>
    %384 = arith.mulf %382, %383 : vector<24x32xf32>
    %385 = vector.broadcast %364 : vector<1x32xf32> to vector<24x32xf32>
    %386 = arith.addf %384, %385 : vector<24x32xf32>
    %387 = vector.extract_strided_slice %386 {offsets = [0, 0], sizes = [1, 32], strides = [1, 1]} : vector<24x32xf32> to vector<1x32xf32>
    %388 = vector.extract_strided_slice %386 {offsets = [1, 0], sizes = [16, 32], strides = [1, 1]} : vector<24x32xf32> to vector<16x32xf32>
    %c0_170 = arith.constant 0 : index
    %c0_171 = arith.constant 0 : index
    %389 = vector.load %arg18[%c0_170, %c0_171] : memref<1x32xf32, #tpu.memory_space<vmem>>, vector<1x32xf32>
    %390 = vector.broadcast %389 : vector<1x32xf32> to vector<16x32xf32>
    %391 = arith.mulf %388, %390 : vector<16x32xf32>
    %cst_172 = arith.constant dense<0.000000e+00> : vector<16xf32>
    %392 = vector.multi_reduction <add>, %391, %cst_172 [1] : vector<16x32xf32> to vector<16xf32>
    %393 = vector.shape_cast %392 : vector<16xf32> to vector<16x1xf32>
    %c0_173 = arith.constant 0 : index
    %c0_174 = arith.constant 0 : index
    %394 = vector.load %arg19[%c0_173, %c0_174] : memref<1x1xf32, #tpu.memory_space<vmem>>, vector<1x1xf32>
    %395 = vector.broadcast %394 : vector<1x1xf32> to vector<16x1xf32>
    %396 = arith.addf %393, %395 : vector<16x1xf32>
    %cst_175 = arith.constant dense<0xFF800000> : vector<1xf32>
    %397 = vector.multi_reduction <maximumf>, %396, %cst_175 [0] : vector<16x1xf32> to vector<1xf32>
    %398 = vector.shape_cast %397 : vector<1xf32> to vector<1x1xf32>
    %399 = vector.broadcast %398 : vector<1x1xf32> to vector<16x1xf32>
    %400 = arith.subf %396, %399 : vector<16x1xf32>
    %401 = math.exp %400 : vector<16x1xf32>
    %cst_176 = arith.constant dense<0.000000e+00> : vector<1xf32>
    %402 = vector.multi_reduction <add>, %401, %cst_176 [0] : vector<16x1xf32> to vector<1xf32>
    %403 = vector.shape_cast %402 : vector<1xf32> to vector<1x1xf32>
    %404 = vector.broadcast %403 : vector<1x1xf32> to vector<16x1xf32>
    %405 = arith.divf %401, %404 : vector<16x1xf32>
    %406 = vector.broadcast %405 : vector<16x1xf32> to vector<16x32xf32>
    %407 = arith.mulf %406, %388 : vector<16x32xf32>
    %cst_177 = arith.constant dense<0.000000e+00> : vector<32xf32>
    %408 = vector.multi_reduction <add>, %407, %cst_177 [0] : vector<16x32xf32> to vector<32xf32>
    %409 = vector.shape_cast %408 : vector<32xf32> to vector<1x32xf32>
    %410 = tpu.concatenate %387, %409 in 1 : vector<1x32xf32>, vector<1x32xf32> -> vector<1x64xf32>
    %c0_178 = arith.constant 0 : index
    %c0_179 = arith.constant 0 : index
    %411 = vector.load %arg20[%c0_178, %c0_179] : memref<1x64xf32, #tpu.memory_space<vmem>>, vector<1x64xf32>
    %c0_180 = arith.constant 0 : index
    %c0_181 = arith.constant 0 : index
    %412 = vector.load %arg21[%c0_180, %c0_181] : memref<1x64xf32, #tpu.memory_space<vmem>>, vector<1x64xf32>
    %cst_182 = arith.constant dense<0.000000e+00> : vector<1xf32>
    %413 = vector.multi_reduction <add>, %410, %cst_182 [1] : vector<1x64xf32> to vector<1xf32>
    %414 = vector.shape_cast %413 : vector<1xf32> to vector<1x1xf32>
    %cst_183 = arith.constant 6.400000e+01 : f32
    %415 = vector.broadcast %cst_183 : f32 to vector<1x1xf32>
    %416 = arith.divf %414, %415 : vector<1x1xf32>
    %417 = vector.broadcast %416 : vector<1x1xf32> to vector<1x64xf32>
    %418 = arith.subf %410, %417 : vector<1x64xf32>
    %419 = arith.mulf %418, %418 : vector<1x64xf32>
    %cst_184 = arith.constant dense<0.000000e+00> : vector<1xf32>
    %420 = vector.multi_reduction <add>, %419, %cst_184 [1] : vector<1x64xf32> to vector<1xf32>
    %421 = vector.shape_cast %420 : vector<1xf32> to vector<1x1xf32>
    %cst_185 = arith.constant 6.400000e+01 : f32
    %422 = vector.broadcast %cst_185 : f32 to vector<1x1xf32>
    %423 = arith.divf %421, %422 : vector<1x1xf32>
    %424 = vector.broadcast %416 : vector<1x1xf32> to vector<1x64xf32>
    %425 = arith.subf %410, %424 : vector<1x64xf32>
    %cst_186 = arith.constant 9.99999974E-6 : f32
    %426 = vector.broadcast %cst_186 : f32 to vector<1x1xf32>
    %427 = arith.addf %423, %426 : vector<1x1xf32>
    %428 = math.rsqrt %427 : vector<1x1xf32>
    %429 = vector.broadcast %428 : vector<1x1xf32> to vector<1x64xf32>
    %430 = arith.mulf %425, %429 : vector<1x64xf32>
    %431 = arith.mulf %430, %411 : vector<1x64xf32>
    %432 = arith.addf %431, %412 : vector<1x64xf32>
    %c0_187 = arith.constant 0 : index
    %c0_188 = arith.constant 0 : index
    %433 = vector.load %arg22[%c0_187, %c0_188] : memref<64x64xf32, #tpu.memory_space<vmem>>, vector<64x64xf32>
    %cst_189 = arith.constant dense<0.000000e+00> : vector<1x64xf32>
    %434 = tpu.matmul %432, %433, %cst_189 {dimension_numbers = #tpu.dot_dimension_numbers<[1], [0], [0], [1], [0, 0, 1, 1], [], []>} : vector<1x64xf32>, vector<64x64xf32>, vector<1x64xf32> -> vector<1x64xf32>
    %c0_190 = arith.constant 0 : index
    %c0_191 = arith.constant 0 : index
    %435 = vector.load %arg23[%c0_190, %c0_191] : memref<1x64xf32, #tpu.memory_space<vmem>>, vector<1x64xf32>
    %436 = arith.addf %434, %435 : vector<1x64xf32>
    %cst_192 = arith.constant 0.000000e+00 : f32
    %437 = vector.broadcast %cst_192 : f32 to vector<1x64xf32>
    %438 = arith.maximumf %436, %437 : vector<1x64xf32>
    %c0_193 = arith.constant 0 : index
    %c0_194 = arith.constant 0 : index
    %439 = vector.load %arg24[%c0_193, %c0_194] : memref<64x2xf32, #tpu.memory_space<vmem>>, vector<64x2xf32>
    %cst_195 = arith.constant dense<0.000000e+00> : vector<1x2xf32>
    %440 = tpu.matmul %438, %439, %cst_195 {dimension_numbers = #tpu.dot_dimension_numbers<[1], [0], [0], [1], [0, 0, 1, 1], [], []>} : vector<1x64xf32>, vector<64x2xf32>, vector<1x2xf32> -> vector<1x2xf32>
    %c0_196 = arith.constant 0 : index
    %c0_197 = arith.constant 0 : index
    %441 = vector.load %arg25[%c0_196, %c0_197] : memref<1x2xf32, #tpu.memory_space<vmem>>, vector<1x2xf32>
    %442 = arith.addf %440, %441 : vector<1x2xf32>
    %c0_198 = arith.constant 0 : index
    %c0_199 = arith.constant 0 : index
    %c0_200 = arith.constant 0 : index
    %443 = vector.load %arg26[%c0_198, %c0_199, %c0_200] : memref<1x1x2xf32, #tpu.memory_space<vmem>>, vector<1x1x2xf32>
    %444 = vector.shape_cast %443 : vector<1x1x2xf32> to vector<1x2xf32>
    %445 = vector.shape_cast %442 : vector<1x2xf32> to vector<1x1x2xf32>
    tpu.vector_store %arg26[%c0_198, %c0_199, %c0_200], %445 {strides = array<i32>} : memref<1x1x2xf32, #tpu.memory_space<vmem>>, vector<1x1x2xf32>,
    %c0_201 = arith.constant 0 : index
    %c0_202 = arith.constant 0 : index
    %c0_203 = arith.constant 0 : index
    %446 = vector.load %arg27[%c0_201, %c0_202, %c0_203] : memref<1x16x1xf32, #tpu.memory_space<vmem>>, vector<1x16x1xf32>
    %447 = vector.shape_cast %446 : vector<1x16x1xf32> to vector<16x1xf32>
    %448 = vector.shape_cast %405 : vector<16x1xf32> to vector<1x16x1xf32>
    tpu.vector_store %arg27[%c0_201, %c0_202, %c0_203], %448 {strides = array<i32>} : memref<1x16x1xf32, #tpu.memory_space<vmem>>, vector<1x16x1xf32>,
    return
  }
  func.func @transform_0(%arg0: i32) -> (i32, i32, i32) {
    %c0_i32 = arith.constant 0 : i32
    %c0_i32_0 = arith.constant 0 : i32
    %c0_i32_1 = arith.constant 0 : i32
    return %arg0, %c0_i32, %c0_i32_0 : i32, i32, i32
  }
  func.func @transform_1(%arg0: i32) -> (i32, i32) {
    %c0_i32 = arith.constant 0 : i32
    %c0_i32_0 = arith.constant 0 : i32
    %c0_i32_1 = arith.constant 0 : i32
    return %c0_i32, %c0_i32_0 : i32, i32
  }
  func.func @transform_2(%arg0: i32) -> (i32, i32) {
    %c0_i32 = arith.constant 0 : i32
    %c0_i32_0 = arith.constant 0 : i32
    %c0_i32_1 = arith.constant 0 : i32
    return %c0_i32, %c0_i32_0 : i32, i32
  }
  func.func @transform_3(%arg0: i32) -> (i32, i32, i32) {
    %c0_i32 = arith.constant 0 : i32
    %c0_i32_0 = arith.constant 0 : i32
    %c0_i32_1 = arith.constant 0 : i32
    %c0_i32_2 = arith.constant 0 : i32
    return %c0_i32, %c0_i32_0, %c0_i32_1 : i32, i32, i32
  }
  func.func @transform_4(%arg0: i32) -> (i32, i32, i32) {
    %c0_i32 = arith.constant 0 : i32
    %c0_i32_0 = arith.constant 0 : i32
    %c0_i32_1 = arith.constant 0 : i32
    %c0_i32_2 = arith.constant 0 : i32
    return %c0_i32, %c0_i32_0, %c0_i32_1 : i32, i32, i32
  }
  func.func @transform_5(%arg0: i32) -> (i32, i32, i32) {
    %c0_i32 = arith.constant 0 : i32
    %c0_i32_0 = arith.constant 0 : i32
    %c0_i32_1 = arith.constant 0 : i32
    %c0_i32_2 = arith.constant 0 : i32
    return %c0_i32, %c0_i32_0, %c0_i32_1 : i32, i32, i32
  }
  func.func @transform_6(%arg0: i32) -> (i32, i32, i32) {
    %c0_i32 = arith.constant 0 : i32
    %c0_i32_0 = arith.constant 0 : i32
    %c0_i32_1 = arith.constant 0 : i32
    %c0_i32_2 = arith.constant 0 : i32
    return %c0_i32, %c0_i32_0, %c0_i32_1 : i32, i32, i32
  }
  func.func @transform_7(%arg0: i32) -> (i32, i32, i32) {
    %c0_i32 = arith.constant 0 : i32
    %c0_i32_0 = arith.constant 0 : i32
    %c0_i32_1 = arith.constant 0 : i32
    %c0_i32_2 = arith.constant 0 : i32
    return %c0_i32, %c0_i32_0, %c0_i32_1 : i32, i32, i32
  }
  func.func @transform_8(%arg0: i32) -> (i32, i32, i32) {
    %c0_i32 = arith.constant 0 : i32
    %c0_i32_0 = arith.constant 0 : i32
    %c0_i32_1 = arith.constant 0 : i32
    %c0_i32_2 = arith.constant 0 : i32
    return %c0_i32, %c0_i32_0, %c0_i32_1 : i32, i32, i32
  }
  func.func @transform_9(%arg0: i32) -> (i32, i32, i32) {
    %c0_i32 = arith.constant 0 : i32
    %c0_i32_0 = arith.constant 0 : i32
    %c0_i32_1 = arith.constant 0 : i32
    %c0_i32_2 = arith.constant 0 : i32
    return %c0_i32, %c0_i32_0, %c0_i32_1 : i32, i32, i32
  }
  func.func @transform_10(%arg0: i32) -> (i32, i32, i32) {
    %c0_i32 = arith.constant 0 : i32
    %c0_i32_0 = arith.constant 0 : i32
    %c0_i32_1 = arith.constant 0 : i32
    %c0_i32_2 = arith.constant 0 : i32
    return %c0_i32, %c0_i32_0, %c0_i32_1 : i32, i32, i32
  }
  func.func @transform_11(%arg0: i32) -> (i32, i32, i32) {
    %c0_i32 = arith.constant 0 : i32
    %c0_i32_0 = arith.constant 0 : i32
    %c0_i32_1 = arith.constant 0 : i32
    %c0_i32_2 = arith.constant 0 : i32
    return %c0_i32, %c0_i32_0, %c0_i32_1 : i32, i32, i32
  }
  func.func @transform_12(%arg0: i32) -> (i32, i32, i32) {
    %c0_i32 = arith.constant 0 : i32
    %c0_i32_0 = arith.constant 0 : i32
    %c0_i32_1 = arith.constant 0 : i32
    %c0_i32_2 = arith.constant 0 : i32
    return %c0_i32, %c0_i32_0, %c0_i32_1 : i32, i32, i32
  }
  func.func @transform_13(%arg0: i32) -> (i32, i32, i32) {
    %c0_i32 = arith.constant 0 : i32
    %c0_i32_0 = arith.constant 0 : i32
    %c0_i32_1 = arith.constant 0 : i32
    %c0_i32_2 = arith.constant 0 : i32
    return %c0_i32, %c0_i32_0, %c0_i32_1 : i32, i32, i32
  }
  func.func @transform_14(%arg0: i32) -> (i32, i32, i32) {
    %c0_i32 = arith.constant 0 : i32
    %c0_i32_0 = arith.constant 0 : i32
    %c0_i32_1 = arith.constant 0 : i32
    %c0_i32_2 = arith.constant 0 : i32
    return %c0_i32, %c0_i32_0, %c0_i32_1 : i32, i32, i32
  }
  func.func @transform_15(%arg0: i32) -> (i32, i32) {
    %c0_i32 = arith.constant 0 : i32
    %c0_i32_0 = arith.constant 0 : i32
    %c0_i32_1 = arith.constant 0 : i32
    return %c0_i32, %c0_i32_0 : i32, i32
  }
  func.func @transform_16(%arg0: i32) -> (i32, i32) {
    %c0_i32 = arith.constant 0 : i32
    %c0_i32_0 = arith.constant 0 : i32
    %c0_i32_1 = arith.constant 0 : i32
    return %c0_i32, %c0_i32_0 : i32, i32
  }
  func.func @transform_17(%arg0: i32) -> (i32, i32) {
    %c0_i32 = arith.constant 0 : i32
    %c0_i32_0 = arith.constant 0 : i32
    %c0_i32_1 = arith.constant 0 : i32
    return %c0_i32, %c0_i32_0 : i32, i32
  }
  func.func @transform_18(%arg0: i32) -> (i32, i32) {
    %c0_i32 = arith.constant 0 : i32
    %c0_i32_0 = arith.constant 0 : i32
    %c0_i32_1 = arith.constant 0 : i32
    return %c0_i32, %c0_i32_0 : i32, i32
  }
  func.func @transform_19(%arg0: i32) -> (i32, i32) {
    %c0_i32 = arith.constant 0 : i32
    %c0_i32_0 = arith.constant 0 : i32
    %c0_i32_1 = arith.constant 0 : i32
    return %c0_i32, %c0_i32_0 : i32, i32
  }
  func.func @transform_20(%arg0: i32) -> (i32, i32) {
    %c0_i32 = arith.constant 0 : i32
    %c0_i32_0 = arith.constant 0 : i32
    %c0_i32_1 = arith.constant 0 : i32
    return %c0_i32, %c0_i32_0 : i32, i32
  }
  func.func @transform_21(%arg0: i32) -> (i32, i32) {
    %c0_i32 = arith.constant 0 : i32
    %c0_i32_0 = arith.constant 0 : i32
    %c0_i32_1 = arith.constant 0 : i32
    return %c0_i32, %c0_i32_0 : i32, i32
  }
  func.func @transform_22(%arg0: i32) -> (i32, i32) {
    %c0_i32 = arith.constant 0 : i32
    %c0_i32_0 = arith.constant 0 : i32
    %c0_i32_1 = arith.constant 0 : i32
    return %c0_i32, %c0_i32_0 : i32, i32
  }
  func.func @transform_23(%arg0: i32) -> (i32, i32) {
    %c0_i32 = arith.constant 0 : i32
    %c0_i32_0 = arith.constant 0 : i32
    %c0_i32_1 = arith.constant 0 : i32
    return %c0_i32, %c0_i32_0 : i32, i32
  }
  func.func @transform_24(%arg0: i32) -> (i32, i32) {
    %c0_i32 = arith.constant 0 : i32
    %c0_i32_0 = arith.constant 0 : i32
    %c0_i32_1 = arith.constant 0 : i32
    return %c0_i32, %c0_i32_0 : i32, i32
  }
  func.func @transform_25(%arg0: i32) -> (i32, i32, i32) {
    %c0_i32 = arith.constant 0 : i32
    %c0_i32_0 = arith.constant 0 : i32
    %c0_i32_1 = arith.constant 0 : i32
    return %arg0, %c0_i32, %c0_i32_0 : i32, i32, i32
  }
  func.func @transform_26(%arg0: i32) -> (i32, i32, i32) {
    %c0_i32 = arith.constant 0 : i32
    %c0_i32_0 = arith.constant 0 : i32
    %c0_i32_1 = arith.constant 0 : i32
    return %arg0, %c0_i32, %c0_i32_0 : i32, i32, i32
  }
}

</mosaic_0001>

<bundles_post_ra>
// kernel: enhanced_vit_forward.1
= control target key start
LH: loop header
LB: loop body
LE: loop exit
PB: predicated region body
PF: predicated region fallthrough
CT: control target
= control target key end

     0   :  { %s4817_s0 = inlined_call_operand.vmem [shape: f32[2,24,48], index: 0, kind: input, shape index: {}]   ;;  %s4818_s1 = inlined_call_operand.vmem [shape: f32[24,32], index: 1, kind: input, shape index: {}]   ;;  %s4819_s2 = inlined_call_operand.vmem [shape: f32[48,32], index: 2, kind: input, shape index: {}]   ;;  %s4820_s3 = inlined_call_operand.vmem [shape: f32[2,1,32], index: 3, kind: input, shape index: {}]   ;;  %s4821_s4 = inlined_call_operand.vmem [shape: f32[2,1,32], index: 4, kind: input, shape index: {}]   ;;  %s4822_s5 = inlined_call_operand.vmem [shape: f32[2,32,96], index: 5, kind: input, shape index: {}]   ;;  %s4823_s6 = inlined_call_operand.vmem [shape: f32[2,1,96], index: 6, kind: input, shape index: {}]   ;;  %s4824_s7 = inlined_call_operand.vmem [shape: f32[2,32,32], index: 7, kind: input, shape index: {}]   ;;  %s4825_s8 = inlined_call_operand.vmem [shape: f32[2,1,32], index: 8, kind: input, shape index: {}]   ;;  %s4826_s9 = inlined_call_operand.vmem [shape: f32[2,1,32], index: 9, kind: input, shape index: {}]   ;;  %s4827_s10 = inlined_call_operand.vmem [shape: f32[2,1,32], index: 10, kind: input, shape index: {}]   ;;  %s4828_s11 = inlined_call_operand.vmem [shape: f32[2,32,128], index: 11, kind: input, shape index: {}]   ;;  %s4829_s12 = inlined_call_operand.vmem [shape: f32[2,1,128], index: 12, kind: input, shape index: {}]   ;;  %s4830_s13 = inlined_call_operand.vmem [shape: f32[2,128,32], index: 13, kind: input, shape index: {}]   ;;  %s4831_s14 = inlined_call_operand.vmem [shape: f32[2,1,32], index: 14, kind: input, shape index: {}]   ;;  %s4832_s15 = inlined_call_operand.vmem [shape: f32[1,32], index: 15, kind: input, shape index: {}]   ;;  %s4833_s16 = inlined_call_operand.vmem [shape: f32[1,32], index: 16, kind: input, shape index: {}]   ;;  %s4834_s17 = inlined_call_operand.vmem [shape: f32[1,32], index: 17, kind: input, shape index: {}]   ;;  %s4835_s18 = inlined_call_operand.<no memory space> [shape: f32[1,1], index: 18, kind: input, shape index: {}]   ;;  %s4836_s19 = inlined_call_operand.vmem [shape: f32[1,64], index: 19, kind: input, shape index: {}]   ;;  %s4837_s20 = inlined_call_operand.vmem [shape: f32[1,64], index: 20, kind: input, shape index: {}]   ;;  %s4838_s21 = inlined_call_operand.vmem [shape: f32[64,64], index: 21, kind: input, shape index: {}]   ;;  %s4839_s22 = inlined_call_operand.vmem [shape: f32[1,64], index: 22, kind: input, shape index: {}]   ;;  %s4840_s23 = inlined_call_operand.vmem [shape: f32[64,2], index: 23, kind: input, shape index: {}]   ;;  %s4841_s24 = inlined_call_operand.vmem [shape: f32[1,2], index: 24, kind: input, shape index: {}]   ;;  %s4842_s25 = inlined_call_operand.hbm [shape: f32[2,1,2], index: 25, kind: output, shape index: {0}]   ;;  %s4843_s26 = inlined_call_operand.vmem [shape: f32[2,16,1], index: 26, kind: output, shape index: {1}]  }
   0x1   :  { %4900 = sst [smem:[#allocation15_spill]] %s4817_s0  ;;  %v32_v0 = vstv %s4835_s18 }
   0x2   :  { %4901 = sst [smem:[#allocation16_spill]] %s4818_s1  ;;  %33 = vst [vmem:[#allocation2] sm:$0x1] %v32_v0 }
   0x3   :  { %4902 = sst [smem:[#allocation17_spill]] %s4819_s2 }
   0x4   :  { %4903 = sst [smem:[#allocation18_spill]] %s4820_s3 }
   0x5   :  { %4904 = sst [smem:[#allocation19_spill]] %s4821_s4 }
   0x6   :  { %4905 = sst [smem:[#allocation20_spill]] %s4822_s5 }
   0x7   :  { %4906 = sst [smem:[#allocation21_spill]] %s4823_s6 }
   0x8   :  { %4907 = sst [smem:[#allocation22_spill]] %s4824_s7 }
   0x9   :  { %4908 = sst [smem:[#allocation23_spill]] %s4825_s8 }
   0xa   :  { %4909 = sst [smem:[#allocation24_spill]] %s4826_s9 }
   0xb   :  { %4910 = sst [smem:[#allocation25_spill]] %s4827_s10 }
   0xc   :  { %4911 = sst [smem:[#allocation26_spill]] %s4828_s11 }
   0xd   :  { %4912 = sst [smem:[#allocation27_spill]] %s4839_s22 }
   0xe   :  { %4913 = sst [smem:[#allocation28_spill]] %s4841_s24 }
   0xf   :  { %4914 = sst [smem:[#allocation29_spill]] %s4842_s25 }
  0x10   :  { %34 = vsyncpa [#allocation4], 0 }
  0x11   :  { %36 = vsyncpa [#allocation4 + $0x1], 0  ;;  %s3812_s7 = smov 0   ;;  %s3814_s28 = smov 0  }
  0x12   :  { %s3816_s8 = smov 0   ;;  %s3818_s4 = smov 0  }
  0x13 LB: > { %4915 = sst [smem:[#allocation6_spill]] %s3642_s7  ;;  %s3833_s18 = sadd.s32 4294967295, %s3654_s4   ;;  %s3654_s4 = sphi %s3818_s4, %s4962_s4   ;;  %s3650_s8 = sphi %s3816_s8, %s4965_s8   ;;  %s3646_s28 = sphi %s3814_s28, %s4964_s28   ;;  %s3642_s7 = sphi %s3812_s7, %s4963_s7  }
  0x14   : > { %4916 = sst [smem:[#allocation7_spill]] %s3646_s28  ;;  %s3175_s29 = sadd.s32 4294967294, %s3654_s4  }
  0x15   : > { %4917 = sst [smem:[#allocation8_spill]] %s3650_s8  ;;  %s3837_s0 = sadd.s32 1, %s3654_s4  }
  0x16   : > { %4918 = sst [smem:[#allocation9_spill]] %s3654_s4  ;;  %s579_s9 = sadd.s32 1, %s3650_s8 }
  0x17   : > { %4919 = sst [smem:[#allocation10_spill]] %s3833_s18  ;;  %s576_s30 = ssub.s32 %s3654_s4, %s3837_s0 }
  0x18   : > { %4920 = sst [smem:[#allocation11_spill]] %s3837_s0  ;;  %p589_p0 = scmp.ne.s32.totalorder %s3650_s8, %s3646_s28 }
  0x19   : > { %p577_p1 = scmp.eq.s32.totalorder %s576_s30, 0  ;;  %p590_p2 = scmp.eq.s32.totalorder %s3833_s18, 1 }
  0x1a   : > { %p595_p3 = scmp.ne.s32.totalorder %s3646_s28, %s3642_s7  ;;  %p596_p4 = scmp.eq.s32.totalorder %s3175_s29, 1 }
  0x1b   : > { %s3848_s2 = scalar_select %p577_p1, %s3650_s8, %s579_s9  }
  0x1c   : > { %p3850_p5 = por %p590_p2, %p589_p0  ;;  %p3854_p6 = por %p596_p4, %p595_p3 }
  0x1d   : > { %4921 = sst [smem:[#allocation12_spill]] %s3848_s2  ;;  %p3178_p7 = scmp.ge.s32.totalorder %s3654_s4, 1 }
  0x1e   : > { %s4922_s5 = scalar_select %p3850_p5, 1, 0 }
  0x1f   : > { %s4924_s10 = scalar_select %p3854_p6, 1, 0 }
  0x20   : > { %4923 = sst [smem:[#allocation13_spill]] %s4922_s5  ;;  %p720_p8 = scmp.lt.s32.totalorder %s3654_s4, 3 }
  0x21   : > { %4925 = sst [smem:[#allocation14_spill]] %s4924_s10 }
  0x22   : > { %p721_p9 = pnand %p3178_p7, %p720_p8 }
  0x23   : > { %s4926_s27 = sld [smem:[#allocation17_spill]] (!%p721_p9)  ;;  %p794_p10 = scmp.lt.s32.totalorder (!%p721_p9), %s3833_s18, 1 }
  0x24   : > { %724 = sbr.rel (%p721_p9) target bundleno = 6619 (0x19db), region = 120  ;;  %s4927_s7 = sld [smem:[#allocation15_spill]] (!%p721_p9) }
  0x25   : > { %s4928_s6 = sld [smem:[#allocation16_spill]] (!%p721_p9)  ;;  %s4860_s30 = smov (!%p721_p9), 64  }
  0x26   : > { %s4929_s9 = sld [smem:[#allocation20_spill]] (!%p721_p9)  ;;  %s4882_s8 = smov (!%p721_p9), 88  }
  0x27   : > { %s4930_s29 = sld [smem:[#allocation18_spill]] (!%p721_p9)  ;;  %s4866_s10 = smov (!%p721_p9), 56  }
  0x28   : > { %s4931_s2 = sld [smem:[#allocation19_spill]] (!%p721_p9)  ;;  %s4939_s24 = smov (!%p721_p9), 96  }
  0x29   : > { %v812_v1 = vld [vmem:[%s4926_s27 + $0x28] sm:$0xff]  ;;  %v811_v2 = vld [vmem:[%s4926_s27 + $0x20] sm:$0xff]  ;;  %v810_v3 = vld [vmem:[%s4926_s27 + $0x18] sm:$0xff]  ;;  %s3874_s0 = scalar_select %p794_p10, %s3833_s18, 1  ;;  %vm816_vm0 = vcmask 392192   ;;  %vm857_vm1 = vcmask 261120  }
  0x2a   : > { %836 = vmatpush.msra.mxu0 %v812_v1  ;;  %v809_v4 = vld [vmem:[%s4926_s27 + $0x10] sm:$0xff]  ;;  %v808_v5 = vld [vmem:[%s4926_s27 + $0x8] sm:$0xff]  ;;  %v807_v6 = vld [vmem:[%s4926_s27] sm:$0xff]  ;;  %v3656_v22 = vmov 32.0   ;;  %vm995_vm12 = vcmask 64512   ;;  %vm1040_vm14 = vcmask 195584  }
  0x2b   : > { %s3319_s3 = smul.u32 24, %s3874_s0  ;;  %v813_v10 = vld [vmem:[%s4928_s6] sm:$0xff]  ;;  %v814_v14 = vld [vmem:[%s4928_s6 + $0x8] sm:$0xff]  ;;  %v815_v18 = vld [vmem:[%s4928_s6 + $0x10] sm:$0xff]  ;;  %3440 = vrcp.f32 %v3656_v22  ;;  %vm1556_vm15 = vcmask 130048   ;;  %s4935_s27 = sld [smem:[#allocation23_spill]] }
  0x2c   : > { %837 = vmatpush.msra.mxu0 %v811_v2  ;;  %v946_v44 = vld [vmem:[%s4929_s9 + $0x18] sm:$0xff]  ;;  %v945_v45 = vld [vmem:[%s4929_s9 + $0x10] sm:$0xff]  ;;  %v944_v46 = vld [vmem:[%s4929_s9 + $0x8] sm:$0xff]  ;;  %s4936_s11 = sld [smem:[#allocation26_spill]]  ;;  %s4940_s5 = smov 64  }
  0x2d   : > { %s798_s4 = scalar_lea.vmem %s4927_s7, %s3319_s3  ;;  %972 = vmatpush.msra.mxu1 %v946_v44  ;;  %v943_v47 = vld [vmem:[%s4929_s9] sm:$0xff]  ;;  %s4862_s3 = smov 96  }
  0x2e   : > { %838 = vmatpush.msra.mxu0 %v810_v3  ;;  %v804_v7 = vld [vmem:[%s798_s4] sm:$0xff]  ;;  %v805_v8 = vld [vmem:[%s798_s4 + $0x8] sm:$0xff]  ;;  %v806_v9 = vld [vmem:[%s798_s4 + $0x10] sm:$0xff]  ;;  %s4932_s4 = sld [smem:[#allocation21_spill]]  ;;  %s4864_s7 = smov 120  }
  0x2f   : > { %973 = vmatpush.msra.mxu1 %v945_v45  ;;  %v3420_v1 = vld [vmem:[%s4930_s29] ss:$0 sm:$0xff]  ;;  %s4942_s6 = smov 80   ;;  %s4945_s28 = smov 72  }
  0x30   : > { %839 = vmatpush.msra.mxu0 %v809_v4  ;;  %s4946_s18 = smov 104   ;;  %s4947_s22 = smov 56  }
  0x31   : > { %v3441_v23 = vpop.eup %3440  ;;  %974 = vmatpush.msra.mxu1 %v944_v46  ;;  %s4948_s25 = smov 48  }
  0x32   : > { %840 = vmatpush.msra.mxu0 %v808_v5  ;;  %v868_v24 = vmul.f32 32.0, %v3441_v23  ;;  %vm872_vm2 = vweird.f32 %v3441_v23  ;;  %v3421_v5 = vld [vmem:[%s4931_s2] ss:$0 sm:$0xff] }
  0x33   : > { %975 = vmatpush.msra.mxu1 %v943_v47 }
  0x34   : > { %841 = vmatpush.msra.mxu0 %v807_v6  ;;  %v869_v25 = vsub.f32 1.0, %v868_v24  ;;  %s4933_s1 = smov %s4932_s4 }
  0x35   : > { %3182 = vmatmul.msk.f32.vlgmr.msra.gmra.mxu0 %vm816_vm0, %v804_v7 }
  0x36   : > { %v870_v26 = vmul.f32 %v3441_v23, %v869_v25 }
  0x38   : > { %v871_v27 = vadd.f32 %v3441_v23, %v870_v26 }
  0x3a   : > { %v3907_v28 = vsel %vm872_vm2, %v3441_v23, %v871_v27 }
  0x3d   : > { %3183 = vmatmul.msk.f32.gmra.mxu0 %vm816_vm0, %v805_v8 }
  0x45   : > { %3184 = vmatmul.msk.f32.gmra.mxu0 %vm816_vm0, %v806_v9 }
  0xb2   : > { %v843_v11 = vpop.f32.mrf.mxu0 }
  0xb3   : > { %v3889_v12 = vadd.f32 %v843_v11, %v813_v10 }
  0xb5   : > { %v858_v13 = vsel %vm857_vm1, %v3889_v12, 0.0 }
  0xb6   : > { %859 = vadd.xlane.f32.xlu0 %v858_v13 }
  0xba   : > { %v846_v15 = vpop.f32.mrf.mxu0 }
  0xbb   : > { %v3896_v16 = vadd.f32 %v846_v15, %v814_v14 }
  0xbd   : > { %v861_v17 = vsel %vm857_vm1, %v3896_v16, 0.0 }
  0xbe   : > { %862 = vadd.xlane.f32.xlu0 %v861_v17 }
  0xc2   : > { %v849_v19 = vpop.f32.mrf.mxu0 }
  0xc3   : > { %v3903_v20 = vadd.f32 %v849_v19, %v815_v18 }
  0xc5   : > { %v864_v21 = vsel %vm857_vm1, %v3903_v20, 0.0 }
  0xc6   : > { %865 = vadd.xlane.f32.xlu1 %v864_v21 }
 0x129   : > { %v860_v29 = vpop.xlane.xlu0 %859 }
 0x12a   : > { %v874_v30 = vmul.f32 %v3907_v28, %v860_v29  ;;  %v3422_v29 = vld [vmem:[%s4932_s4] ss:$0 sm:$0xff]  ;;  %s4874_s4 = smov 72  }
 0x12c   : > { %v877_v31 = vsub.f32 %v3889_v12, %v874_v30 }
 0x12e   : > { %v880_v32 = vmul.f32 %v877_v31, %v877_v31 }
 0x130   : > { %v883_v33 = vsel %vm857_vm1, %v880_v32, 0.0 }
 0x131   : > { %884 = vadd.xlane.f32.xlu1 %v883_v33  ;;  %v863_v34 = vpop.xlane.xlu0 %862 }
 0x132   : > { %v875_v35 = vmul.f32 %v3907_v28, %v863_v34 }
 0x134   : > { %v878_v36 = vsub.f32 %v3896_v16, %v875_v35 }
 0x136   : > { %v881_v37 = vmul.f32 %v878_v36, %v878_v36 }
 0x138   : > { %v886_v38 = vsel %vm857_vm1, %v881_v37, 0.0 }
 0x139   : > { %v866_v39 = vpop.xlane.xlu1 %865  ;;  %887 = vadd.xlane.f32.xlu2 %v886_v38 }
 0x13a   : > { %v876_v40 = vmul.f32 %v3907_v28, %v866_v39  ;;  %v852_v39 = vlaneseq }
 0x13c   : > { %v3917_v41 = vsub.f32 %v3903_v20, %v876_v40  ;;  %v3971_v40 = vand.u32 127, %v852_v39 }
 0x13e   : > { %v882_v42 = vmul.f32 %v3917_v41, %v3917_v41  ;;  %vm854_vm13 = vcmp.lt.s32.totalorder %v3971_v40, 17 }
 0x140   : > { %v889_v43 = vsel %vm857_vm1, %v882_v42, 0.0 }
 0x141   : > { %890 = vadd.xlane.f32.xlu2 %v889_v43 }
 0x1a4   : > { %v885_v48 = vpop.xlane.xlu1 %884 }
 0x1a5   : > { %v892_v49 = vmul.f32 %v885_v48, %v3907_v28 }
 0x1a7   : > { %v895_v50 = vadd.f32 1e-06, %v892_v49 }
 0x1a9   : > { %3442 = vrsqrt.f32 %v895_v50  ;;  %vm904_vm4 = vweird.f32 %v895_v50 }
 0x1ac   : > { %v888_v51 = vpop.xlane.xlu2 %887 }
 0x1ad   : > { %v893_v52 = vmul.f32 %v888_v51, %v3907_v28 }
 0x1af   : > { %v3443_v53 = vpop.eup %3442  ;;  %v896_v54 = vadd.f32 1e-06, %v893_v52 }
 0x1b0   : > { %v899_v55 = vmul.f32 %v3443_v53, %v895_v50  ;;  %vm905_vm3 = vweird.f32 %v3443_v53 }
 0x1b1   : > { %3444 = vrsqrt.f32 %v896_v54  ;;  %vm906_vm5 = vmor %vm904_vm4, %vm905_vm3  ;;  %vm914_vm7 = vweird.f32 %v896_v54 }
 0x1b2   : > { %v900_v56 = vmul.f32 %v3443_v53, %v899_v55 }
 0x1b4   : > { %v901_v57 = vmul.f32 0.5, %v900_v56  ;;  %v891_v58 = vpop.xlane.xlu2 %890 }
 0x1b5   : > { %v894_v59 = vmul.f32 %v891_v58, %v3907_v28 }
 0x1b6   : > { %v902_v60 = vsub.f32 1.5, %v901_v57 }
 0x1b7   : > { %v3445_v61 = vpop.eup %3444  ;;  %v897_v62 = vadd.f32 1e-06, %v894_v59 }
 0x1b8   : > { %v903_v63 = vmul.f32 %v3443_v53, %v902_v60  ;;  %v909_v0 = vmul.f32 %v3445_v61, %v896_v54  ;;  %vm915_vm6 = vweird.f32 %v3445_v61 }
 0x1b9   : > { %3446 = vrsqrt.f32 %v897_v62  ;;  %vm916_vm8 = vmor %vm914_vm7, %vm915_vm6  ;;  %vm924_vm10 = vweird.f32 %v897_v62 }
 0x1ba   : > { %v907_v2 = vsel %vm906_vm5, %v3443_v53, %v903_v63  ;;  %v910_v3 = vmul.f32 %v3445_v61, %v909_v0 }
 0x1bb   : > { %v928_v4 = vmul.f32 %v907_v2, %v877_v31 }
 0x1bc   : > { %v911_v6 = vmul.f32 0.5, %v910_v3 }
 0x1bd   : > { %v934_v7 = vmul.f32 %v3420_v1, %v928_v4 }
 0x1be   : > { %v912_v8 = vsub.f32 1.5, %v911_v6 }
 0x1bf   : > { %v3447_v9 = vpop.eup %3446  ;;  %v940_v10 = vadd.f32 %v3421_v5, %v934_v7 }
 0x1c0   : > { %v913_v11 = vmul.f32 %v3445_v61, %v912_v8  ;;  %v919_v13 = vmul.f32 %v3447_v9, %v897_v62  ;;  %vm925_vm9 = vweird.f32 %v3447_v9 }
 0x1c1   : > { %3185 = vmatmul.msk.f32.vlgmr.msra.gmra.mxu1 %vm857_vm1, %v940_v10  ;;  %vm926_vm11 = vmor %vm924_vm10, %vm925_vm9 }
 0x1c2   : > { %v920_v14 = vmul.f32 %v3447_v9, %v919_v13  ;;  %v917_v15 = vsel %vm916_vm8, %v3445_v61, %v913_v11 }
 0x1c3   : > { %v929_v17 = vmul.f32 %v917_v15, %v878_v36 }
 0x1c4   : > { %v921_v18 = vmul.f32 0.5, %v920_v14 }
 0x1c5   : > { %v935_v19 = vmul.f32 %v3420_v1, %v929_v17 }
 0x1c6   : > { %v922_v21 = vsub.f32 1.5, %v921_v18 }
 0x1c7   : > { %v941_v22 = vadd.f32 %v3421_v5, %v935_v19 }
 0x1c8   : > { %v923_v23 = vmul.f32 %v3447_v9, %v922_v21 }
 0x1c9   : > { %3186 = vmatmul.msk.f32.gmra.mxu1 %vm857_vm1, %v941_v22 }
 0x1ca   : > { %v927_v24 = vsel %vm926_vm11, %v3447_v9, %v923_v23 }
 0x1cb   : > { %v930_v25 = vmul.f32 %v927_v24, %v3917_v41 }
 0x1cd   : > { %v936_v26 = vmul.f32 %v3420_v1, %v930_v25 }
 0x1cf   : > { %v942_v27 = vadd.f32 %v3421_v5, %v936_v26 }
 0x1d1   : > { %3187 = vmatmul.msk.f32.gmra.mxu1 %vm857_vm1, %v942_v27 }
 0x23e   : > { %v977_v30 = vpop.f32.mrf.mxu1 }
 0x23f   : > { %v3950_v31 = vadd.f32 %v3422_v29, %v977_v30 }
 0x241   : > { %989 = vrot.lane.b32.xlu2 %v3950_v31, %s4862_s3 }
 0x246   : > { %v980_v32 = vpop.f32.mrf.mxu1 }
 0x247   : > { %v3954_v33 = vadd.f32 %v3422_v29, %v980_v32 }
 0x249   : > { %991 = vrot.lane.b32.xlu1 %v3954_v33, %s4862_s3 }
 0x24e   : > { %v983_v34 = vpop.f32.mrf.mxu1 }
 0x24f   : > { %v3958_v35 = vadd.f32 %v3422_v29, %v983_v34 }
 0x251   : > { %993 = vrot.lane.b32.xlu0 %v3958_v35, %s4862_s3  ;;  %v3987_v53 = vpack.i.bf16 %v3954_v33, %v3958_v35  ;;  %s4880_s3 = smov 80  }
 0x29b   : > { %v990_v38 = vpop.permute.xlu2 %989 }
 0x2bb   : > { %v992_v37 = vpop.permute.xlu1 %991 }
 0x2c3   : > { %v994_v36 = vpop.permute.xlu0 %993 }
 0x2c4   : > { %3188 = vmatpush.xpose.msk.msra.mxu2 %vm995_vm12, %v994_v36 }
 0x2c8   : > { %3189 = vmatpush.xpose.msk.msra.mxu2 %vm995_vm12, %v992_v37 }
 0x2cc   : > { %3190 = vmatpush.xpose.msk.msra.mxu2 %vm995_vm12, %v990_v38 }
 0x2cf   : > { %3191 = vmatmul.msk.f32.vlgmr.msra.gmra.mxu2 %vm995_vm12, %v3950_v31 }
 0x2d7   : > { %3192 = vmatmul.msk.f32.gmra.mxu2 %vm995_vm12, %v3954_v33 }
 0x2df   : > { %3193 = vmatmul.msk.f32.gmra.mxu2 %vm995_vm12, %v3958_v35 }
 0x352   : > { %v1025_v41 = vpop.f32.mrf.mxu2 }
 0x353   : > { %v1034_v42 = vmul.f32 0.35355338, %v1025_v41 }
 0x355   : > { %v1037_v43 = vsel %vm854_vm13, %v1034_v42, -1e+30 }
 0x356   : > { %v1041_v44 = vsel %vm1040_vm14, %v1037_v43, -inf }
 0x357   : > { %1042 = vmax.xlane.f32.xlu0 %v1041_v44 }
 0x35a   : > { %v1028_v45 = vpop.f32.mrf.mxu2 }
 0x35b   : > { %v1035_v46 = vmul.f32 0.35355338, %v1028_v45 }
 0x35d   : > { %v1038_v47 = vsel %vm854_vm13, %v1035_v46, -1e+30 }
 0x35e   : > { %v1044_v48 = vsel %vm1040_vm14, %v1038_v47, -inf }
 0x35f   : > { %1045 = vmax.xlane.f32.xlu2 %v1044_v48 }
 0x362   : > { %v1031_v49 = vpop.f32.mrf.mxu2 }
 0x363   : > { %v1036_v50 = vmul.f32 0.35355338, %v1031_v49 }
 0x365   : > { %v1039_v51 = vsel %vm854_vm13, %v1036_v50, -1e+30 }
 0x366   : > { %v1047_v52 = vsel %vm1040_vm14, %v1039_v51, -inf }
 0x367   : > { %1048 = vmax.xlane.f32.xlu1 %v1047_v52 }
 0x36b   : > { %1074 = vrot.lane.b32.xlu0 %v3950_v31, %s4860_s30 }
 0x377   : > { %3378 = vrot.lane.b32.xlu2 %v3987_v53, %s4860_s30  ;;  %s4878_s30 = smov 112  }
 0x37f   : > { %1126 = vrot.lane.b32.xlu2 %v3954_v33, %s4882_s8 }
 0x387   : > { %1118 = vrot.lane.b32.xlu2 %v3950_v31, %s4864_s7 }
 0x38f   : > { %1122 = vrot.lane.b32.xlu2 %v3958_v35, %s4864_s7 }
 0x397   : > { %1207 = vrot.lane.b32.xlu2 %v3950_v31, %s4866_s10 }
 0x39f   : > { %1392 = vrot.lane.b32.xlu2 %v3954_v33, %s4874_s4 }
 0x3a7   : > { %1251 = vrot.lane.b32.xlu2 %v3950_v31, %s4878_s30 }
 0x3ca   : > { %v1043_v54 = vpop.xlane.xlu0 %1042 }
 0x3cb   : > { %v1050_v55 = vsub.f32 %v1037_v43, %v1043_v54 }
 0x3cd   : > { %v1053_v56 = vmul.f32 1.442695, %v1050_v55 }
 0x3cf   : > { %3448 = vpow2.f32 %v1053_v56 }
 0x3d2   : > { %v1046_v57 = vpop.xlane.xlu2 %1045 }
 0x3d3   : > { %v1051_v58 = vsub.f32 %v1038_v47, %v1046_v57 }
 0x3d5   : > { %v3449_v59 = vpop.eup %3448  ;;  %v1055_v60 = vmul.f32 1.442695, %v1051_v58 }
 0x3d6   : > { %v1059_v61 = vsel %vm1040_vm14, %v3449_v59, 0.0 }
 0x3d7   : > { %3450 = vpow2.f32 %v1055_v60  ;;  %1060 = vadd.xlane.f32.xlu0 %v1059_v61 }
 0x3da   : > { %v3379_v62 = vpop.permute.xlu2 %3378  ;;  %v1049_v63 = vpop.xlane.xlu1 %1048 }
 0x3db   : > { %v1052_v0 = vsub.f32 %v1039_v51, %v1049_v63  ;;  %v3380_v1 = vunpack.i.l.bf16 %v3379_v62  ;;  %v3381_v4 = vunpack.i.h.bf16 %v3379_v62 }
 0x3dd   : > { %v3451_v2 = vpop.eup %3450  ;;  %v1057_v3 = vmul.f32 1.442695, %v1052_v0  ;;  %1105 = vmatpush.msra.mxu3 %v3380_v1  ;;  %v1075_v6 = vpop.permute.xlu0 %1074 }
 0x3de   : > { %v1062_v5 = vsel %vm1040_vm14, %v3451_v2, 0.0 }
 0x3df   : > { %3452 = vpow2.f32 %v1057_v3  ;;  %1106 = vmatpush.msra.mxu3 %v3381_v4  ;;  %1063 = vadd.xlane.f32.xlu1 %v1062_v5 }
 0x3e1   : > { %1107 = vmatpush.msra.mxu3 %v1075_v6 }
 0x3e2   : > { %v1127_v22 = vpop.permute.xlu2 %1126 }
 0x3e5   : > { %v3453_v7 = vpop.eup %3452 }
 0x3e6   : > { %v1065_v8 = vsel %vm1040_vm14, %v3453_v7, 0.0 }
 0x3e7   : > { %1066 = vadd.xlane.f32.xlu1 %v1065_v8 }
 0x3ea   : > { %v1119_v25 = vpop.permute.xlu2 %1118 }
 0x3eb   : > { %1124 = vrot.lane.b32.xlu0 %v3950_v31, %s4882_s8 }
 0x3f2   : > { %v1123_v27 = vpop.permute.xlu2 %1122 }
 0x3f3   : > { %1120 = vrot.lane.b32.xlu0 %v3954_v33, %s4864_s7  ;;  %s4868_s7 = smov 104  }
 0x400   : > { %1128 = vrot.lane.b32.xlu1 %v3958_v35, %s4882_s8  ;;  %s4943_s8 = smov 120  }
 0x408   : > { %1261 = vrot.lane.b32.xlu1 %v3958_v35, %s4880_s3 }
 0x410   : > { %1257 = vrot.lane.b32.xlu1 %v3950_v31, %s4880_s3 }
 0x44a   : > { %v1061_v9 = vpop.xlane.xlu0 %1060 }
 0x44b   : > { %3454 = vrcp.f32 %v1061_v9 }
 0x451   : > { %v3455_v10 = vpop.eup %3454 }
 0x452   : > { %v1064_v11 = vpop.xlane.xlu1 %1063  ;;  %v1071_v13 = vmul.f32 %v3455_v10, %v3449_v59  ;;  %v1208_v59 = vpop.permute.xlu2 %1207 }
 0x453   : > { %3456 = vrcp.f32 %v1064_v11 }
 0x454   : > { %3194 = vmatmul.msk.f32.vlgmr.msra.gmra.mxu3 %vm1040_vm14, %v1071_v13 }
 0x459   : > { %v3457_v14 = vpop.eup %3456 }
 0x45a   : > { %v1067_v15 = vpop.xlane.xlu1 %1066  ;;  %v1072_v17 = vmul.f32 %v3457_v14, %v3451_v2  ;;  %v1393_v62 = vpop.permute.xlu2 %1392 }
 0x45b   : > { %3458 = vrcp.f32 %v1067_v15 }
 0x45c   : > { %3195 = vmatmul.msk.f32.gmra.mxu3 %vm1040_vm14, %v1072_v17 }
 0x45d   : > { %v1125_v23 = vpop.permute.xlu0 %1124 }
 0x461   : > { %v3459_v18 = vpop.eup %3458 }
 0x462   : > { %v1073_v19 = vmul.f32 %v3459_v18, %v3453_v7  ;;  %v1252_v0 = vpop.permute.xlu2 %1251 }
 0x464   : > { %3196 = vmatmul.msk.f32.gmra.mxu3 %vm1040_vm14, %v1073_v19 }
 0x465   : > { %v1121_v26 = vpop.permute.xlu0 %1120 }
 0x472   : > { %v1129_v21 = vpop.permute.xlu1 %1128 }
 0x473   : > { %3197 = vmatpush.xpose.msk.msrb.mxu3 %vm995_vm12, %v1129_v21 }
 0x477   : > { %3198 = vmatpush.xpose.msk.msrb.mxu3 %vm995_vm12, %v1127_v22 }
 0x47a   : > { %v1262_v24 = vpop.permute.xlu1 %1261 }
 0x47b   : > { %3199 = vmatpush.xpose.msk.msrb.mxu3 %vm995_vm12, %v1125_v23  ;;  %3206 = vmatpush.xpose.msk.msrb.mxu0 %vm995_vm12, %v1262_v24 }
 0x47e   : > { %3200 = vmatmul.msk.f32.vlgmr.msrb.gmra.mxu3 %vm995_vm12, %v1119_v25 }
 0x482   : > { %v1258_v45 = vpop.permute.xlu1 %1257 }
 0x486   : > { %3201 = vmatmul.msk.f32.gmra.mxu3 %vm995_vm12, %v1121_v26 }
 0x48e   : > { %3202 = vmatmul.msk.f32.gmra.mxu3 %vm995_vm12, %v1123_v27 }
 0x4d7   : > { %v4026_v29 = vpop.f32.mrf.mxu3 }
 0x4df   : > { %v4028_v30 = vpop.f32.mrf.mxu3 }
 0x4e7   : > { %v4030_v32 = vpop.f32.mrf.mxu3 }
 0x501   : > { %v1159_v34 = vpop.f32.mrf.mxu3 }
 0x502   : > { %v1168_v3 = vmul.f32 0.35355338, %v1159_v34 }
 0x504   : > { %v1171_v4 = vsel %vm854_vm13, %v1168_v3, -1e+30 }
 0x509   : > { %v1162_v36 = vpop.f32.mrf.mxu3 }
 0x50a   : > { %v1169_v37 = vmul.f32 0.35355338, %v1162_v36 }
 0x50c   : > { %v1172_v38 = vsel %vm854_vm13, %v1169_v37, -1e+30 }
 0x50d   : > { %v1177_v39 = vsel %vm1040_vm14, %v1172_v38, -inf }
 0x50e   : > { %1178 = vmax.xlane.f32.xlu0 %v1177_v39 }
 0x511   : > { %v1165_v41 = vpop.f32.mrf.mxu3 }
 0x512   : > { %v1170_v42 = vmul.f32 0.35355338, %v1165_v41 }
 0x514   : > { %v1173_v43 = vsel %vm854_vm13, %v1170_v42, -1e+30 }
 0x515   : > { %v1180_v44 = vsel %vm1040_vm14, %v1173_v43, -inf }
 0x516   : > { %1181 = vmax.xlane.f32.xlu1 %v1180_v44 }
 0x522   : > { %3383 = vrot.lane.b32.xlu0 %v3987_v53, %s4866_s10  ;;  %s4870_s10 = smov 48  }
 0x52a   : > { %1394 = vrot.lane.b32.xlu0 %v3958_v35, %s4874_s4 }
 0x52f   : > { %1384 = vrot.lane.b32.xlu1 %v3950_v31, %s4868_s7 }
 0x532   : > { %1259 = vrot.lane.b32.xlu0 %v3954_v33, %s4880_s3  ;;  %s4934_s3 = sld [smem:[#allocation22_spill]] }
 0x53a   : > { %1390 = vrot.lane.b32.xlu0 %v3950_v31, %s4874_s4  ;;  %s4890_s4 = smov 24  }
 0x542   : > { %1253 = vrot.lane.b32.xlu0 %v3954_v33, %s4878_s30 }
 0x54a   : > { %1388 = vrot.lane.b32.xlu0 %v3958_v35, %s4868_s7 }
 0x581   : > { %v1179_v46 = vpop.xlane.xlu0 %1178 }
 0x582   : > { %v1184_v47 = vsub.f32 %v1172_v38, %v1179_v46 }
 0x584   : > { %v1188_v48 = vmul.f32 1.442695, %v1184_v47 }
 0x586   : > { %3460 = vpow2.f32 %v1188_v48 }
 0x589   : > { %v1182_v49 = vpop.xlane.xlu1 %1181 }
 0x58a   : > { %v1185_v50 = vsub.f32 %v1173_v43, %v1182_v49 }
 0x58c   : > { %v3461_v51 = vpop.eup %3460  ;;  %v1190_v52 = vmul.f32 1.442695, %v1185_v50 }
 0x58d   : > { %v1195_v54 = vsel %vm1040_vm14, %v3461_v51, 0.0 }
 0x58e   : > { %3462 = vpow2.f32 %v1190_v52  ;;  %1196 = vadd.xlane.f32.xlu2 %v1195_v54 }
 0x594   : > { %v3463_v55 = vpop.eup %3462  ;;  %v3384_v56 = vpop.permute.xlu0 %3383 }
 0x595   : > { %v1198_v57 = vsel %vm1040_vm14, %v3463_v55, 0.0  ;;  %v3385_v58 = vunpack.i.l.bf16 %v3384_v56  ;;  %v3386_v60 = vunpack.i.h.bf16 %v3384_v56 }
 0x596   : > { %1199 = vadd.xlane.f32.xlu1 %v1198_v57 }
 0x597   : > { %1238 = vmatpush.msrb.mxu1 %v3385_v58  ;;  %3316 = vmatpush.msra.mxu3 %v3385_v58 }
 0x599   : > { %1239 = vmatpush.msrb.mxu1 %v3386_v60  ;;  %3317 = vmatpush.msra.mxu3 %v3386_v60 }
 0x59b   : > { %1240 = vmatpush.msrb.mxu1 %v1208_v59  ;;  %3318 = vmatpush.msra.mxu3 %v1208_v59 }
 0x59c   : > { %v1395_v61 = vpop.permute.xlu0 %1394 }
 0x59d   : > { %3215 = vmatpush.xpose.msk.msrb.mxu3 %vm995_vm12, %v1395_v61 }
 0x5a1   : > { %3216 = vmatpush.xpose.msk.msrb.mxu3 %vm995_vm12, %v1393_v62  ;;  %v1385_v5 = vpop.permute.xlu1 %1384 }
 0x5a4   : > { %v1260_v63 = vpop.permute.xlu0 %1259 }
 0x5a5   : > { %3207 = vmatpush.xpose.msk.msrb.mxu0 %vm995_vm12, %v1260_v63 }
 0x5a6   : > { %1386 = vrot.lane.b32.xlu2 %v3954_v33, %s4868_s7  ;;  %v1174_v33 = vsel %vm1040_vm14, %v1171_v4, -inf  ;;  %s4872_s7 = smov 40  }
 0x5a9   : > { %3208 = vmatpush.xpose.msk.msrb.mxu0 %vm995_vm12, %v1258_v45 }
 0x5ac   : > { %v1391_v1 = vpop.permute.xlu0 %1390  ;;  %3209 = vmatmul.msk.f32.vlgmr.msrb.gmra.mxu0 %vm995_vm12, %v1252_v0 }
 0x5ad   : > { %3217 = vmatpush.xpose.msk.msrb.mxu3 %vm995_vm12, %v1391_v1 }
 0x5af   : > { %1255 = vrot.lane.b32.xlu1 %v3958_v35, %s4878_s30  ;;  %s4937_s30 = sld [smem:[#allocation24_spill]] }
 0x5b4   : > { %v1254_v2 = vpop.permute.xlu0 %1253 }
 0x5b5   : > { %3210 = vmatmul.msk.f32.gmra.mxu0 %vm995_vm12, %v1254_v2 }
 0x5bc   : > { %v1389_v15 = vpop.permute.xlu0 %1388 }
 0x5cf   : > { %1175 = vmax.xlane.f32.xlu2 %v1174_v33 }
 0x601   : > { %v1197_v6 = vpop.xlane.xlu2 %1196 }
 0x602   : > { %3464 = vrcp.f32 %v1197_v6 }
 0x608   : > { %v3465_v7 = vpop.eup %3464 }
 0x609   : > { %v1205_v8 = vmul.f32 %v3465_v7, %v3461_v51  ;;  %v1200_v9 = vpop.xlane.xlu1 %1199  ;;  %v1387_v13 = vpop.permute.xlu2 %1386 }
 0x60a   : > { %3466 = vrcp.f32 %v1200_v9 }
 0x60b   : > { %3204 = vmatmul.msk.f32.vlgmr.msra.gmra.mxu3 %vm1040_vm14, %v1205_v8 }
 0x610   : > { %v3467_v35 = vpop.eup %3466 }
 0x611   : > { %v1206_v10 = vmul.f32 %v3467_v35, %v3463_v55 }
 0x613   : > { %3205 = vmatmul.msk.f32.gmra.mxu3 %vm1040_vm14, %v1206_v10 }
 0x61b   : > { %3218 = vmatmul.msk.f32.vlgmr.msrb.gmra.mxu3 %vm995_vm12, %v1385_v5 }
 0x621   : > { %v1256_v11 = vpop.permute.xlu1 %1255 }
 0x622   : > { %3211 = vmatmul.msk.f32.gmra.mxu0 %vm995_vm12, %v1256_v11 }
 0x623   : > { %3219 = vmatmul.msk.f32.gmra.mxu3 %vm995_vm12, %v1387_v13 }
 0x629   : > { %v1292_v14 = vpop.f32.mrf.mxu0 }
 0x62a   : > { %v1301_v17 = vmul.f32 0.35355338, %v1292_v14 }
 0x62b   : > { %3220 = vmatmul.msk.f32.gmra.mxu3 %vm995_vm12, %v1389_v15 }
 0x62c   : > { %v1304_v18 = vsel %vm854_vm13, %v1301_v17, -1e+30 }
 0x62d   : > { %v1307_v19 = vsel %vm1040_vm14, %v1304_v18, -inf }
 0x62e   : > { %1308 = vmax.xlane.f32.xlu1 %v1307_v19 }
 0x632   : > { %v1295_v21 = vpop.f32.mrf.mxu0 }
 0x633   : > { %v1302_v22 = vmul.f32 0.35355338, %v1295_v21 }
 0x635   : > { %v1305_v23 = vsel %vm854_vm13, %v1302_v22, -1e+30 }
 0x636   : > { %v1310_v24 = vsel %vm1040_vm14, %v1305_v23, -inf }
 0x637   : > { %1311 = vmax.xlane.f32.xlu2 %v1310_v24 }
 0x642   : > { %v1176_v25 = vpop.xlane.xlu2 %1175 }
 0x643   : > { %v1183_v26 = vsub.f32 %v1171_v4, %v1176_v25 }
 0x645   : > { %v1186_v27 = vmul.f32 1.442695, %v1183_v26 }
 0x647   : > { %3468 = vpow2.f32 %v1186_v27 }
 0x64d   : > { %v3469_v34 = vpop.eup %3468 }
 0x64e   : > { %v1192_v36 = vsel %vm1040_vm14, %v3469_v34, 0.0 }
 0x64f   : > { %1193 = vadd.xlane.f32.xlu1 %v1192_v36 }
 0x68e   : > { %v4081_v37 = vpop.f32.mrf.mxu3 }
 0x696   : > { %v4083_v38 = vpop.f32.mrf.mxu3 }
 0x69e   : > { %v1425_v39 = vpop.f32.mrf.mxu3 }
 0x69f   : > { %v1298_v41 = vpop.f32.mrf.mxu0  ;;  %v1434_v57 = vmul.f32 0.35355338, %v1425_v39 }
 0x6a0   : > { %v1303_v42 = vmul.f32 0.35355338, %v1298_v41 }
 0x6a1   : > { %v1309_v43 = vpop.xlane.xlu1 %1308  ;;  %v1437_v63 = vsel %vm854_vm13, %v1434_v57, -1e+30 }
 0x6a2   : > { %v1316_v44 = vsub.f32 %v1304_v18, %v1309_v43  ;;  %v1306_v45 = vsel %vm854_vm13, %v1303_v42, -1e+30  ;;  %v1440_v0 = vsel %vm1040_vm14, %v1437_v63, -inf }
 0x6a3   : > { %v1313_v46 = vsel %vm1040_vm14, %v1306_v45, -inf }
 0x6a4   : > { %v1319_v47 = vmul.f32 1.442695, %v1316_v44  ;;  %1314 = vmax.xlane.f32.xlu0 %v1313_v46 }
 0x6a6   : > { %3470 = vpow2.f32 %v1319_v47  ;;  %v1428_v48 = vpop.f32.mrf.mxu3 }
 0x6a7   : > { %v1435_v49 = vmul.f32 0.35355338, %v1428_v48 }
 0x6a9   : > { %v1438_v50 = vsel %vm854_vm13, %v1435_v49, -1e+30 }
 0x6aa   : > { %v1312_v51 = vpop.xlane.xlu2 %1311  ;;  %v1443_v52 = vsel %vm1040_vm14, %v1438_v50, -inf }
 0x6ab   : > { %1444 = vmax.xlane.f32.xlu1 %v1443_v52  ;;  %v1317_v55 = vsub.f32 %v1305_v23, %v1312_v51 }
 0x6ac   : > { %v3471_v54 = vpop.eup %3470 }
 0x6ad   : > { %v1325_v56 = vsel %vm1040_vm14, %v3471_v54, 0.0  ;;  %v1321_v60 = vmul.f32 1.442695, %v1317_v55 }
 0x6ae   : > { %v1431_v58 = vpop.f32.mrf.mxu3  ;;  %1326 = vadd.xlane.f32.xlu0 %v1325_v56 }
 0x6af   : > { %v1436_v59 = vmul.f32 0.35355338, %v1431_v58  ;;  %3472 = vpow2.f32 %v1321_v60 }
 0x6b1   : > { %v4094_v61 = vsel %vm854_vm13, %v1436_v59, -1e+30 }
 0x6b2   : > { %v1446_v62 = vsel %vm1040_vm14, %v4094_v61, -inf }
 0x6b3   : > { %1447 = vmax.xlane.f32.xlu2 %v1446_v62 }
 0x6b5   : > { %v3473_v1 = vpop.eup %3472 }
 0x6b6   : > { %1441 = vmax.xlane.f32.xlu0 %v1440_v0  ;;  %v1328_v2 = vsel %vm1040_vm14, %v3473_v1, 0.0 }
 0x6be   : > { %1329 = vadd.xlane.f32.xlu0 %v1328_v2 }
 0x6c2   : > { %v1194_v3 = vpop.xlane.xlu1 %1193 }
 0x6c3   : > { %3474 = vrcp.f32 %v1194_v3 }
 0x6c4   : > { %1340 = vrot.lane.b32.xlu1 %v3950_v31, %s4870_s10 }
 0x6c9   : > { %v3475_v4 = vpop.eup %3474 }
 0x6ca   : > { %v1204_v33 = vmul.f32 %v3475_v4, %v3469_v34  ;;  %v1565_v4 = vld [vmem:[%s4934_s3 + $0x10] sm:$0xff] }
 0x6cb   : > { %3388 = vrot.lane.b32.xlu2 %v3987_v53, %s4870_s10  ;;  %s4876_s10 = smov 8  }
 0x6cc   : > { %3203 = vmatmul.msk.f32.vlgmr.msrb.gmra.mxu1 %vm1040_vm14, %v1204_v33  ;;  %v1564_v33 = vld [vmem:[%s4934_s3 + $0x8] sm:$0xff] }
 0x6d2   : > { %3393 = vrot.lane.b32.xlu0 %v3987_v53, %s4872_s7 }
 0x717   : > { %v1315_v5 = vpop.xlane.xlu0 %1314 }
 0x718   : > { %v1318_v6 = vsub.f32 %v1306_v45, %v1315_v5  ;;  %v1563_v5 = vld [vmem:[%s4934_s3] sm:$0xff] }
 0x71a   : > { %v1323_v7 = vmul.f32 1.442695, %v1318_v6 }
 0x71c   : > { %3476 = vpow2.f32 %v1323_v7 }
 0x71e   : > { %v1445_v8 = vpop.xlane.xlu1 %1444 }
 0x71f   : > { %v1450_v9 = vsub.f32 %v1438_v50, %v1445_v8 }
 0x721   : > { %v1454_v35 = vmul.f32 1.442695, %v1450_v9  ;;  %v1327_v10 = vpop.xlane.xlu0 %1326 }
 0x722   : > { %v3477_v11 = vpop.eup %3476 }
 0x723   : > { %3478 = vpow2.f32 %v1454_v35  ;;  %v1331_v13 = vsel %vm1040_vm14, %v3477_v11, 0.0 }
 0x724   : > { %1332 = vadd.xlane.f32.xlu0 %v1331_v13  ;;  %3480 = vrcp.f32 %v1327_v10 }
 0x726   : > { %v1448_v14 = vpop.xlane.xlu2 %1447 }
 0x727   : > { %v1451_v46 = vsub.f32 %v4094_v61, %v1448_v14 }
 0x729   : > { %v3479_v15 = vpop.eup %3478  ;;  %v1442_v17 = vpop.xlane.xlu0 %1441  ;;  %v1456_v47 = vmul.f32 1.442695, %v1451_v46 }
 0x72a   : > { %v1449_v18 = vsub.f32 %v1437_v63, %v1442_v17  ;;  %v1461_v19 = vsel %vm1040_vm14, %v3479_v15, 0.0  ;;  %v3481_v25 = vpop.eup %3480 }
 0x72b   : > { %1462 = vadd.xlane.f32.xlu2 %v1461_v19  ;;  %v1337_v36 = vmul.f32 %v3481_v25, %v3471_v54 }
 0x72c   : > { %v1452_v53 = vmul.f32 1.442695, %v1449_v18 }
 0x72e   : > { %3482 = vpow2.f32 %v1452_v53  ;;  %v3389_v21 = vpop.permute.xlu2 %3388 }
 0x72f   : > { %v3390_v22 = vunpack.i.l.bf16 %v3389_v21  ;;  %v3391_v23 = vunpack.i.h.bf16 %v3389_v21 }
 0x731   : > { %1371 = vmatpush.msrb.mxu2 %v3390_v22  ;;  %v1330_v24 = vpop.xlane.xlu0 %1329 }
 0x732   : > { %3484 = vrcp.f32 %v1330_v24 }
 0x733   : > { %1372 = vmatpush.msrb.mxu2 %v3391_v23  ;;  %3486 = vpow2.f32 %v1456_v47 }
 0x734   : > { %v3483_v26 = vpop.eup %3482 }
 0x735   : > { %v1458_v27 = vsel %vm1040_vm14, %v3483_v26, 0.0 }
 0x736   : > { %1459 = vadd.xlane.f32.xlu1 %v1458_v27  ;;  %v1341_v34 = vpop.permute.xlu1 %1340 }
 0x737   : > { %1373 = vmatpush.msrb.mxu2 %v1341_v34 }
 0x738   : > { %3212 = vmatmul.msk.f32.vlgmr.msrb.gmra.mxu2 %vm1040_vm14, %v1337_v36  ;;  %v3485_v39 = vpop.eup %3484 }
 0x739   : > { %v1338_v41 = vmul.f32 %v3485_v39, %v3473_v1  ;;  %v3487_v48 = vpop.eup %3486 }
 0x73a   : > { %v1464_v49 = vsel %vm1040_vm14, %v3487_v48, 0.0 }
 0x740   : > { %3213 = vmatmul.msk.f32.gmra.mxu2 %vm1040_vm14, %v1338_v41 }
 0x744   : > { %v3394_v42 = vpop.permute.xlu0 %3393 }
 0x745   : > { %v3395_v43 = vunpack.i.l.bf16 %v3394_v42  ;;  %v3396_v44 = vunpack.i.h.bf16 %v3394_v42 }
 0x747   : > { %1504 = vmatpush.msra.mxu1 %v3395_v43 }
 0x749   : > { %v1242_v45 = vpop.f32.mrf.mxu1  ;;  %1505 = vmatpush.msra.mxu1 %v3396_v44 }
 0x74a   : > { %1520 = vrot.lane.b32.xlu2 %v1242_v45, %s4876_s10 }
 0x74f   : > { %1473 = vrot.lane.b32.xlu1 %v3950_v31, %s4872_s7  ;;  %s4888_s7 = smov 16  }
 0x752   : > { %1522 = vrot.lane.b32.xlu2 %v4081_v37, %s4876_s10 }
 0x779   : > { %1465 = vadd.xlane.f32.xlu1 %v1464_v49 }
 0x797   : > { %v1333_v50 = vpop.xlane.xlu0 %1332 }
 0x798   : > { %3488 = vrcp.f32 %v1333_v50 }
 0x79e   : > { %v3489_v51 = vpop.eup %3488  ;;  %v1463_v37 = vpop.xlane.xlu2 %1462 }
 0x79f   : > { %v1339_v52 = vmul.f32 %v3489_v51, %v3477_v11 }
 0x7a1   : > { %3214 = vmatmul.msk.f32.gmra.mxu2 %vm1040_vm14, %v1339_v52 }
 0x7a6   : > { %v1521_v6 = vpop.permute.xlu2 %1520 }
 0x7a7   : > { %v1553_v9 = vsel %vm995_vm12, %v4026_v29, %v1521_v6 }
 0x7a9   : > { %v1460_v54 = vpop.xlane.xlu1 %1459 }
 0x7aa   : > { %3490 = vrcp.f32 %v1460_v54 }
 0x7ab   : > { %3492 = vrcp.f32 %v1463_v37 }
 0x7ae   : > { %v1523_v8 = vpop.permute.xlu2 %1522 }
 0x7b0   : > { %v3491_v55 = vpop.eup %3490 }
 0x7b1   : > { %v1470_v56 = vmul.f32 %v3491_v55, %v3483_v26  ;;  %v3493_v59 = vpop.eup %3492 }
 0x7b2   : > { %v1471_v60 = vmul.f32 %v3493_v59, %v3479_v15  ;;  %v1554_v15 = vsel %vm995_vm12, %v4028_v30, %v1523_v8  ;;  %v3423_v30 = vld [vmem:[%s4935_s27] ss:$0 sm:$0xff] }
 0x7b3   : > { %v1689_v59 = vld [vmem:[%s4936_s11] sm:$0xff] }
 0x7b4   : > { %v3424_v8 = vld [vmem:[%s4937_s30] ss:$0 sm:$0xff] }
 0x7bb   : > { %v1375_v31 = vpop.f32.mrf.mxu2 }
 0x7bc   : > { %1532 = vrot.lane.b32.xlu0 %v1375_v31, %s4888_s7 }
 0x7c1   : > { %v1474_v57 = vpop.permute.xlu1 %1473 }
 0x7c2   : > { %1506 = vmatpush.msra.mxu1 %v1474_v57  ;;  %v1691_v57 = vld [vmem:[%s4936_s11 + $0x10] sm:$0xff] }
 0x7c3   : > { %v1378_v58 = vpop.f32.mrf.mxu2  ;;  %3221 = vmatmul.msk.f32.vlgmr.msra.gmra.mxu1 %vm1040_vm14, %v1470_v56  ;;  %v1692_v56 = vld [vmem:[%s4936_s11 + $0x18] sm:$0xff] }
 0x7c4   : > { %1534 = vrot.lane.b32.xlu0 %v1378_v58, %s4888_s7  ;;  %1718 = vmatpush.msra.mxu2 %v1692_v56  ;;  %v1690_v58 = vld [vmem:[%s4936_s11 + $0x8] sm:$0xff] }
 0x7c5   : > { %v1760_v56 = vld [vmem:[%s4830_s13 + $0x8] sm:$0xff] }
 0x7c6   : > { %1719 = vmatpush.msra.mxu2 %v1691_v57  ;;  %v1759_v57 = vld [vmem:[%s4830_s13] sm:$0xff] }
 0x7c8   : > { %1720 = vmatpush.msra.mxu2 %v1690_v58  ;;  %v3426_v58 = vld [vmem:[%s4829_s12] ss:$0 sm:$0xff] }
 0x7ca   : > { %1721 = vmatpush.msra.mxu2 %v1689_v59 }
 0x7cb   : > { %3222 = vmatmul.msk.f32.gmra.mxu1 %vm1040_vm14, %v1471_v60 }
 0x7cc   : > { %1524 = vrot.lane.b32.xlu0 %v4083_v38, %s4876_s10  ;;  %v1566_v38 = vld [vmem:[%s4934_s3 + $0x18] sm:$0xff]  ;;  %s4938_s10 = sld [smem:[#allocation25_spill]] }
 0x7cd   : > { %1592 = vmatpush.msra.mxu0 %v1566_v38 }
 0x7cf   : > { %1593 = vmatpush.msra.mxu0 %v1565_v4 }
 0x7d1   : > { %1594 = vmatpush.msra.mxu0 %v1564_v33 }
 0x7d3   : > { %1595 = vmatpush.msra.mxu0 %v1563_v5 }
 0x7ec   : > { %v1466_v61 = vpop.xlane.xlu1 %1465 }
 0x7ed   : > { %3494 = vrcp.f32 %v1466_v61 }
 0x7f3   : > { %v3495_v62 = vpop.eup %3494 }
 0x7f4   : > { %v1472_v63 = vmul.f32 %v3495_v62, %v3487_v48 }
 0x7f6   : > { %3223 = vmatmul.msk.f32.gmra.mxu1 %vm1040_vm14, %v1472_v63 }
 0x824   : > { %v1381_v2 = vpop.f32.mrf.mxu2 }
 0x82e   : > { %v1533_v7 = vpop.permute.xlu0 %1532 }
 0x82f   : > { %v1557_v35 = vsel %vm1556_vm15, %v1553_v9, %v1533_v7 }
 0x836   : > { %v1535_v13 = vpop.permute.xlu0 %1534 }
 0x837   : > { %v1558_v17 = vsel %vm1556_vm15, %v1554_v15, %v1535_v13 }
 0x83e   : > { %v1525_v19 = vpop.permute.xlu0 %1524 }
 0x83f   : > { %v1555_v53 = vsel %vm995_vm12, %v4030_v32, %v1525_v19 }
 0x840   : > { %v1508_v0 = vpop.f32.mrf.mxu1 }
 0x841   : > { %1544 = vrot.lane.b32.xlu1 %v1508_v0, %s4890_s4 }
 0x848   : > { %v1511_v1 = vpop.f32.mrf.mxu1 }
 0x849   : > { %1546 = vrot.lane.b32.xlu2 %v1511_v1, %s4890_s4 }
 0x851   : > { %1536 = vrot.lane.b32.xlu2 %v1381_v2, %s4888_s7  ;;  %s4944_s7 = smov 112  }
 0x873   : > { %v1514_v3 = vpop.f32.mrf.mxu1 }
 0x874   : > { %1548 = vrot.lane.b32.xlu0 %v1514_v3, %s4890_s4  ;;  %s4941_s4 = smov 88  }
 0x8a3   : > { %v1547_v14 = vpop.permute.xlu2 %1546 }
 0x8a4   : > { %v1561_v18 = vsel %vm1040_vm14, %v1558_v17, %v1547_v14 }
 0x8ab   : > { %v1537_v29 = vpop.permute.xlu2 %1536 }
 0x8ac   : > { %v1559_v21 = vsel %vm1556_vm15, %v1555_v53, %v1537_v29 }
 0x8b3   : > { %v1545_v10 = vpop.permute.xlu1 %1544 }
 0x8b4   : > { %v1560_v11 = vsel %vm1040_vm14, %v1557_v35, %v1545_v10 }
 0x8b5   : > { %3224 = vmatmul.msk.f32.vlgmr.msra.gmra.mxu0 %vm857_vm1, %v1560_v11  ;;  %v3425_v11 = vld [vmem:[%s4938_s10] ss:$0 sm:$0xff] }
 0x8bd   : > { %3225 = vmatmul.msk.f32.gmra.mxu0 %vm857_vm1, %v1561_v18 }
 0x8e6   : > { %v1549_v22 = vpop.permute.xlu0 %1548 }
 0x8e7   : > { %v1562_v23 = vsel %vm1040_vm14, %v1559_v21, %v1549_v22  ;;  %v1774_v22 = vld [vmem:[%s4830_s13 + $0x78] sm:$0xff] }
 0x8e8   : > { %3226 = vmatmul.msk.f32.gmra.mxu0 %vm857_vm1, %v1562_v23  ;;  %v1773_v23 = vld [vmem:[%s4830_s13 + $0x70] sm:$0xff]  ;;  %1779 = vmatpush.msra.mxu3 %v1774_v22 }
 0x8ea   : > { %1780 = vmatpush.msra.mxu3 %v1773_v23 }
 0x932   : > { %v1597_v24 = vpop.f32.mrf.mxu0 }
 0x933   : > { %v1598_v25 = vadd.f32 %v3423_v30, %v1597_v24 }
 0x935   : > { %v4164_v26 = vadd.f32 %v1598_v25, %v3889_v12 }
 0x937   : > { %v1611_v27 = vsel %vm857_vm1, %v4164_v26, 0.0 }
 0x938   : > { %1612 = vadd.xlane.f32.xlu2 %v1611_v27  ;;  %v1771_v27 = vld [vmem:[%s4830_s13 + $0x60] sm:$0xff] }
 0x93a   : > { %v1600_v32 = vpop.f32.mrf.mxu0 }
 0x93b   : > { %v1601_v34 = vadd.f32 %v3423_v30, %v1600_v32 }
 0x93d   : > { %v4169_v36 = vadd.f32 %v1601_v34, %v3896_v16 }
 0x93f   : > { %v1614_v39 = vsel %vm857_vm1, %v4169_v36, 0.0 }
 0x940   : > { %1615 = vadd.xlane.f32.xlu1 %v1614_v39 }
 0x965   : > { %v1603_v41 = vpop.f32.mrf.mxu0 }
 0x966   : > { %v1604_v42 = vadd.f32 %v3423_v30, %v1603_v41  ;;  %v1772_v30 = vld [vmem:[%s4830_s13 + $0x68] sm:$0xff] }
 0x967   : > { %1781 = vmatpush.msra.mxu3 %v1772_v30 }
 0x968   : > { %v4174_v43 = vadd.f32 %v1604_v42, %v3903_v20 }
 0x969   : > { %1782 = vmatpush.msra.mxu3 %v1771_v27 }
 0x96a   : > { %v1617_v12 = vsel %vm857_vm1, %v4174_v43, 0.0 }
 0x96b   : > { %1618 = vadd.xlane.f32.xlu0 %v1617_v12 }
 0x9ab   : > { %v1613_v44 = vpop.xlane.xlu2 %1612 }
 0x9ac   : > { %v1620_v45 = vmul.f32 %v1613_v44, %v3907_v28 }
 0x9ae   : > { %v1623_v46 = vsub.f32 %v4164_v26, %v1620_v45 }
 0x9b0   : > { %v1626_v16 = vmul.f32 %v1623_v46, %v1623_v46 }
 0x9b2   : > { %v1629_v47 = vsel %vm857_vm1, %v1626_v16, 0.0 }
 0x9b3   : > { %v1616_v48 = vpop.xlane.xlu1 %1615  ;;  %1630 = vadd.xlane.f32.xlu2 %v1629_v47 }
 0x9b4   : > { %v1621_v49 = vmul.f32 %v1616_v48, %v3907_v28  ;;  %v1770_v48 = vld [vmem:[%s4830_s13 + $0x58] sm:$0xff] }
 0x9b5   : > { %1783 = vmatpush.msra.mxu3 %v1770_v48 }
 0x9b6   : > { %v1624_v50 = vsub.f32 %v4169_v36, %v1621_v49  ;;  %v1769_v49 = vld [vmem:[%s4830_s13 + $0x50] sm:$0xff] }
 0x9b7   : > { %1784 = vmatpush.msra.mxu3 %v1769_v49 }
 0x9b8   : > { %v1627_v20 = vmul.f32 %v1624_v50, %v1624_v50 }
 0x9ba   : > { %v1632_v51 = vsel %vm857_vm1, %v1627_v20, 0.0  ;;  %v1767_v20 = vld [vmem:[%s4830_s13 + $0x40] sm:$0xff] }
 0x9bb   : > { %1633 = vadd.xlane.f32.xlu1 %v1632_v51  ;;  %v1766_v51 = vld [vmem:[%s4830_s13 + $0x38] sm:$0xff] }
 0x9de   : > { %v1619_v52 = vpop.xlane.xlu0 %1618 }
 0x9df   : > { %v1622_v54 = vmul.f32 %v1619_v52, %v3907_v28  ;;  %v1765_v52 = vld [vmem:[%s4830_s13 + $0x30] sm:$0xff] }
 0x9e1   : > { %v4186_v31 = vsub.f32 %v4174_v43, %v1622_v54  ;;  %v1764_v54 = vld [vmem:[%s4830_s13 + $0x28] sm:$0xff] }
 0x9e3   : > { %v1628_v37 = vmul.f32 %v4186_v31, %v4186_v31 }
 0x9e5   : > { %v1635_v55 = vsel %vm857_vm1, %v1628_v37, 0.0  ;;  %v1762_v37 = vld [vmem:[%s4830_s13 + $0x18] sm:$0xff] }
 0x9e6   : > { %1636 = vadd.xlane.f32.xlu2 %v1635_v55  ;;  %v1761_v55 = vld [vmem:[%s4830_s13 + $0x10] sm:$0xff] }
 0xa26   : > { %v1631_v60 = vpop.xlane.xlu2 %1630 }
 0xa27   : > { %v1638_v61 = vmul.f32 %v1631_v60, %v3907_v28 }
 0xa29   : > { %v1641_v62 = vadd.f32 1e-06, %v1638_v61 }
 0xa2b   : > { %3496 = vrsqrt.f32 %v1641_v62  ;;  %vm1650_vm2 = vweird.f32 %v1641_v62 }
 0xa2e   : > { %v1634_v63 = vpop.xlane.xlu1 %1633 }
 0xa2f   : > { %v1639_v0 = vmul.f32 %v1634_v63, %v3907_v28 }
 0xa31   : > { %v3497_v1 = vpop.eup %3496  ;;  %v1642_v2 = vadd.f32 1e-06, %v1639_v0 }
 0xa32   : > { %v1645_v3 = vmul.f32 %v3497_v1, %v1641_v62  ;;  %vm1651_vm0 = vweird.f32 %v3497_v1 }
 0xa33   : > { %3498 = vrsqrt.f32 %v1642_v2  ;;  %vm1652_vm3 = vmor %vm1650_vm2, %vm1651_vm0  ;;  %vm1660_vm5 = vweird.f32 %v1642_v2 }
 0xa34   : > { %v1646_v38 = vmul.f32 %v3497_v1, %v1645_v3 }
 0xa36   : > { %v1647_v4 = vmul.f32 0.5, %v1646_v38 }
 0xa38   : > { %v1648_v33 = vsub.f32 1.5, %v1647_v4 }
 0xa39   : > { %v3499_v5 = vpop.eup %3498 }
 0xa3a   : > { %v1649_v6 = vmul.f32 %v3497_v1, %v1648_v33  ;;  %v1655_v7 = vmul.f32 %v3499_v5, %v1642_v2  ;;  %vm1661_vm4 = vweird.f32 %v3499_v5 }
 0xa3b   : > { %vm1662_vm6 = vmor %vm1660_vm5, %vm1661_vm4 }
 0xa3c   : > { %v1653_v9 = vsel %vm1652_vm3, %v3497_v1, %v1649_v6  ;;  %v1656_v35 = vmul.f32 %v3499_v5, %v1655_v7 }
 0xa3d   : > { %v1674_v10 = vmul.f32 %v1653_v9, %v1623_v46 }
 0xa3e   : > { %v1657_v13 = vmul.f32 0.5, %v1656_v35 }
 0xa3f   : > { %v1680_v14 = vmul.f32 %v3424_v8, %v1674_v10 }
 0xa40   : > { %v1658_v15 = vsub.f32 1.5, %v1657_v13 }
 0xa41   : > { %v1686_v17 = vadd.f32 %v3425_v11, %v1680_v14 }
 0xa42   : > { %v1659_v18 = vmul.f32 %v3499_v5, %v1658_v15 }
 0xa43   : > { %3227 = vmatmul.msk.f32.vlgmr.msra.gmra.mxu2 %vm857_vm1, %v1686_v17 }
 0xa44   : > { %v1663_v19 = vsel %vm1662_vm6, %v3499_v5, %v1659_v18 }
 0xa45   : > { %v1675_v29 = vmul.f32 %v1663_v19, %v1624_v50  ;;  %v1768_v50 = vld [vmem:[%s4830_s13 + $0x48] sm:$0xff] }
 0xa46   : > { %1785 = vmatpush.msra.mxu3 %v1768_v50 }
 0xa47   : > { %v1681_v53 = vmul.f32 %v3424_v8, %v1675_v29 }
 0xa48   : > { %1786 = vmatpush.msra.mxu3 %v1767_v20 }
 0xa49   : > { %v1687_v21 = vadd.f32 %v3425_v11, %v1681_v53 }
 0xa4a   : > { %1787 = vmatpush.msra.mxu3 %v1766_v51 }
 0xa4b   : > { %3228 = vmatmul.msk.f32.gmra.mxu2 %vm857_vm1, %v1687_v21 }
 0xa4c   : > { %1788 = vmatpush.msra.mxu3 %v1765_v52 }
 0xa4e   : > { %1789 = vmatpush.msra.mxu3 %v1764_v54 }
 0xa59   : > { %v1637_v24 = vpop.xlane.xlu2 %1636 }
 0xa5a   : > { %v1640_v25 = vmul.f32 %v1637_v24, %v3907_v28 }
 0xa5c   : > { %v1643_v32 = vadd.f32 1e-06, %v1640_v25  ;;  %v3427_v25 = vld [vmem:[%s4831_s14] ss:$0 sm:$0xff] }
 0xa5e   : > { %3500 = vrsqrt.f32 %v1643_v32  ;;  %vm1670_vm8 = vweird.f32 %v1643_v32 }
 0xa64   : > { %v3501_v34 = vpop.eup %3500 }
 0xa65   : > { %v1665_v39 = vmul.f32 %v3501_v34, %v1643_v32  ;;  %vm1671_vm7 = vweird.f32 %v3501_v34 }
 0xa66   : > { %vm1672_vm9 = vmor %vm1670_vm8, %vm1671_vm7 }
 0xa67   : > { %v1666_v41 = vmul.f32 %v3501_v34, %v1665_v39 }
 0xa69   : > { %v1667_v42 = vmul.f32 0.5, %v1666_v41 }
 0xa6b   : > { %v1668_v12 = vsub.f32 1.5, %v1667_v42 }
 0xa6d   : > { %v1669_v44 = vmul.f32 %v3501_v34, %v1668_v12 }
 0xa6f   : > { %v1673_v45 = vsel %vm1672_vm9, %v3501_v34, %v1669_v44 }
 0xa70   : > { %v1676_v46 = vmul.f32 %v1673_v45, %v4186_v31  ;;  %v1763_v31 = vld [vmem:[%s4830_s13 + $0x20] sm:$0xff] }
 0xa71   : > { %1790 = vmatpush.msra.mxu3 %v1763_v31 }
 0xa72   : > { %v1682_v16 = vmul.f32 %v3424_v8, %v1676_v46 }
 0xa73   : > { %1791 = vmatpush.msra.mxu3 %v1762_v37 }
 0xa74   : > { %v1688_v47 = vadd.f32 %v3425_v11, %v1682_v16 }
 0xa75   : > { %1792 = vmatpush.msra.mxu3 %v1761_v55 }
 0xa76   : > { %3229 = vmatmul.msk.f32.gmra.mxu2 %vm857_vm1, %v1688_v47 }
 0xa77   : > { %1793 = vmatpush.msra.mxu3 %v1760_v56 }
 0xa79   : > { %1794 = vmatpush.msra.mxu3 %v1759_v57 }
 0xac6   : > { %v1723_v59 = vpop.f32.mrf.mxu2 }
 0xac7   : > { %v1724_v60 = vadd.f32 %v3426_v58, %v1723_v59  ;;  %v3234_v59 = vld [vmem:[%s4929_s9 + $0x30] sm:$0xff] }
 0xac9   : > { %v1735_v61 = vmul.f32 0.044715, %v1724_v60  ;;  %v1732_v8 = vmul.f32 0.5, %v1724_v60 }
 0xacb   : > { %v1738_v62 = vmul.f32 %v1735_v61, %v1724_v60  ;;  %v3232_v61 = vld [vmem:[%s4929_s9 + $0x20] sm:$0xff] }
 0xacd   : > { %v1741_v63 = vmul.f32 %v1738_v62, %v1724_v60 }
 0xace   : > { %v1726_v0 = vpop.f32.mrf.mxu2 }
 0xacf   : > { %v1727_v1 = vadd.f32 %v3426_v58, %v1726_v0  ;;  %v1744_v2 = vadd.f32 %v1741_v63, %v1724_v60  ;;  %v3233_v60 = vld [vmem:[%s4929_s9 + $0x28] sm:$0xff] }
 0xad1   : > { %v1747_v3 = vmul.f32 0.7978845, %v1744_v2  ;;  %v1736_v38 = vmul.f32 0.044715, %v1727_v1  ;;  %v1733_v11 = vmul.f32 0.5, %v1727_v1 }
 0xad3   : > { %3502 = vtanh.f32 %v1747_v3  ;;  %v1739_v4 = vmul.f32 %v1736_v38, %v1727_v1 }
 0xad5   : > { %v1742_v33 = vmul.f32 %v1739_v4, %v1727_v1 }
 0xad7   : > { %v1745_v5 = vadd.f32 %v1742_v33, %v1727_v1 }
 0xad9   : > { %v3503_v6 = vpop.eup %3502  ;;  %v1748_v7 = vmul.f32 0.7978845, %v1745_v5 }
 0xada   : > { %v1753_v9 = vadd.f32 1.0, %v3503_v6 }
 0xadb   : > { %3504 = vtanh.f32 %v1748_v7 }
 0xadc   : > { %v1756_v35 = vmul.f32 %v1753_v9, %v1732_v8 }
 0xade   : > { %1795 = vmatmul.f32.vlgmr.msra.gmra.mxu3 %v1756_v35  ;;  %v3428_v35 = vld [vmem:[%s4930_s29 + $0x1] ss:$0 sm:$0xff] }
 0xae1   : > { %v3505_v10 = vpop.eup %3504 }
 0xae2   : > { %v1754_v13 = vadd.f32 1.0, %v3505_v10 }
 0xae4   : > { %v1757_v14 = vmul.f32 %v1754_v13, %v1733_v11 }
 0xae6   : > { %1798 = vmatmul.f32.gmra.mxu3 %v1757_v14  ;;  %v3429_v14 = vld [vmem:[%s4931_s2 + $0x1] ss:$0 sm:$0xff]  ;;  %s4956_s2 = sld [smem:[#allocation29_spill]] }
 0xaf9   : > { %v1729_v15 = vpop.f32.mrf.mxu2 }
 0xafa   : > { %v1730_v17 = vadd.f32 %v3426_v58, %v1729_v15  ;;  %v3235_v58 = vld [vmem:[%s4929_s9 + $0x38] sm:$0xff]  ;;  %s4957_s9 = sld [smem:[#allocation28_spill]] }
 0xafb   : > { %1921 = vmatpush.msrb.mxu1 %v3235_v58 }
 0xafc   : > { %v1737_v18 = vmul.f32 0.044715, %v1730_v17  ;;  %v1734_v23 = vmul.f32 0.5, %v1730_v17 }
 0xafd   : > { %1922 = vmatpush.msrb.mxu1 %v3234_v59 }
 0xafe   : > { %v1740_v19 = vmul.f32 %v1737_v18, %v1730_v17 }
 0xaff   : > { %1923 = vmatpush.msrb.mxu1 %v3233_v60 }
 0xb00   : > { %v1743_v29 = vmul.f32 %v1740_v19, %v1730_v17 }
 0xb01   : > { %1924 = vmatpush.msrb.mxu1 %v3232_v61 }
 0xb02   : > { %v1746_v53 = vadd.f32 %v1743_v29, %v1730_v17 }
 0xb04   : > { %v1749_v21 = vmul.f32 0.7978845, %v1746_v53 }
 0xb06   : > { %3506 = vtanh.f32 %v1749_v21 }
 0xb0c   : > { %v3507_v22 = vpop.eup %3506 }
 0xb0d   : > { %v1755_v30 = vadd.f32 1.0, %v3507_v22 }
 0xb0f   : > { %v1758_v24 = vmul.f32 %v1755_v30, %v1734_v23 }
 0xb11   : > { %1801 = vmatmul.f32.gmra.mxu3 %v1758_v24 }
 0xb61   : > { %v1796_v27 = vpop.f32.mrf.mxu3 }
 0xb62   : > { %v1797_v32 = vadd.f32 %v3427_v25, %v1796_v27 }
 0xb64   : > { %v4271_v34 = vadd.f32 %v1797_v32, %v4164_v26 }
 0xb66   : > { %v1812_v39 = vsel %vm857_vm1, %v4271_v34, 0.0 }
 0xb67   : > { %1813 = vadd.xlane.f32.xlu0 %v1812_v39 }
 0xb69   : > { %v1799_v41 = vpop.f32.mrf.mxu3 }
 0xb6a   : > { %v1800_v42 = vadd.f32 %v3427_v25, %v1799_v41 }
 0xb6c   : > { %v4276_v12 = vadd.f32 %v1800_v42, %v4169_v36 }
 0xb6e   : > { %v1815_v44 = vsel %vm857_vm1, %v4276_v12, 0.0 }
 0xb6f   : > { %1816 = vadd.xlane.f32.xlu1 %v1815_v44 }
 0xb94   : > { %v1802_v45 = vpop.f32.mrf.mxu3 }
 0xb95   : > { %v1803_v46 = vadd.f32 %v3427_v25, %v1802_v45 }
 0xb97   : > { %v4281_v16 = vadd.f32 %v1803_v46, %v4174_v43 }
 0xb99   : > { %v1818_v26 = vsel %vm857_vm1, %v4281_v16, 0.0 }
 0xb9a   : > { %1819 = vadd.xlane.f32.xlu2 %v1818_v26 }
 0xbda   : > { %v1814_v47 = vpop.xlane.xlu0 %1813 }
 0xbdb   : > { %v1821_v48 = vmul.f32 %v1814_v47, %v3907_v28 }
 0xbdd   : > { %v1824_v49 = vsub.f32 %v4271_v34, %v1821_v48  ;;  %v3430_v48 = vld [vmem:[%s4933_s1 + $0x1] ss:$0 sm:$0xff] }
 0xbdf   : > { %v1827_v36 = vmul.f32 %v1824_v49, %v1824_v49 }
 0xbe1   : > { %v1830_v50 = vsel %vm857_vm1, %v1827_v36, 0.0 }
 0xbe2   : > { %v1817_v20 = vpop.xlane.xlu1 %1816  ;;  %1831 = vadd.xlane.f32.xlu0 %v1830_v50 }
 0xbe3   : > { %v1822_v51 = vmul.f32 %v1817_v20, %v3907_v28 }
 0xbe5   : > { %v1825_v52 = vsub.f32 %v4276_v12, %v1822_v51 }
 0xbe7   : > { %v1828_v43 = vmul.f32 %v1825_v52, %v1825_v52 }
 0xbe9   : > { %v1833_v54 = vsel %vm857_vm1, %v1828_v43, 0.0 }
 0xbea   : > { %1834 = vadd.xlane.f32.xlu1 %v1833_v54 }
 0xc0d   : > { %v1820_v31 = vpop.xlane.xlu2 %1819 }
 0xc0e   : > { %v1823_v37 = vmul.f32 %v1820_v31, %v3907_v28 }
 0xc10   : > { %v4293_v55 = vsub.f32 %v4281_v16, %v1823_v37 }
 0xc12   : > { %v1829_v56 = vmul.f32 %v4293_v55, %v4293_v55 }
 0xc14   : > { %v1836_v57 = vsel %vm857_vm1, %v1829_v56, 0.0 }
 0xc15   : > { %1837 = vadd.xlane.f32.xlu2 %v1836_v57 }
 0xc55   : > { %v1832_v62 = vpop.xlane.xlu0 %1831 }
 0xc56   : > { %v1839_v63 = vmul.f32 %v1832_v62, %v3907_v28 }
 0xc58   : > { %v1842_v0 = vadd.f32 1e-06, %v1839_v63 }
 0xc5a   : > { %3508 = vrsqrt.f32 %v1842_v0  ;;  %vm1851_vm11 = vweird.f32 %v1842_v0 }
 0xc5d   : > { %v1835_v1 = vpop.xlane.xlu1 %1834 }
 0xc5e   : > { %v1840_v2 = vmul.f32 %v1835_v1, %v3907_v28 }
 0xc60   : > { %v3509_v3 = vpop.eup %3508  ;;  %v1843_v38 = vadd.f32 1e-06, %v1840_v2 }
 0xc61   : > { %v1846_v4 = vmul.f32 %v3509_v3, %v1842_v0  ;;  %vm1852_vm10 = vweird.f32 %v3509_v3 }
 0xc62   : > { %3510 = vrsqrt.f32 %v1843_v38  ;;  %vm1853_vm0 = vmor %vm1851_vm11, %vm1852_vm10  ;;  %vm1861_vm3 = vweird.f32 %v1843_v38 }
 0xc63   : > { %v1847_v33 = vmul.f32 %v3509_v3, %v1846_v4 }
 0xc65   : > { %v1848_v5 = vmul.f32 0.5, %v1847_v33 }
 0xc67   : > { %v1849_v6 = vsub.f32 1.5, %v1848_v5 }
 0xc68   : > { %v3511_v7 = vpop.eup %3510 }
 0xc69   : > { %v1850_v8 = vmul.f32 %v3509_v3, %v1849_v6  ;;  %v1856_v9 = vmul.f32 %v3511_v7, %v1843_v38  ;;  %vm1862_vm2 = vweird.f32 %v3511_v7 }
 0xc6a   : > { %vm1863_vm4 = vmor %vm1861_vm3, %vm1862_vm2 }
 0xc6b   : > { %v1854_v10 = vsel %vm1853_vm0, %v3509_v3, %v1850_v8  ;;  %v1857_v11 = vmul.f32 %v3511_v7, %v1856_v9 }
 0xc6c   : > { %v1875_v13 = vmul.f32 %v1854_v10, %v1824_v49 }
 0xc6d   : > { %v1858_v15 = vmul.f32 0.5, %v1857_v11 }
 0xc6e   : > { %v1881_v17 = vmul.f32 %v3428_v35, %v1875_v13 }
 0xc6f   : > { %v1859_v18 = vsub.f32 1.5, %v1858_v15 }
 0xc70   : > { %v1887_v19 = vadd.f32 %v3429_v14, %v1881_v17 }
 0xc71   : > { %v1860_v29 = vmul.f32 %v3511_v7, %v1859_v18 }
 0xc72   : > { %3237 = vmatmul.msk.f32.vlgmr.msrb.gmra.mxu1 %vm857_vm1, %v1887_v19 }
 0xc73   : > { %v1864_v53 = vsel %vm1863_vm4, %v3511_v7, %v1860_v29 }
 0xc74   : > { %v1876_v21 = vmul.f32 %v1864_v53, %v1825_v52 }
 0xc76   : > { %v1882_v22 = vmul.f32 %v3428_v35, %v1876_v21 }
 0xc78   : > { %v1888_v23 = vadd.f32 %v3429_v14, %v1882_v22 }
 0xc7a   : > { %3238 = vmatmul.msk.f32.gmra.mxu1 %vm857_vm1, %v1888_v23 }
 0xc88   : > { %v1838_v30 = vpop.xlane.xlu2 %1837 }
 0xc89   : > { %v1841_v24 = vmul.f32 %v1838_v30, %v3907_v28 }
 0xc8b   : > { %v1844_v25 = vadd.f32 1e-06, %v1841_v24 }
 0xc8d   : > { %3512 = vrsqrt.f32 %v1844_v25  ;;  %vm1871_vm6 = vweird.f32 %v1844_v25 }
 0xc93   : > { %v3513_v27 = vpop.eup %3512 }
 0xc94   : > { %v1866_v32 = vmul.f32 %v3513_v27, %v1844_v25  ;;  %vm1872_vm5 = vweird.f32 %v3513_v27 }
 0xc95   : > { %vm1873_vm7 = vmor %vm1871_vm6, %vm1872_vm5  ;;  %vm2849_vm5 = vcmask 261121  }
 0xc96   : > { %v1867_v39 = vmul.f32 %v3513_v27, %v1866_v32 }
 0xc98   : > { %v1868_v41 = vmul.f32 0.5, %v1867_v39 }
 0xc9a   : > { %v1869_v42 = vsub.f32 1.5, %v1868_v41 }
 0xc9c   : > { %v1870_v44 = vmul.f32 %v3513_v27, %v1869_v42 }
 0xc9e   : > { %v1874_v45 = vsel %vm1873_vm7, %v3513_v27, %v1870_v44 }
 0xc9f   : > { %v1877_v46 = vmul.f32 %v1874_v45, %v4293_v55 }
 0xca1   : > { %v1883_v26 = vmul.f32 %v3428_v35, %v1877_v46 }
 0xca3   : > { %v1889_v47 = vadd.f32 %v3429_v14, %v1883_v26 }
 0xca5   : > { %3239 = vmatmul.msk.f32.gmra.mxu1 %vm857_vm1, %v1889_v47 }
 0xcef   : > { %v1926_v49 = vpop.f32.mrf.mxu1 }
 0xcf0   : > { %v4326_v36 = vadd.f32 %v3430_v48, %v1926_v49 }
 0xcf2   : > { %1938 = vrot.lane.b32.xlu2 %v4326_v36, %s4939_s24 }
 0xcf7   : > { %v1929_v50 = vpop.f32.mrf.mxu1 }
 0xcf8   : > { %v4330_v20 = vadd.f32 %v3430_v48, %v1929_v50 }
 0xcfa   : > { %1940 = vrot.lane.b32.xlu1 %v4330_v20, %s4939_s24  ;;  %2021 = vrot.lane.b32.xlu2 %v4326_v36, %s4940_s5 }
 0xd22   : > { %v1932_v51 = vpop.f32.mrf.mxu1 }
 0xd23   : > { %v4336_v52 = vadd.f32 %v3430_v48, %v1932_v51 }
 0xd25   : > { %1942 = vrot.lane.b32.xlu0 %v4336_v52, %s4939_s24  ;;  %v4364_v2 = vpack.i.bf16 %v4330_v20, %v4336_v52  ;;  %s4949_s24 = smov 40  }
 0xd4c   : > { %v1939_v31 = vpop.permute.xlu2 %1938 }
 0xd54   : > { %v2022_v33 = vpop.permute.xlu2 %2021 }
 0xd6c   : > { %v1941_v54 = vpop.permute.xlu1 %1940 }
 0xd97   : > { %v1943_v43 = vpop.permute.xlu0 %1942 }
 0xd98   : > { %3240 = vmatpush.xpose.msk.msrb.mxu0 %vm995_vm12, %v1943_v43 }
 0xd9c   : > { %3241 = vmatpush.xpose.msk.msrb.mxu0 %vm995_vm12, %v1941_v54 }
 0xda0   : > { %3242 = vmatpush.xpose.msk.msrb.mxu0 %vm995_vm12, %v1939_v31 }
 0xda3   : > { %3243 = vmatmul.msk.f32.vlgmr.msrb.gmra.mxu0 %vm995_vm12, %v4326_v36 }
 0xdab   : > { %3244 = vmatmul.msk.f32.gmra.mxu0 %vm995_vm12, %v4330_v20 }
 0xdb3   : > { %3245 = vmatmul.msk.f32.gmra.mxu0 %vm995_vm12, %v4336_v52 }
 0xe20   : > { %v1973_v37 = vpop.f32.mrf.mxu0 }
 0xe21   : > { %v1982_v55 = vmul.f32 0.35355338, %v1973_v37 }
 0xe23   : > { %v1985_v56 = vsel %vm854_vm13, %v1982_v55, -1e+30 }
 0xe24   : > { %v1988_v57 = vsel %vm1040_vm14, %v1985_v56, -inf }
 0xe25   : > { %1989 = vmax.xlane.f32.xlu0 %v1988_v57 }
 0xe28   : > { %v1976_v58 = vpop.f32.mrf.mxu0 }
 0xe29   : > { %v1983_v59 = vmul.f32 0.35355338, %v1976_v58 }
 0xe2b   : > { %v1986_v60 = vsel %vm854_vm13, %v1983_v59, -1e+30 }
 0xe2c   : > { %v1991_v61 = vsel %vm1040_vm14, %v1986_v60, -inf }
 0xe2d   : > { %1992 = vmax.xlane.f32.xlu1 %v1991_v61 }
 0xe30   : > { %v1979_v62 = vpop.f32.mrf.mxu0 }
 0xe31   : > { %v1984_v63 = vmul.f32 0.35355338, %v1979_v62 }
 0xe33   : > { %v1987_v0 = vsel %vm854_vm13, %v1984_v63, -1e+30 }
 0xe34   : > { %v1994_v1 = vsel %vm1040_vm14, %v1987_v0, -inf }
 0xe35   : > { %1995 = vmax.xlane.f32.xlu2 %v1994_v1 }
 0xe39   : > { %2075 = vrot.lane.b32.xlu0 %v4336_v52, %s4941_s4 }
 0xe41   : > { %2071 = vrot.lane.b32.xlu0 %v4326_v36, %s4941_s4 }
 0xe46   : > { %3398 = vrot.lane.b32.xlu1 %v4364_v2, %s4940_s5  ;;  %s4950_s5 = smov 8  }
 0xe49   : > { %2208 = vrot.lane.b32.xlu0 %v4336_v52, %s4942_s6 }
 0xe4d   : > { %2073 = vrot.lane.b32.xlu2 %v4330_v20, %s4941_s4  ;;  %s4951_s4 = smov 16  }
 0xe51   : > { %2067 = vrot.lane.b32.xlu0 %v4330_v20, %s4943_s8 }
 0xe55   : > { %2065 = vrot.lane.b32.xlu2 %v4326_v36, %s4943_s8 }
 0xe59   : > { %2198 = vrot.lane.b32.xlu0 %v4326_v36, %s4944_s7 }
 0xe5d   : > { %2206 = vrot.lane.b32.xlu2 %v4330_v20, %s4942_s6 }
 0xe61   : > { %2069 = vrot.lane.b32.xlu0 %v4336_v52, %s4943_s8 }
 0xe65   : > { %2204 = vrot.lane.b32.xlu2 %v4326_v36, %s4942_s6 }
 0xe6d   : > { %2341 = vrot.lane.b32.xlu2 %v4336_v52, %s4945_s28 }
 0xe75   : > { %2200 = vrot.lane.b32.xlu2 %v4330_v20, %s4944_s7 }
 0xe7d   : > { %2331 = vrot.lane.b32.xlu2 %v4326_v36, %s4946_s18 }
 0xe85   : > { %2333 = vrot.lane.b32.xlu2 %v4330_v20, %s4946_s18 }
 0xe98   : > { %v1990_v3 = vpop.xlane.xlu0 %1989 }
 0xe99   : > { %v1997_v38 = vsub.f32 %v1985_v56, %v1990_v3 }
 0xe9b   : > { %v2000_v4 = vmul.f32 1.442695, %v1997_v38 }
 0xe9d   : > { %3514 = vpow2.f32 %v2000_v4 }
 0xea0   : > { %v1993_v5 = vpop.xlane.xlu1 %1992 }
 0xea1   : > { %v1998_v6 = vsub.f32 %v1986_v60, %v1993_v5 }
 0xea3   : > { %v3515_v7 = vpop.eup %3514  ;;  %v2002_v8 = vmul.f32 1.442695, %v1998_v6 }
 0xea4   : > { %v2006_v9 = vsel %vm1040_vm14, %v3515_v7, 0.0 }
 0xea5   : > { %3516 = vpow2.f32 %v2002_v8  ;;  %2007 = vadd.xlane.f32.xlu0 %v2006_v9 }
 0xea8   : > { %v1996_v35 = vpop.xlane.xlu2 %1995 }
 0xea9   : > { %v1999_v10 = vsub.f32 %v1987_v0, %v1996_v35 }
 0xeab   : > { %v3517_v11 = vpop.eup %3516  ;;  %v2004_v13 = vmul.f32 1.442695, %v1999_v10  ;;  %v2076_v14 = vpop.permute.xlu0 %2075 }
 0xeac   : > { %3249 = vmatpush.xpose.msk.msra.mxu1 %vm995_vm12, %v2076_v14  ;;  %v2009_v15 = vsel %vm1040_vm14, %v3517_v11, 0.0 }
 0xead   : > { %3518 = vpow2.f32 %v2004_v13  ;;  %2010 = vadd.xlane.f32.xlu0 %v2009_v15 }
 0xeb0   : > { %v2074_v17 = vpop.permute.xlu2 %2073 }
 0xeb1   : > { %3250 = vmatpush.xpose.msk.msra.mxu1 %vm995_vm12, %v2074_v17 }
 0xeb3   : > { %v3519_v18 = vpop.eup %3518  ;;  %v2072_v19 = vpop.permute.xlu0 %2071 }
 0xeb4   : > { %v2012_v29 = vsel %vm1040_vm14, %v3519_v18, 0.0 }
 0xeb5   : > { %2013 = vadd.xlane.f32.xlu1 %v2012_v29  ;;  %3251 = vmatpush.xpose.msk.msra.mxu1 %vm995_vm12, %v2072_v19 }
 0xeb8   : > { %v3399_v53 = vpop.permute.xlu1 %3398  ;;  %v2066_v21 = vpop.permute.xlu2 %2065 }
 0xeb9   : > { %v3400_v22 = vunpack.i.l.bf16 %v3399_v53  ;;  %3252 = vmatmul.msk.f32.vlgmr.msra.gmra.mxu1 %vm995_vm12, %v2066_v21  ;;  %v3401_v23 = vunpack.i.h.bf16 %v3399_v53 }
 0xebb   : > { %v2209_v30 = vpop.permute.xlu0 %2208  ;;  %2052 = vmatpush.msrb.mxu2 %v3400_v22 }
 0xebd   : > { %2053 = vmatpush.msrb.mxu2 %v3401_v23 }
 0xebf   : > { %2054 = vmatpush.msrb.mxu2 %v2022_v33 }
 0xec0   : > { %v2207_v24 = vpop.permute.xlu2 %2206 }
 0xec1   : > { %3258 = vmatpush.xpose.msk.msra.mxu2 %vm995_vm12, %v2209_v30  ;;  %2337 = vrot.lane.b32.xlu0 %v4326_v36, %s4945_s28 }
 0xec3   : > { %v2068_v25 = vpop.permute.xlu0 %2067 }
 0xec4   : > { %3253 = vmatmul.msk.f32.gmra.mxu1 %vm995_vm12, %v2068_v25 }
 0xec5   : > { %3259 = vmatpush.xpose.msk.msra.mxu2 %vm995_vm12, %v2207_v24 }
 0xec8   : > { %v2205_v27 = vpop.permute.xlu2 %2204 }
 0xec9   : > { %2202 = vrot.lane.b32.xlu0 %v4336_v52, %s4944_s7  ;;  %3260 = vmatpush.xpose.msk.msra.mxu2 %vm995_vm12, %v2205_v27 }
 0xecb   : > { %v2199_v32 = vpop.permute.xlu0 %2198 }
 0xece   : > { %2339 = vrot.lane.b32.xlu1 %v4330_v20, %s4945_s28 }
 0xed0   : > { %v2342_v39 = vpop.permute.xlu2 %2341 }
 0xed1   : > { %2335 = vrot.lane.b32.xlu0 %v4336_v52, %s4946_s18  ;;  %3267 = vmatpush.xpose.msk.msrb.mxu1 %vm995_vm12, %v2342_v39 }
 0xed3   : > { %v2070_v41 = vpop.permute.xlu0 %2069 }
 0xed4   : > { %3254 = vmatmul.msk.f32.gmra.mxu1 %vm995_vm12, %v2070_v41 }
 0xed8   : > { %v2201_v54 = vpop.permute.xlu2 %2200 }
 0xee0   : > { %v2332_v58 = vpop.permute.xlu2 %2331 }
 0xee8   : > { %v2334_v61 = vpop.permute.xlu2 %2333 }
 0xf18   : > { %v2008_v42 = vpop.xlane.xlu0 %2007 }
 0xf19   : > { %3520 = vrcp.f32 %v2008_v42 }
 0xf1f   : > { %v3521_v44 = vpop.eup %3520 }
 0xf20   : > { %v2018_v45 = vmul.f32 %v3521_v44, %v3515_v7  ;;  %v2011_v46 = vpop.xlane.xlu0 %2010 }
 0xf21   : > { %3522 = vrcp.f32 %v2011_v46 }
 0xf22   : > { %3246 = vmatmul.msk.f32.vlgmr.msrb.gmra.mxu2 %vm1040_vm14, %v2018_v45 }
 0xf27   : > { %v3523_v26 = vpop.eup %3522 }
 0xf28   : > { %v2014_v47 = vpop.xlane.xlu1 %2013  ;;  %v2019_v48 = vmul.f32 %v3523_v26, %v3517_v11 }
 0xf29   : > { %3524 = vrcp.f32 %v2014_v47 }
 0xf2a   : > { %3247 = vmatmul.msk.f32.gmra.mxu2 %vm1040_vm14, %v2019_v48 }
 0xf2f   : > { %v3525_v49 = vpop.eup %3524 }
 0xf30   : > { %v2020_v50 = vmul.f32 %v3525_v49, %v3519_v18 }
 0xf32   : > { %3248 = vmatmul.msk.f32.gmra.mxu2 %vm1040_vm14, %v2020_v50 }
 0xf33   : > { %v2338_v31 = vpop.permute.xlu0 %2337 }
 0xf36   : > { %v2106_v20 = vpop.f32.mrf.mxu1 }
 0xf37   : > { %v2115_v51 = vmul.f32 0.35355338, %v2106_v20 }
 0xf39   : > { %v2118_v52 = vsel %vm854_vm13, %v2115_v51, -1e+30 }
 0xf3a   : > { %3261 = vmatmul.msk.f32.vlgmr.msra.gmra.mxu2 %vm995_vm12, %v2199_v32  ;;  %v2121_v43 = vsel %vm1040_vm14, %v2118_v52, -inf }
 0xf3b   : > { %2122 = vmax.xlane.f32.xlu1 %v2121_v43  ;;  %v2203_v60 = vpop.permute.xlu0 %2202 }
 0xf40   : > { %v2340_v37 = vpop.permute.xlu1 %2339 }
 0xf41   : > { %v2109_v55 = vpop.f32.mrf.mxu1  ;;  %3268 = vmatpush.xpose.msk.msrb.mxu1 %vm995_vm12, %v2340_v37 }
 0xf42   : > { %v2116_v56 = vmul.f32 0.35355338, %v2109_v55  ;;  %3262 = vmatmul.msk.f32.gmra.mxu2 %vm995_vm12, %v2201_v54 }
 0xf43   : > { %v2336_v3 = vpop.permute.xlu0 %2335 }
 0xf44   : > { %v2119_v57 = vsel %vm854_vm13, %v2116_v56, -1e+30 }
 0xf45   : > { %3269 = vmatpush.xpose.msk.msrb.mxu1 %vm995_vm12, %v2338_v31  ;;  %v2124_v59 = vsel %vm1040_vm14, %v2119_v57, -inf }
 0xf46   : > { %2125 = vmax.xlane.f32.xlu2 %v2124_v59 }
 0xf48   : > { %3270 = vmatmul.msk.f32.vlgmr.msrb.gmra.mxu1 %vm995_vm12, %v2332_v58 }
 0xf4a   : > { %3263 = vmatmul.msk.f32.gmra.mxu2 %vm995_vm12, %v2203_v60 }
 0xf50   : > { %3271 = vmatmul.msk.f32.gmra.mxu1 %vm995_vm12, %v2334_v61 }
 0xf51   : > { %v2112_v62 = vpop.f32.mrf.mxu1 }
 0xf52   : > { %v2117_v63 = vmul.f32 0.35355338, %v2112_v62 }
 0xf54   : > { %v2120_v0 = vsel %vm854_vm13, %v2117_v63, -1e+30 }
 0xf55   : > { %v2127_v1 = vsel %vm1040_vm14, %v2120_v0, -inf }
 0xf56   : > { %2128 = vmax.xlane.f32.xlu0 %v2127_v1 }
 0xf58   : > { %3272 = vmatmul.msk.f32.gmra.mxu1 %vm995_vm12, %v2336_v3 }
 0xfa5   : > { %v4433_v38 = vpop.f32.mrf.mxu2 }
 0xfad   : > { %v4435_v4 = vpop.f32.mrf.mxu2 }
 0xfae   : > { %v2123_v33 = vpop.xlane.xlu1 %2122 }
 0xfaf   : > { %v2130_v7 = vsub.f32 %v2118_v52, %v2123_v33 }
 0xfb1   : > { %v2133_v35 = vmul.f32 1.442695, %v2130_v7 }
 0xfb3   : > { %3526 = vpow2.f32 %v2133_v35 }
 0xfb5   : > { %v4440_v10 = vpop.f32.mrf.mxu2 }
 0xfb9   : > { %v2126_v11 = vpop.xlane.xlu2 %2125  ;;  %v4445_v21 = vpop.eup %3526 }
 0xfba   : > { %v2131_v15 = vsub.f32 %v2119_v57, %v2126_v11  ;;  %v2139_v25 = vsel %vm1040_vm14, %v4445_v21, 0.0 }
 0xfbc   : > { %v2135_v19 = vmul.f32 1.442695, %v2131_v15 }
 0xfbd   : > { %v2239_v23 = vpop.f32.mrf.mxu2 }
 0xfbe   : > { %3528 = vpow2.f32 %v2135_v19  ;;  %v2248_v32 = vmul.f32 0.35355338, %v2239_v23 }
 0xfc0   : > { %v2251_v42 = vsel %vm854_vm13, %v2248_v32, -1e+30 }
 0xfc1   : > { %v2254_v44 = vsel %vm1040_vm14, %v2251_v42, -inf }
 0xfc4   : > { %v4452_v41 = vpop.eup %3528 }
 0xfc5   : > { %v2372_v5 = vpop.f32.mrf.mxu1  ;;  %v2142_v45 = vsel %vm1040_vm14, %v4452_v41, 0.0  ;;  %v2242_v47 = vpop.f32.mrf.mxu2 }
 0xfc6   : > { %v2381_v6 = vmul.f32 0.35355338, %v2372_v5  ;;  %v2249_v56 = vmul.f32 0.35355338, %v2242_v47 }
 0xfc8   : > { %v2384_v8 = vsel %vm854_vm13, %v2381_v6, -1e+30  ;;  %v2252_v60 = vsel %vm854_vm13, %v2249_v56, -1e+30 }
 0xfc9   : > { %v2387_v9 = vsel %vm1040_vm14, %v2384_v8, -inf  ;;  %v2129_v29 = vpop.xlane.xlu0 %2128  ;;  %v2257_v62 = vsel %vm1040_vm14, %v2252_v60, -inf }
 0xfca   : > { %2388 = vmax.xlane.f32.xlu1 %v2387_v9  ;;  %v2132_v30 = vsub.f32 %v2120_v0, %v2129_v29 }
 0xfcc   : > { %v2137_v39 = vmul.f32 1.442695, %v2132_v30 }
 0xfcd   : > { %v2375_v13 = vpop.f32.mrf.mxu1  ;;  %v2245_v48 = vpop.f32.mrf.mxu2 }
 0xfce   : > { %v2382_v14 = vmul.f32 0.35355338, %v2375_v13  ;;  %3530 = vpow2.f32 %v2137_v39  ;;  %v2250_v49 = vmul.f32 0.35355338, %v2245_v48 }
 0xfd0   : > { %v2385_v17 = vsel %vm854_vm13, %v2382_v14, -1e+30  ;;  %v4471_v50 = vsel %vm854_vm13, %v2250_v49, -1e+30 }
 0xfd1   : > { %v2390_v18 = vsel %vm1040_vm14, %v2385_v17, -inf  ;;  %v2260_v20 = vsel %vm1040_vm14, %v4471_v50, -inf }
 0xfd2   : > { %2391 = vmax.xlane.f32.xlu2 %v2390_v18 }
 0xfd4   : > { %v4461_v46 = vpop.eup %3530 }
 0xfd5   : > { %v2378_v53 = vpop.f32.mrf.mxu1  ;;  %v2145_v26 = vsel %vm1040_vm14, %v4461_v46, 0.0 }
 0xfd6   : > { %v2383_v22 = vmul.f32 0.35355338, %v2378_v53 }
 0xfd8   : > { %v2386_v24 = vsel %vm854_vm13, %v2383_v22, -1e+30 }
 0xfd9   : > { %v2393_v27 = vsel %vm1040_vm14, %v2386_v24, -inf }
 0xfda   : > { %2140 = vadd.xlane.f32.xlu2 %v2139_v25  ;;  %2394 = vmax.xlane.f32.xlu0 %v2393_v27 }
 0xfe2   : > { %2255 = vmax.xlane.f32.xlu2 %v2254_v44  ;;  %2143 = vadd.xlane.f32.xlu0 %v2142_v45 }
 0xfe3   : > { %3403 = vrot.lane.b32.xlu1 %v4364_v2, %s4947_s22 }
 0xfea   : > { %2146 = vadd.xlane.f32.xlu0 %v2145_v26 }
 0xfeb   : > { %3408 = vrot.lane.b32.xlu1 %v4364_v2, %s4948_s25 }
 0xffa   : > { %2154 = vrot.lane.b32.xlu2 %v4326_v36, %s4947_s22  ;;  %s3315_s22 = sshll.u32 %s3874_s0, 4  ;;  %s3672_s0 = smov 32  }
 0xffb   : > { %s803_s6 = scalar_lea.vmem %s4843_s26, %s3315_s22 }
0x1015   : > { %2261 = vmax.xlane.f32.xlu1 %v2260_v20 }
0x102e   : > { %2287 = vrot.lane.b32.xlu1 %v4326_v36, %s4948_s25  ;;  %s4952_s25 = smov 24  }
0x103d   : > { %v2389_v51 = vpop.xlane.xlu1 %2388 }
0x103e   : > { %v2396_v52 = vsub.f32 %v2384_v8, %v2389_v51 }
0x1040   : > { %v2399_v43 = vmul.f32 1.442695, %v2396_v52 }
0x1042   : > { %3532 = vpow2.f32 %v2399_v43 }
0x1045   : > { %v2392_v54 = vpop.xlane.xlu2 %2391 }
0x1046   : > { %v2397_v31 = vsub.f32 %v2385_v17, %v2392_v54 }
0x1048   : > { %v4477_v37 = vpop.eup %3532  ;;  %v2401_v57 = vmul.f32 1.442695, %v2397_v31 }
0x1049   : > { %v2405_v55 = vsel %vm1040_vm14, %v4477_v37, 0.0 }
0x104a   : > { %2406 = vadd.xlane.f32.xlu0 %v2405_v55  ;;  %3534 = vpow2.f32 %v2401_v57 }
0x104d   : > { %v2395_v58 = vpop.xlane.xlu0 %2394  ;;  %v2141_v59 = vpop.xlane.xlu2 %2140 }
0x104e   : > { %v2398_v61 = vsub.f32 %v2386_v24, %v2395_v58  ;;  %3536 = vrcp.f32 %v2141_v59 }
0x1050   : > { %v2403_v63 = vmul.f32 1.442695, %v2398_v61  ;;  %v4484_v0 = vpop.eup %3534 }
0x1051   : > { %v2408_v6 = vsel %vm1040_vm14, %v4484_v0, 0.0 }
0x1052   : > { %2258 = vmax.xlane.f32.xlu0 %v2257_v62  ;;  %3538 = vpow2.f32 %v2403_v63 }
0x1054   : > { %v3537_v9 = vpop.eup %3536 }
0x1055   : > { %v3404_v1 = vpop.permute.xlu1 %3403  ;;  %v2256_v33 = vpop.xlane.xlu2 %2255  ;;  %v2151_v13 = vmul.f32 %v3537_v9, %v4445_v21 }
0x1056   : > { %v3405_v3 = vunpack.i.l.bf16 %v3404_v1  ;;  %v2263_v5 = vsub.f32 %v2251_v42, %v2256_v33  ;;  %v3406_v7 = vunpack.i.h.bf16 %v3404_v1  ;;  %v2144_v8 = vpop.xlane.xlu0 %2143 }
0x1058   : > { %2185 = vmatpush.msra.mxu0 %v3405_v3  ;;  %2409 = vadd.xlane.f32.xlu1 %v2408_v6  ;;  %v2266_v40 = vmul.f32 1.442695, %v2263_v5  ;;  %v4488_v35 = vpop.eup %3538  ;;  %v3279_v6 = vld [vmem:[%s4934_s3 + $0x38] sm:$0xff] }
0x1059   : > { %v2411_v18 = vsel %vm1040_vm14, %v4488_v35, 0.0  ;;  %2540 = vmatpush.msrb.mxu2 %v3279_v6 }
0x105a   : > { %2186 = vmatpush.msra.mxu0 %v3406_v7  ;;  %3540 = vpow2.f32 %v2266_v40  ;;  %v3277_v7 = vld [vmem:[%s4934_s3 + $0x28] sm:$0xff] }
0x105b   : > { %3542 = vrcp.f32 %v2144_v8 }
0x105d   : > { %v3409_v11 = vpop.permute.xlu1 %3408  ;;  %v2155_v15 = vpop.permute.xlu2 %2154 }
0x105e   : > { %v3410_v14 = vunpack.i.l.bf16 %v3409_v11  ;;  %2187 = vmatpush.msra.mxu0 %v2155_v15  ;;  %v3411_v17 = vunpack.i.h.bf16 %v3409_v11  ;;  %v2147_v29 = vpop.xlane.xlu0 %2146 }
0x105f   : > { %3255 = vmatmul.msk.f32.vlgmr.msra.gmra.mxu0 %vm1040_vm14, %v2151_v13  ;;  %3544 = vrcp.f32 %v2147_v29  ;;  %v3276_v13 = vld [vmem:[%s4934_s3 + $0x20] sm:$0xff] }
0x1060   : > { %2318 = vmatpush.msrb.mxu3 %v3410_v14  ;;  %v3541_v19 = vpop.eup %3540  ;;  %2412 = vadd.xlane.f32.xlu1 %v2411_v18 }
0x1061   : > { %v2272_v53 = vsel %vm1040_vm14, %v3541_v19, 0.0  ;;  %v3543_v22 = vpop.eup %3542 }
0x1062   : > { %2319 = vmatpush.msrb.mxu3 %v3411_v17  ;;  %2273 = vadd.xlane.f32.xlu0 %v2272_v53  ;;  %v2152_v21 = vmul.f32 %v3543_v22, %v4452_v41 }
0x1065   : > { %v3545_v23 = vpop.eup %3544 }
0x1066   : > { %v2153_v30 = vmul.f32 %v3545_v23, %v4461_v46 }
0x1067   : > { %3256 = vmatmul.msk.f32.gmra.mxu0 %vm1040_vm14, %v2152_v21 }
0x106f   : > { %3257 = vmatmul.msk.f32.gmra.mxu0 %vm1040_vm14, %v2153_v30 }
0x1076   : > { %3413 = vrot.lane.b32.xlu0 %v4364_v2, %s4949_s24 }
0x1088   : > { %v2262_v24 = vpop.xlane.xlu1 %2261 }
0x1089   : > { %v2265_v25 = vsub.f32 %v4471_v50, %v2262_v24 }
0x108b   : > { %v2270_v27 = vmul.f32 1.442695, %v2265_v25 }
0x108d   : > { %3546 = vpow2.f32 %v2270_v27 }
0x1093   : > { %v3547_v32 = vpop.eup %3546 }
0x1094   : > { %v2278_v42 = vsel %vm1040_vm14, %v3547_v32, 0.0 }
0x10a0   : > { %v2288_v39 = vpop.permute.xlu1 %2287  ;;  %2279 = vadd.xlane.f32.xlu0 %v2278_v42 }
0x10a1   : > { %2320 = vmatpush.msrb.mxu3 %v2288_v39 }
0x10bd   : > { %v2407_v41 = vpop.xlane.xlu0 %2406 }
0x10c5   : > { %v2259_v44 = vpop.xlane.xlu0 %2258 }
0x10c6   : > { %v2264_v45 = vsub.f32 %v2252_v60, %v2259_v44 }
0x10c8   : > { %v2268_v46 = vmul.f32 1.442695, %v2264_v45 }
0x10ca   : > { %3548 = vpow2.f32 %v2268_v46 }
0x10cb   : > { %v2410_v55 = vpop.xlane.xlu1 %2409 }
0x10d0   : > { %v3549_v26 = vpop.eup %3548 }
0x10d1   : > { %v2275_v47 = vsel %vm1040_vm14, %v3549_v26, 0.0 }
0x10d2   : > { %2276 = vadd.xlane.f32.xlu2 %v2275_v47 }
0x10d3   : > { %v2413_v62 = vpop.xlane.xlu1 %2412 }
0x10d5   : > { %v2274_v2 = vpop.xlane.xlu0 %2273 }
0x10d6   : > { %3550 = vrcp.f32 %v2274_v2 }
0x10d7   : > { %3552 = vrcp.f32 %v2407_v41 }
0x10dc   : > { %v3551_v48 = vpop.eup %3550  ;;  %v2189_v49 = vpop.f32.mrf.mxu0 }
0x10dd   : > { %v2284_v50 = vmul.f32 %v3551_v48, %v3541_v19  ;;  %2467 = vrot.lane.b32.xlu1 %v2189_v49, %s4950_s5  ;;  %v3553_v57 = vpop.eup %3552 }
0x10de   : > { %v2417_v59 = vmul.f32 %v3553_v57, %v4477_v37 }
0x10df   : > { %3264 = vmatmul.msk.f32.vlgmr.msrb.gmra.mxu3 %vm1040_vm14, %v2284_v50 }
0x10e4   : > { %v2192_v20 = vpop.f32.mrf.mxu0 }
0x10e8   : > { %v3414_v51 = vpop.permute.xlu0 %3413 }
0x10e9   : > { %v3415_v52 = vunpack.i.l.bf16 %v3414_v51  ;;  %v3416_v43 = vunpack.i.h.bf16 %v3414_v51 }
0x10ea   : > { %2420 = vrot.lane.b32.xlu2 %v4326_v36, %s4949_s24  ;;  %s4953_s24 = sld [smem:[#allocation7_spill]] }
0x10eb   : > { %2451 = vmatpush.msrb.mxu0 %v3415_v52 }
0x10ec   : > { %v2195_v54 = vpop.f32.mrf.mxu0 }
0x10ed   : > { %2452 = vmatpush.msrb.mxu0 %v3416_v43  ;;  %2471 = vrot.lane.b32.xlu1 %v2195_v54, %s4950_s5 }
0x1113   : > { %v2280_v56 = vpop.xlane.xlu0 %2279 }
0x1145   : > { %v2277_v31 = vpop.xlane.xlu2 %2276 }
0x1146   : > { %3554 = vrcp.f32 %v2277_v31 }
0x1147   : > { %3556 = vrcp.f32 %v2410_v55 }
0x1148   : > { %3558 = vrcp.f32 %v2280_v56 }
0x1149   : > { %3560 = vrcp.f32 %v2413_v62  ;;  %v3288_v62 = vld [vmem:[%s4936_s11 + $0x30] sm:$0xff] }
0x114c   : > { %v3555_v58 = vpop.eup %3554 }
0x114d   : > { %v2421_v60 = vpop.permute.xlu2 %2420  ;;  %v2285_v61 = vmul.f32 %v3555_v58, %v3549_v26  ;;  %v3557_v36 = vpop.eup %3556 }
0x114e   : > { %2453 = vmatpush.msrb.mxu0 %v2421_v60  ;;  %v3559_v63 = vpop.eup %3558  ;;  %v2418_v3 = vmul.f32 %v3557_v36, %v4484_v0  ;;  %v3278_v0 = vld [vmem:[%s4934_s3 + $0x30] sm:$0xff]  ;;  %v3289_v36 = vld [vmem:[%s4936_s11 + $0x38] sm:$0xff] }
0x114f   : > { %3265 = vmatmul.msk.f32.gmra.mxu3 %vm1040_vm14, %v2285_v61  ;;  %3273 = vmatmul.msk.f32.vlgmr.msrb.gmra.mxu0 %vm1040_vm14, %v2417_v59  ;;  %v2286_v1 = vmul.f32 %v3559_v63, %v3547_v32  ;;  %v3561_v33 = vpop.eup %3560  ;;  %v2468_v14 = vpop.permute.xlu1 %2467  ;;  %v3287_v63 = vld [vmem:[%s4936_s11 + $0x28] sm:$0xff] }
0x1150   : > { %v2419_v37 = vmul.f32 %v3561_v33, %v4488_v35  ;;  %2541 = vmatpush.msrb.mxu2 %v3278_v0  ;;  %v2500_v17 = vsel %vm995_vm12, %v4433_v38, %v2468_v14  ;;  %2670 = vmatpush.msra.mxu3 %v3289_v36  ;;  %v3294_v36 = vld [vmem:[%s4830_s13 + $0x80] sm:$0xff] }
0x1152   : > { %2542 = vmatpush.msrb.mxu2 %v3277_v7  ;;  %2671 = vmatpush.msra.mxu3 %v3288_v62  ;;  %v3434_v62 = vld [vmem:[%s4829_s12 + $0x1] ss:$0 sm:$0xff] }
0x1154   : > { %2543 = vmatpush.msrb.mxu2 %v3276_v13  ;;  %2672 = vmatpush.msra.mxu3 %v3287_v63  ;;  %v3433_v13 = vld [vmem:[%s4938_s10 + $0x1] ss:$0 sm:$0xff] }
0x1157   : > { %3266 = vmatmul.msk.f32.gmra.mxu3 %vm1040_vm14, %v2286_v1  ;;  %3274 = vmatmul.msk.f32.gmra.mxu0 %vm1040_vm14, %v2418_v3  ;;  %v3286_v1 = vld [vmem:[%s4936_s11 + $0x20] sm:$0xff] }
0x1158   : > { %2673 = vmatpush.msra.mxu3 %v3286_v1 }
0x115f   : > { %3275 = vmatmul.msk.f32.gmra.mxu0 %vm1040_vm14, %v2419_v37  ;;  %v2472_v38 = vpop.permute.xlu1 %2471 }
0x1160   : > { %v2502_v27 = vsel %vm995_vm12, %v4440_v10, %v2472_v38 }
0x1162   : > { %v2322_v5 = vpop.f32.mrf.mxu3 }
0x1163   : > { %2479 = vrot.lane.b32.xlu0 %v2322_v5, %s4951_s4 }
0x11cc   : > { %v2455_v8 = vpop.f32.mrf.mxu0 }
0x11cd   : > { %2491 = vrot.lane.b32.xlu2 %v2455_v8, %s4952_s25 }
0x11d2   : > { %v2325_v9 = vpop.f32.mrf.mxu3 }
0x11d4   : > { %v2458_v40 = vpop.f32.mrf.mxu0 }
0x11d5   : > { %2469 = vrot.lane.b32.xlu2 %v2192_v20, %s4950_s5  ;;  %2493 = vrot.lane.b32.xlu0 %v2458_v40, %s4952_s25  ;;  %v2480_v15 = vpop.permute.xlu0 %2479 }
0x11d6   : > { %v2503_v18 = vsel %vm1556_vm15, %v2500_v17, %v2480_v15 }
0x11da   : > { %v2328_v11 = vpop.f32.mrf.mxu3 }
0x11dc   : > { %v2461_v35 = vpop.f32.mrf.mxu0 }
0x11dd   : > { %2481 = vrot.lane.b32.xlu2 %v2325_v9, %s4951_s4  ;;  %2495 = vrot.lane.b32.xlu0 %v2461_v35, %s4952_s25  ;;  %v3432_v9 = vld [vmem:[%s4937_s30 + $0x1] ss:$0 sm:$0xff]  ;;  %s4955_s25 = sld [smem:[#allocation27_spill]] }
0x11e5   : > { %2483 = vrot.lane.b32.xlu2 %v2328_v11, %s4951_s4 }
0x1227   : > { %v2492_v19 = vpop.permute.xlu2 %2491 }
0x1228   : > { %v2506_v29 = vsel %vm1040_vm14, %v2503_v18, %v2492_v19 }
0x1229   : > { %3281 = vmatmul.msk.f32.vlgmr.msrb.gmra.mxu2 %vm857_vm1, %v2506_v29  ;;  %v3309_v29 = vld [vmem:[%s4830_s13 + $0xf8] sm:$0xff] }
0x122a   : > { %2733 = vmatpush.msra.mxu1 %v3309_v29 }
0x122f   : > { %v2470_v53 = vpop.permute.xlu2 %2469 }
0x1230   : > { %v2501_v21 = vsel %vm995_vm12, %v4435_v4, %v2470_v53  ;;  %v3431_v4 = vld [vmem:[%s4935_s27 + $0x1] ss:$0 sm:$0xff]  ;;  %v3308_v53 = vld [vmem:[%s4830_s13 + $0xf0] sm:$0xff] }
0x1231   : > { %2734 = vmatpush.msra.mxu1 %v3308_v53 }
0x1237   : > { %v2482_v22 = vpop.permute.xlu2 %2481 }
0x1238   : > { %v2504_v23 = vsel %vm1556_vm15, %v2501_v21, %v2482_v22  ;;  %v3307_v22 = vld [vmem:[%s4830_s13 + $0xe8] sm:$0xff] }
0x1239   : > { %2735 = vmatpush.msra.mxu1 %v3307_v22 }
0x123f   : > { %v2484_v25 = vpop.permute.xlu2 %2483 }
0x1240   : > { %v2505_v32 = vsel %vm1556_vm15, %v2502_v27, %v2484_v25 }
0x1247   : > { %v2494_v30 = vpop.permute.xlu0 %2493 }
0x1248   : > { %v2507_v24 = vsel %vm1040_vm14, %v2504_v23, %v2494_v30  ;;  %v3306_v30 = vld [vmem:[%s4830_s13 + $0xe0] sm:$0xff] }
0x1249   : > { %3282 = vmatmul.msk.f32.gmra.mxu2 %vm857_vm1, %v2507_v24  ;;  %2736 = vmatpush.msra.mxu1 %v3306_v30 }
0x124f   : > { %v2496_v39 = vpop.permute.xlu0 %2495 }
0x1250   : > { %v2508_v42 = vsel %vm1040_vm14, %v2505_v32, %v2496_v39 }
0x1251   : > { %3283 = vmatmul.msk.f32.gmra.mxu2 %vm857_vm1, %v2508_v42 }
0x12ac   : > { %v2545_v41 = vpop.f32.mrf.mxu2 }
0x12ad   : > { %v2546_v44 = vadd.f32 %v3431_v4, %v2545_v41 }
0x12af   : > { %v4555_v45 = vadd.f32 %v2546_v44, %v4271_v34 }
0x12b1   : > { %v2561_v46 = vsel %vm857_vm1, %v4555_v45, 0.0 }
0x12b2   : > { %2562 = vadd.xlane.f32.xlu1 %v2561_v46 }
0x12cc   : > { %v2548_v10 = vpop.f32.mrf.mxu2 }
0x12cd   : > { %v2549_v26 = vadd.f32 %v3431_v4, %v2548_v10 }
0x12cf   : > { %v4560_v47 = vadd.f32 %v2549_v26, %v4276_v12 }
0x12d1   : > { %v2564_v2 = vsel %vm857_vm1, %v4560_v47, 0.0 }
0x12d2   : > { %2565 = vadd.xlane.f32.xlu2 %v2564_v2 }
0x12d4   : > { %v2551_v48 = vpop.f32.mrf.mxu2 }
0x12d5   : > { %v2552_v49 = vadd.f32 %v3431_v4, %v2551_v48 }
0x12d7   : > { %v4565_v50 = vadd.f32 %v2552_v49, %v4281_v16 }
0x12d9   : > { %v2567_v34 = vsel %vm857_vm1, %v4565_v50, 0.0 }
0x12da   : > { %2568 = vadd.xlane.f32.xlu0 %v2567_v34 }
0x1325   : > { %v2563_v20 = vpop.xlane.xlu1 %2562 }
0x1326   : > { %v2570_v51 = vmul.f32 %v2563_v20, %v3907_v28 }
0x1328   : > { %v2573_v52 = vsub.f32 %v4555_v45, %v2570_v51 }
0x132a   : > { %v2576_v12 = vmul.f32 %v2573_v52, %v2573_v52 }
0x132c   : > { %v2579_v43 = vsel %vm857_vm1, %v2576_v12, 0.0 }
0x132d   : > { %2580 = vadd.xlane.f32.xlu1 %v2579_v43  ;;  %v3305_v43 = vld [vmem:[%s4830_s13 + $0xd8] sm:$0xff] }
0x132e   : > { %2737 = vmatpush.msra.mxu1 %v3305_v43 }
0x1345   : > { %v2566_v54 = vpop.xlane.xlu2 %2565 }
0x1346   : > { %v2571_v31 = vmul.f32 %v2566_v54, %v3907_v28  ;;  %v3304_v54 = vld [vmem:[%s4830_s13 + $0xd0] sm:$0xff] }
0x1347   : > { %2738 = vmatpush.msra.mxu1 %v3304_v54 }
0x1348   : > { %v4574_v55 = vsub.f32 %v4560_v47, %v2571_v31  ;;  %v3303_v31 = vld [vmem:[%s4830_s13 + $0xc8] sm:$0xff] }
0x1349   : > { %2739 = vmatpush.msra.mxu1 %v3303_v31 }
0x134a   : > { %v2577_v16 = vmul.f32 %v4574_v55, %v4574_v55 }
0x134c   : > { %v2582_v56 = vsel %vm857_vm1, %v2577_v16, 0.0  ;;  %v3301_v16 = vld [vmem:[%s4830_s13 + $0xb8] sm:$0xff] }
0x134d   : > { %2583 = vadd.xlane.f32.xlu2 %v2582_v56  ;;  %v2569_v57 = vpop.xlane.xlu0 %2568  ;;  %v3300_v56 = vld [vmem:[%s4830_s13 + $0xb0] sm:$0xff] }
0x134e   : > { %v2572_v58 = vmul.f32 %v2569_v57, %v3907_v28  ;;  %v3299_v57 = vld [vmem:[%s4830_s13 + $0xa8] sm:$0xff] }
0x1350   : > { %v4581_v59 = vsub.f32 %v4565_v50, %v2572_v58  ;;  %v3298_v58 = vld [vmem:[%s4830_s13 + $0xa0] sm:$0xff] }
0x1352   : > { %v2578_v60 = vmul.f32 %v4581_v59, %v4581_v59 }
0x1354   : > { %v2585_v61 = vsel %vm857_vm1, %v2578_v60, 0.0  ;;  %v3296_v60 = vld [vmem:[%s4830_s13 + $0x90] sm:$0xff] }
0x1355   : > { %2586 = vadd.xlane.f32.xlu0 %v2585_v61  ;;  %v3295_v61 = vld [vmem:[%s4830_s13 + $0x88] sm:$0xff] }
0x13a0   : > { %v2581_v3 = vpop.xlane.xlu1 %2580 }
0x13a1   : > { %v2588_v33 = vmul.f32 %v2581_v3, %v3907_v28 }
0x13a3   : > { %v2591_v37 = vadd.f32 1e-06, %v2588_v33 }
0x13a5   : > { %3562 = vrsqrt.f32 %v2591_v37  ;;  %vm2600_vm13 = vweird.f32 %v2591_v37 }
0x13ab   : > { %v3563_v5 = vpop.eup %3562 }
0x13ac   : > { %v2595_v6 = vmul.f32 %v3563_v5, %v2591_v37  ;;  %vm2601_vm12 = vweird.f32 %v3563_v5 }
0x13ad   : > { %vm2602_vm14 = vmor %vm2600_vm13, %vm2601_vm12 }
0x13ae   : > { %v2596_v0 = vmul.f32 %v3563_v5, %v2595_v6 }
0x13b0   : > { %v2597_v7 = vmul.f32 0.5, %v2596_v0 }
0x13b2   : > { %v2598_v8 = vsub.f32 1.5, %v2597_v7 }
0x13b4   : > { %v2599_v40 = vmul.f32 %v3563_v5, %v2598_v8 }
0x13b6   : > { %v2603_v35 = vsel %vm2602_vm14, %v3563_v5, %v2599_v40 }
0x13b7   : > { %v2624_v11 = vmul.f32 %v2603_v35, %v2573_v52 }
0x13b9   : > { %v2630_v14 = vmul.f32 %v3432_v9, %v2624_v11 }
0x13bb   : > { %v2636_v15 = vadd.f32 %v3433_v13, %v2630_v14 }
0x13bd   : > { %3291 = vmatmul.msk.f32.vlgmr.msra.gmra.mxu3 %vm857_vm1, %v2636_v15 }
0x13c0   : > { %v2584_v17 = vpop.xlane.xlu2 %2583 }
0x13c1   : > { %v2589_v18 = vmul.f32 %v2584_v17, %v3907_v28 }
0x13c3   : > { %v2592_v19 = vadd.f32 1e-06, %v2589_v18 }
0x13c5   : > { %3564 = vrsqrt.f32 %v2592_v19  ;;  %vm2610_vm8 = vweird.f32 %v2592_v19 }
0x13c8   : > { %v2587_v21 = vpop.xlane.xlu0 %2586 }
0x13c9   : > { %v2590_v23 = vmul.f32 %v2587_v21, %v3907_v28 }
0x13cb   : > { %v3565_v24 = vpop.eup %3564  ;;  %v2593_v38 = vadd.f32 1e-06, %v2590_v23 }
0x13cc   : > { %v2605_v25 = vmul.f32 %v3565_v24, %v2592_v19  ;;  %vm2611_vm15 = vweird.f32 %v3565_v24 }
0x13cd   : > { %3566 = vrsqrt.f32 %v2593_v38  ;;  %vm2612_vm9 = vmor %vm2610_vm8, %vm2611_vm15  ;;  %vm2620_vm11 = vweird.f32 %v2593_v38  ;;  %vm2856_vm8 = vcmask 253952  }
0x13ce   : > { %v2606_v27 = vmul.f32 %v3565_v24, %v2605_v25 }
0x13d0   : > { %v2607_v32 = vmul.f32 0.5, %v2606_v27 }
0x13d2   : > { %v2608_v39 = vsub.f32 1.5, %v2607_v32 }
0x13d3   : > { %v3567_v42 = vpop.eup %3566 }
0x13d4   : > { %v2609_v4 = vmul.f32 %v3565_v24, %v2608_v39  ;;  %v2615_v41 = vmul.f32 %v3567_v42, %v2593_v38  ;;  %vm2621_vm10 = vweird.f32 %v3567_v42 }
0x13d5   : > { %vm2622_vm0 = vmor %vm2620_vm11, %vm2621_vm10  ;;  %vm2867_vm10 = vcmask 7169   ;;  %vm2871_vm11 = vcmask 0  }
0x13d6   : > { %v2613_v44 = vsel %vm2612_vm9, %v3565_v24, %v2609_v4  ;;  %v2616_v46 = vmul.f32 %v3567_v42, %v2615_v41  ;;  %v3435_v4 = vld [vmem:[%s4831_s14 + $0x1] ss:$0 sm:$0xff]  ;;  %vm2869_vm9 = vcmask 7168  }
0x13d7   : > { %v2625_v10 = vmul.f32 %v2613_v44, %v4574_v55  ;;  %v3302_v55 = vld [vmem:[%s4830_s13 + $0xc0] sm:$0xff] }
0x13d8   : > { %v2617_v26 = vmul.f32 0.5, %v2616_v46  ;;  %2740 = vmatpush.msra.mxu1 %v3302_v55 }
0x13d9   : > { %v2631_v2 = vmul.f32 %v3432_v9, %v2625_v10 }
0x13da   : > { %v2618_v48 = vsub.f32 1.5, %v2617_v26  ;;  %2741 = vmatpush.msra.mxu1 %v3301_v16 }
0x13db   : > { %v2637_v49 = vadd.f32 %v3433_v13, %v2631_v2 }
0x13dc   : > { %v2619_v34 = vmul.f32 %v3567_v42, %v2618_v48  ;;  %2742 = vmatpush.msra.mxu1 %v3300_v56 }
0x13dd   : > { %3292 = vmatmul.msk.f32.gmra.mxu3 %vm857_vm1, %v2637_v49 }
0x13de   : > { %v2623_v20 = vsel %vm2622_vm0, %v3567_v42, %v2619_v34  ;;  %2743 = vmatpush.msra.mxu1 %v3299_v57  ;;  %vm2893_vm0 = vcmask 1046528  }
0x13df   : > { %v2626_v51 = vmul.f32 %v2623_v20, %v4581_v59  ;;  %v3297_v59 = vld [vmem:[%s4830_s13 + $0x98] sm:$0xff] }
0x13e0   : > { %2744 = vmatpush.msra.mxu1 %v3298_v58 }
0x13e1   : > { %v2632_v52 = vmul.f32 %v3432_v9, %v2626_v51 }
0x13e2   : > { %2745 = vmatpush.msra.mxu1 %v3297_v59 }
0x13e3   : > { %v2638_v12 = vadd.f32 %v3433_v13, %v2632_v52 }
0x13e4   : > { %2746 = vmatpush.msra.mxu1 %v3296_v60 }
0x13e5   : > { %3293 = vmatmul.msk.f32.gmra.mxu3 %vm857_vm1, %v2638_v12 }
0x13e6   : > { %2747 = vmatpush.msra.mxu1 %v3295_v61 }
0x13e8   : > { %2748 = vmatpush.msra.mxu1 %v3294_v36 }
0x1440   : > { %v2675_v63 = vpop.f32.mrf.mxu3 }
0x1441   : > { %v2676_v1 = vadd.f32 %v3434_v62, %v2675_v63 }
0x1443   : > { %v2687_v3 = vmul.f32 0.044715, %v2676_v1  ;;  %v2684_v7 = vmul.f32 0.5, %v2676_v1 }
0x1445   : > { %v2690_v33 = vmul.f32 %v2687_v3, %v2676_v1 }
0x1447   : > { %v2693_v37 = vmul.f32 %v2690_v33, %v2676_v1 }
0x1449   : > { %v2696_v5 = vadd.f32 %v2693_v37, %v2676_v1 }
0x144b   : > { %v2699_v6 = vmul.f32 0.7978845, %v2696_v5 }
0x144d   : > { %3568 = vtanh.f32 %v2699_v6 }
0x1453   : > { %v3569_v0 = vpop.eup %3568 }
0x1454   : > { %v2705_v8 = vadd.f32 1.0, %v3569_v0  ;;  %v3436_v0 = vld [vmem:[%s4832_s15] ss:$0 sm:$0xff] }
0x1456   : > { %v2708_v40 = vmul.f32 %v2705_v8, %v2684_v7 }
0x1458   : > { %2749 = vmatmul.f32.vlgmr.msra.gmra.mxu1 %v2708_v40  ;;  %v3437_v40 = vld [vmem:[%s4833_s16] ss:$0 sm:$0xff] }
0x1460   : > { %v2678_v9 = vpop.f32.mrf.mxu3 }
0x1461   : > { %v2679_v35 = vadd.f32 %v3434_v62, %v2678_v9 }
0x1463   : > { %v2688_v11 = vmul.f32 0.044715, %v2679_v35  ;;  %v2685_v24 = vmul.f32 0.5, %v2679_v35 }
0x1465   : > { %v2691_v13 = vmul.f32 %v2688_v11, %v2679_v35 }
0x1467   : > { %v2694_v14 = vmul.f32 %v2691_v13, %v2679_v35 }
0x1468   : > { %v2681_v15 = vpop.f32.mrf.mxu3 }
0x1469   : > { %v2682_v17 = vadd.f32 %v3434_v62, %v2681_v15  ;;  %v2697_v18 = vadd.f32 %v2694_v14, %v2679_v35  ;;  %v3438_v35 = vld [vmem:[%s4834_s17] ss:$0 sm:$0xff] }
0x146b   : > { %v2700_v19 = vmul.f32 0.7978845, %v2697_v18  ;;  %v2689_v29 = vmul.f32 0.044715, %v2682_v17  ;;  %v2686_v32 = vmul.f32 0.5, %v2682_v17 }
0x146d   : > { %3570 = vtanh.f32 %v2700_v19  ;;  %v2692_v53 = vmul.f32 %v2689_v29, %v2682_v17 }
0x146f   : > { %v2695_v22 = vmul.f32 %v2692_v53, %v2682_v17 }
0x1471   : > { %v2698_v21 = vadd.f32 %v2695_v22, %v2682_v17 }
0x1473   : > { %v3571_v23 = vpop.eup %3570  ;;  %v2701_v30 = vmul.f32 0.7978845, %v2698_v21 }
0x1474   : > { %v2706_v38 = vadd.f32 1.0, %v3571_v23 }
0x1475   : > { %3572 = vtanh.f32 %v2701_v30 }
0x1476   : > { %v2709_v25 = vmul.f32 %v2706_v38, %v2685_v24 }
0x1478   : > { %2752 = vmatmul.f32.gmra.mxu1 %v2709_v25 }
0x147b   : > { %v3573_v27 = vpop.eup %3572 }
0x147c   : > { %v2707_v39 = vadd.f32 1.0, %v3573_v27 }
0x147e   : > { %v2710_v42 = vmul.f32 %v2707_v39, %v2686_v32 }
0x1480   : > { %2755 = vmatmul.f32.gmra.mxu1 %v2710_v42 }
0x14d5   : > { %v2750_v41 = vpop.f32.mrf.mxu1 }
0x14d6   : > { %v2751_v44 = vadd.f32 %v3435_v4, %v2750_v41 }
0x14d8   : > { %v2759_v46 = vadd.f32 %v2751_v44, %v4555_v45 }
0x14da   : > { %v2764_v10 = vsel %vm857_vm1, %v2759_v46, 0.0 }
0x14db   : > { %2765 = vadd.xlane.f32.xlu1 %v2764_v10 }
0x14f5   : > { %v2753_v26 = vpop.f32.mrf.mxu1 }
0x14f6   : > { %v2754_v2 = vadd.f32 %v3435_v4, %v2753_v26 }
0x14f8   : > { %v2760_v48 = vadd.f32 %v2754_v2, %v4560_v47 }
0x14fa   : > { %v2767_v49 = vsel %vm857_vm1, %v2760_v48, 0.0 }
0x14fb   : > { %2768 = vadd.xlane.f32.xlu2 %v2767_v49 }
0x14fd   : > { %v2756_v34 = vpop.f32.mrf.mxu1 }
0x14fe   : > { %v2757_v20 = vadd.f32 %v3435_v4, %v2756_v34 }
0x1500   : > { %v2761_v51 = vadd.f32 %v2757_v20, %v4565_v50 }
0x1502   : > { %v2770_v52 = vsel %vm857_vm1, %v2761_v51, 0.0 }
0x1503   : > { %2771 = vadd.xlane.f32.xlu0 %v2770_v52 }
0x154e   : > { %v2766_v12 = vpop.xlane.xlu1 %2765 }
0x154f   : > { %v2773_v45 = vmul.f32 %v2766_v12, %v3907_v28  ;;  %v3439_v12 = vld [vmem:[#allocation2] ss:$0 sm:$0xff] }
0x1551   : > { %v2776_v43 = vsub.f32 %v2759_v46, %v2773_v45 }
0x1553   : > { %v2779_v54 = vmul.f32 %v2776_v43, %v2776_v43 }
0x1555   : > { %v2782_v31 = vsel %vm857_vm1, %v2779_v54, 0.0 }
0x1556   : > { %2783 = vadd.xlane.f32.xlu1 %v2782_v31 }
0x156e   : > { %v2769_v55 = vpop.xlane.xlu2 %2768 }
0x156f   : > { %v2774_v47 = vmul.f32 %v2769_v55, %v3907_v28 }
0x1571   : > { %v2777_v16 = vsub.f32 %v2760_v48, %v2774_v47 }
0x1573   : > { %v2780_v56 = vmul.f32 %v2777_v16, %v2777_v16 }
0x1575   : > { %v2785_v57 = vsel %vm857_vm1, %v2780_v56, 0.0 }
0x1576   : > { %2786 = vadd.xlane.f32.xlu2 %v2785_v57  ;;  %v2772_v50 = vpop.xlane.xlu0 %2771 }
0x1577   : > { %v2775_v58 = vmul.f32 %v2772_v50, %v3907_v28 }
0x1579   : > { %v2778_v59 = vsub.f32 %v2761_v51, %v2775_v58 }
0x157b   : > { %v2781_v60 = vmul.f32 %v2778_v59, %v2778_v59 }
0x157d   : > { %v2788_v61 = vsel %vm857_vm1, %v2781_v60, 0.0 }
0x157e   : > { %2789 = vadd.xlane.f32.xlu0 %v2788_v61 }
0x15c9   : > { %v2784_v36 = vpop.xlane.xlu1 %2783 }
0x15ca   : > { %v2791_v62 = vmul.f32 %v2784_v36, %v3907_v28 }
0x15cc   : > { %v2794_v63 = vadd.f32 1e-06, %v2791_v62 }
0x15ce   : > { %3574 = vrsqrt.f32 %v2794_v63  ;;  %vm2803_vm3 = vweird.f32 %v2794_v63 }
0x15d4   : > { %v3575_v1 = vpop.eup %3574 }
0x15d5   : > { %v2798_v3 = vmul.f32 %v3575_v1, %v2794_v63  ;;  %vm2804_vm2 = vweird.f32 %v3575_v1 }
0x15d6   : > { %vm2805_vm4 = vmor %vm2803_vm3, %vm2804_vm2 }
0x15d7   : > { %v2799_v33 = vmul.f32 %v3575_v1, %v2798_v3 }
0x15d9   : > { %v2800_v37 = vmul.f32 0.5, %v2799_v33 }
0x15db   : > { %v2801_v5 = vsub.f32 1.5, %v2800_v37 }
0x15dd   : > { %v2802_v6 = vmul.f32 %v3575_v1, %v2801_v5 }
0x15df   : > { %v2806_v7 = vsel %vm2805_vm4, %v3575_v1, %v2802_v6 }
0x15e0   : > { %v2827_v8 = vmul.f32 %v2806_v7, %v2776_v43 }
0x15e2   : > { %v2833_v9 = vmul.f32 %v3436_v0, %v2827_v8 }
0x15e4   : > { %v4688_v11 = vadd.f32 %v3437_v40, %v2833_v9 }
0x15e6   : > { %v2846_v13 = vmul.f32 %v3438_v35, %v4688_v11 }
0x15e8   : > { %v2850_v14 = vsel %vm2849_vm5, %v2846_v13, 0.0 }
0x15e9   : > { %2851 = vadd.xlane.f32.xlu1 %v2850_v14  ;;  %v2787_v15 = vpop.xlane.xlu2 %2786 }
0x15ea   : > { %v2792_v17 = vmul.f32 %v2787_v15, %v3907_v28 }
0x15ec   : > { %v2795_v18 = vadd.f32 1e-06, %v2792_v17 }
0x15ee   : > { %3576 = vrsqrt.f32 %v2795_v18  ;;  %vm2813_vm7 = vweird.f32 %v2795_v18 }
0x15f1   : > { %v2790_v19 = vpop.xlane.xlu0 %2789 }
0x15f2   : > { %v2793_v29 = vmul.f32 %v2790_v19, %v3907_v28 }
0x15f4   : > { %v3577_v53 = vpop.eup %3576  ;;  %v2796_v22 = vadd.f32 1e-06, %v2793_v29 }
0x15f5   : > { %v2808_v21 = vmul.f32 %v3577_v53, %v2795_v18  ;;  %vm2814_vm6 = vweird.f32 %v3577_v53  ;;  %v3671_v18 = vmov 0  }
0x15f6   : > { %3578 = vrsqrt.f32 %v2796_v22  ;;  %vm2815_vm12 = vmor %vm2813_vm7, %vm2814_vm6  ;;  %vm2823_vm14 = vweird.f32 %v2796_v22  ;;  %3419 = vset.pattern.permute.xlu0 %v3671_v18  ;;  %3418 = vset.pattern.permute.xlu2 %v3671_v18  ;;  %vm2971_vm6 = vcmask 516096  }
0x15f7   : > { %v2809_v23 = vmul.f32 %v3577_v53, %v2808_v21  ;;  %3417 = vset.pattern.permute.xlu1 %v3671_v18  ;;  %v3043_v18 = vld [vmem:[%s4840_s23 + $0x30] sm:$0xff] }
0x15f9   : > { %v2810_v30 = vmul.f32 0.5, %v2809_v23 }
0x15fb   : > { %v2811_v24 = vsub.f32 1.5, %v2810_v30 }
0x15fc   : > { %v3579_v38 = vpop.eup %3578 }
0x15fd   : > { %v2812_v25 = vmul.f32 %v3577_v53, %v2811_v24  ;;  %v2818_v27 = vmul.f32 %v3579_v38, %v2796_v22  ;;  %vm2824_vm13 = vweird.f32 %v3579_v38 }
0x15fe   : > { %vm2825_vm15 = vmor %vm2823_vm14, %vm2824_vm13  ;;  %vm3012_vm14 = vcmask 523264  }
0x15ff   : > { %v2816_v32 = vsel %vm2815_vm12, %v3577_v53, %v2812_v25  ;;  %v2819_v39 = vmul.f32 %v3579_v38, %v2818_v27 }
0x1600   : > { %v2828_v42 = vmul.f32 %v2816_v32, %v2777_v16 }
0x1601   : > { %v2820_v4 = vmul.f32 0.5, %v2819_v39 }
0x1602   : > { %v2834_v41 = vmul.f32 %v3436_v0, %v2828_v42 }
0x1603   : > { %v2821_v44 = vsub.f32 1.5, %v2820_v4 }
0x1604   : > { %v4693_v28 = vadd.f32 %v3437_v40, %v2834_v41 }
0x1605   : > { %v2822_v46 = vmul.f32 %v3579_v38, %v2821_v44 }
0x1606   : > { %v2847_v10 = vmul.f32 %v3438_v35, %v4693_v28 }
0x1607   : > { %v2826_v26 = vsel %vm2825_vm15, %v3579_v38, %v2822_v46  ;;  %vm3069_vm15 = vcmask 8192  }
0x1608   : > { %v2853_v2 = vsel %vm857_vm1, %v2847_v10, 0.0  ;;  %v2829_v48 = vmul.f32 %v2826_v26, %v2778_v59 }
0x1609   : > { %2854 = vadd.xlane.f32.xlu2 %v2853_v2 }
0x160a   : > { %v2835_v49 = vmul.f32 %v3436_v0, %v2829_v48 }
0x160c   : > { %v4697_v34 = vadd.f32 %v3437_v40, %v2835_v49 }
0x160e   : > { %v2848_v20 = vmul.f32 %v3438_v35, %v4697_v34 }
0x1610   : > { %v2857_v51 = vsel %vm2856_vm8, %v2848_v20, 0.0 }
0x1611   : > { %2858 = vadd.xlane.f32.xlu0 %v2857_v51 }
0x165c   : > { %v2852_v45 = vpop.xlane.xlu1 %2851 }
0x165d   : > { %v2864_v54 = vadd.f32 %v3439_v12, %v2852_v45 }
0x165f   : > { %v2868_v47 = vsel %vm2867_vm10, %v2864_v54, -inf }
0x167c   : > { %v2855_v52 = vpop.xlane.xlu2 %2854 }
0x167d   : > { %v2865_v43 = vadd.f32 %v3439_v12, %v2855_v52 }
0x167f   : > { %v2870_v31 = vsel %vm2869_vm9, %v2865_v43, -inf }
0x1680   : > { %v2873_v56 = vmax.f32 %v2868_v47, %v2870_v31 }
0x1684   : > { %v2859_v55 = vpop.xlane.xlu0 %2858 }
0x1685   : > { %v2866_v16 = vadd.f32 %v3439_v12, %v2859_v55 }
0x1687   : > { %v2872_v57 = vsel %vm2871_vm11, %v2866_v16, -inf }
0x1688   : > { %v2874_v50 = vmax.f32 %v2873_v56, %v2872_v57 }
0x168a   : > { %v2875_v58 = vrot.slane %v2874_v50, 4 }
0x168c   : > { %v2876_v59 = vmax.f32 %v2874_v50, %v2875_v58 }
0x168e   : > { %v2877_v60 = vrot.slane %v2876_v59, 2 }
0x1690   : > { %v2878_v61 = vmax.f32 %v2876_v59, %v2877_v60 }
0x1692   : > { %v2879_v36 = vrot.slane %v2878_v61, 1 }
0x1694   : > { %v2880_v62 = vmax.f32 %v2878_v61, %v2879_v36  ;;  %v3673_v61 = vmov 64.0  }
0x1696   : > { %v2881_v63 = vsub.f32 %v2864_v54, %v2880_v62  ;;  %v2882_v1 = vsub.f32 %v2865_v43, %v2880_v62  ;;  %v2883_v3 = vsub.f32 %v2866_v16, %v2880_v62 }
0x1698   : > { %v2884_v33 = vmul.f32 1.442695, %v2881_v63  ;;  %v2886_v37 = vmul.f32 1.442695, %v2882_v1  ;;  %v2888_v5 = vmul.f32 1.442695, %v2883_v3 }
0x169a   : > { %3580 = vpow2.f32 %v2884_v33 }
0x169b   : > { %3582 = vpow2.f32 %v2886_v37 }
0x169c   : > { %3584 = vpow2.f32 %v2888_v5 }
0x16a0   : > { %v3581_v6 = vpop.eup %3580 }
0x16a1   : > { %v3583_v0 = vpop.eup %3582  ;;  %v2894_v7 = vrot.slane %v3581_v6, 1 }
0x16a2   : > { %v3585_v8 = vpop.eup %3584  ;;  %v2895_v40 = vrot.slane %v3583_v0, 1 }
0x16a3   : > { %v2897_v9 = vrot.slane %v3585_v8, 1 }
0x16a4   : > { %v2896_v35 = vsel %vm2893_vm0, %v2894_v7, %v2895_v40 }
0x16a5   : > { %v2898_v13 = vsel %vm2893_vm0, %v2895_v40, %v2897_v9  ;;  %v2901_v14 = vsel %vm2869_vm9, %v2896_v35, 0.0  ;;  %v3008_v40 = vld [vmem:[%s4838_s21 + $0x28] sm:$0xff]  ;;  %v3007_v9 = vld [vmem:[%s4838_s21 + $0x20] sm:$0xff]  ;;  %v3006_v35 = vld [vmem:[%s4838_s21 + $0x18] sm:$0xff] }
0x16a6   : > { %v2902_v15 = vsel %vm2869_vm9, %v2898_v13, 0.0  ;;  %v3005_v13 = vld [vmem:[%s4838_s21 + $0x10] sm:$0xff] }
0x16a7   : > { %v2903_v17 = vadd.f32 %v2902_v15, %v2901_v14  ;;  %v3004_v14 = vld [vmem:[%s4838_s21 + $0x8] sm:$0xff]  ;;  %v3003_v15 = vld [vmem:[%s4838_s21] sm:$0xff] }
0x16a9   : > { %v2904_v19 = vrot.slane %v2903_v17, 4 }
0x16ab   : > { %v2905_v29 = vadd.f32 %v2904_v19, %v2903_v17  ;;  %v3044_v17 = vld [vmem:[%s4840_s23 + $0x38] sm:$0xff]  ;;  %v3042_v19 = vld [vmem:[%s4840_s23 + $0x28] sm:$0xff] }
0x16ac   : > { %3057 = vmatpush.msra.mxu2 %v3044_v17 }
0x16ad   : > { %v2906_v53 = vrot.slane %v2905_v29, 2 }
0x16ae   : > { %3058 = vmatpush.msra.mxu2 %v3043_v18 }
0x16af   : > { %v2907_v22 = vadd.f32 %v2906_v53, %v2905_v29 }
0x16b0   : > { %3059 = vmatpush.msra.mxu2 %v3042_v19 }
0x16b1   : > { %v2908_v21 = vrot.slane %v2907_v22, 1 }
0x16b3   : > { %v2909_v23 = vadd.f32 %v2908_v21, %v2907_v22  ;;  %v3041_v22 = vld [vmem:[%s4840_s23 + $0x20] sm:$0xff] }
0x16b4   : > { %3060 = vmatpush.msra.mxu2 %v3041_v22 }
0x16b5   : > { %3586 = vrcp.f32 %v2909_v23  ;;  %v2921_v25 = vand.u32 2147483648, %v2909_v23  ;;  %v2919_v32 = vand.u32 2147483647, %v2909_v23  ;;  %vm2915_vm3 = vweird.f32 %v2909_v23 }
0x16b6   : > { %3588 = vrcp.f32 %v3673_v61 }
0x16b7   : > { %v2922_v42 = vor.u32 1.1754944e-38, %v2921_v25  ;;  %vm2920_vm5 = vcmp.eq.f32.partialorder %v2919_v32, 8.507059e+37 }
0x16bb   : > { %v3587_v30 = vpop.eup %3586 }
0x16bc   : > { %v2911_v24 = vmul.f32 %v3587_v30, %v2909_v23  ;;  %vm2916_vm2 = vweird.f32 %v3587_v30  ;;  %v3589_v36 = vpop.eup %3588  ;;  %v3040_v23 = vld [vmem:[%s4840_s23 + $0x18] sm:$0xff] }
0x16bd   : > { %vm2917_vm4 = vmor %vm2915_vm3, %vm2916_vm2  ;;  %v2976_v62 = vmul.f32 64.0, %v3589_v36  ;;  %vm2980_vm7 = vweird.f32 %v3589_v36  ;;  %3061 = vmatpush.msra.mxu2 %v3040_v23 }
0x16be   : > { %v2912_v38 = vsub.f32 1.0, %v2911_v24 }
0x16bf   : > { %v2977_v63 = vsub.f32 1.0, %v2976_v62 }
0x16c0   : > { %v2913_v27 = vmul.f32 %v3587_v30, %v2912_v38 }
0x16c1   : > { %v2978_v1 = vmul.f32 %v3589_v36, %v2977_v63 }
0x16c2   : > { %v2914_v39 = vadd.f32 %v3587_v30, %v2913_v27 }
0x16c3   : > { %v2979_v3 = vadd.f32 %v3589_v36, %v2978_v1 }
0x16c4   : > { %v2918_v4 = vsel %vm2917_vm4, %v3587_v30, %v2914_v39  ;;  %v2969_v39 = vld [vmem:[%s4836_s19] sm:$0x1] }
0x16c5   : > { %v2923_v41 = vsel %vm2920_vm5, %v2922_v42, %v2918_v4  ;;  %v2981_v33 = vsel %vm2980_vm7, %v3589_v36, %v2979_v3 }
0x16c6   : > { %v2926_v44 = vmul.f32 %v3585_v8, %v2923_v41  ;;  %v2925_v46 = vmul.f32 %v3583_v0, %v2923_v41  ;;  %v2924_v10 = vmul.f32 %v3581_v6, %v2923_v41  ;;  %v3009_v8 = vld [vmem:[%s4838_s21 + $0x30] sm:$0xff]  ;;  %v2970_v41 = vld [vmem:[%s4837_s20] sm:$0x1] }
0x16c8   : > { %3073 = vst.msk [vmem:[%s803_s6 + $0xf] sm:$0x1] %vm2871_vm11, %v2926_v44  ;;  %2939 = vperm.xlu0 %3419, %v2926_v44   ;;  %2934 = vperm.xlu2 %3418, %v2925_v46  }
0x16c9   : > { %3072 = vst.msk [vmem:[%s803_s6 + $0x7] sm:$0xff] %vm2869_vm9, %v2925_v46  ;;  %2929 = vperm.xlu1 %3417, %v2924_v10  }
0x16ca   : > { %3071 = vst.msk [vmem:[%s803_s6 - $0x1] sm:$0xfe] %vm2867_vm10, %v2924_v10  ;;  %s4954_s6 = sld [smem:[#allocation10_spill]]  ;;  %v3039_v10 = vld [vmem:[%s4840_s23 + $0x10] sm:$0xff] }
0x16cb   : > { %3062 = vmatpush.msra.mxu2 %v3039_v10 }
0x16d0   : > { %s3088_s4 = scalar_lea.hbm %s4956_s2, %s4954_s6 }
0x16d1   : > { %s3092_s11 = sshll.u32 %s3088_s4, 4  ;;  %s3093_s11 = int_to_ptr.hbm [resolvable:$true] %s3092_s11 }
0x1722   : > { %v2935_v26 = vpop.permute.xlu2 %2934 }
0x1723   : > { %v2943_v2 = vmul.f32 %v2935_v26, %v4693_v28  ;;  %v3038_v26 = vld [vmem:[%s4840_s23 + $0x8] sm:$0xff] }
0x1724   : > { %3063 = vmatpush.msra.mxu2 %v3038_v26 }
0x1725   : > { %v2949_v52 = vrot.slane %v2943_v2, 1  ;;  %v3037_v2 = vld [vmem:[%s4840_s23] sm:$0xff] }
0x1726   : > { %3064 = vmatpush.msra.mxu2 %v3037_v2 }
0x173a   : > { %v2940_v48 = vpop.permute.xlu0 %2939 }
0x173b   : > { %v2944_v49 = vmul.f32 %v2940_v48, %v4697_v34  ;;  %v2930_v20 = vpop.permute.xlu1 %2929  ;;  %v3011_v48 = vld [vmem:[%s4955_s25] sm:$0x1] }
0x173c   : > { %v2942_v51 = vmul.f32 %v2930_v20, %v4688_v11 }
0x173d   : > { %v2951_v12 = vrot.slane %v2944_v49, 1 }
0x173e   : > { %v2948_v45 = vrot.slane %v2942_v51, 1 }
0x173f   : > { %v2952_v43 = vsel %vm2893_vm0, %v2949_v52, %v2951_v12 }
0x1740   : > { %v2956_v54 = vsel %vm857_vm1, %v2952_v43, 0.0  ;;  %v2950_v31 = vsel %vm2893_vm0, %v2948_v45, %v2949_v52  ;;  %v3045_v52 = vld [vmem:[%s4957_s9] sm:$0x1]  ;;  %s3612_s9 = scalar_lea.hbm %s4956_s2, 2 }
0x1741   : > { %v2955_v55 = vsel %vm857_vm1, %v2950_v31, 0.0 }
0x1742   : > { %v2957_v47 = vadd.f32 %v2956_v54, %v2955_v55 }
0x1744   : > { %v2958_v16 = vrot.slane %v2957_v47, 4 }
0x1746   : > { %v2959_v28 = vadd.f32 %v2958_v16, %v2957_v47 }
0x1748   : > { %v2960_v56 = vrot.slane %v2959_v28, 2 }
0x174a   : > { %v2961_v57 = vadd.f32 %v2960_v56, %v2959_v28 }
0x174c   : > { %v2962_v34 = vrot.slane %v2961_v57, 1 }
0x174e   : > { %v2963_v50 = vadd.f32 %v2962_v34, %v2961_v57 }
0x1750   : > { %2965 = vrot.lane.b32.xlu1 %v2963_v50, %s3672_s0  ;;  %s785_s0 = sand.u32 1, %s4953_s24   ;;  %s3606_s24 = sshra.s32 %s3093_s11, 4  ;;  %s3607_s24 = int_to_ptr.hbm [resolvable:$true] %s3606_s24 }
0x1751   : > { %s786_s7 = scalar_lea.vmem [#allocation3], %s785_s0  ;;  %s3075_s18 = scalar_lea.sflag [#allocation4], %s785_s0 }
0x1752   : > { %s3090_s28 = sshll.u32 %s786_s7, 4  ;;  %s3608_s22 = scalar_lea.hbm %s3607_s24, 1  ;;  %s3091_s28 = int_to_ptr.vmem [resolvable:$true] %s3090_s28 }
0x1753   : > { %p3609_p11 = scmp.ne.s32.totalorder %s3607_s24, %s3608_s22  ;;  %p3613_p0 = scmp.lt.s32.totalorder %s3607_s24, %s4956_s2 }
0x1754   : > { %p3614_p1 = scmp.lt.s32.totalorder %s3612_s9, %s3608_s22 }
0x1755   : > { %p3610_p12 = pnand %p3609_p11, %p3850_p5 }
0x1756   : > { %p3615_p2 = por %p3614_p1, %p3613_p0 }
0x1757   : > { %p3611_p13 = pneg %p3610_p12 }
0x1759   : > { %p3616_p3 = pnand %p3615_p2, %p3611_p13 }
0x17c2   : > { %v2966_v58 = vpop.permute.xlu1 %2965 }
0x17c3   : > { %v2968_v59 = vsel %vm857_vm1, %v4688_v11, %v2966_v58  ;;  %v3010_v11 = vld [vmem:[%s4838_s21 + $0x38] sm:$0xff] }
0x17c4   : > { %v2972_v60 = vsel %vm2971_vm6, %v2968_v59, 0.0  ;;  %3024 = vmatpush.msra.mxu0 %v3010_v11 }
0x17c5   : > { %2973 = vadd.xlane.f32.xlu2 %v2972_v60 }
0x17c6   : > { %3025 = vmatpush.msra.mxu0 %v3009_v8 }
0x17c8   : > { %3026 = vmatpush.msra.mxu0 %v3008_v40 }
0x17ca   : > { %3027 = vmatpush.msra.mxu0 %v3007_v9 }
0x17cc   : > { %3028 = vmatpush.msra.mxu0 %v3006_v35 }
0x17ce   : > { %3029 = vmatpush.msra.mxu0 %v3005_v13 }
0x17d0   : > { %3030 = vmatpush.msra.mxu0 %v3004_v14 }
0x17d2   : > { %3031 = vmatpush.msra.mxu0 %v3003_v15 }
0x1838   : > { %v2974_v37 = vpop.xlane.xlu2 %2973 }
0x1839   : > { %v2982_v5 = vmul.f32 %v2981_v33, %v2974_v37 }
0x183b   : > { %v2983_v6 = vsub.f32 %v2968_v59, %v2982_v5 }
0x183d   : > { %v2984_v0 = vmul.f32 %v2983_v6, %v2983_v6 }
0x183f   : > { %v2985_v7 = vsel %vm2971_vm6, %v2984_v0, 0.0 }
0x1840   : > { %2986 = vadd.xlane.f32.xlu1 %v2985_v7 }
0x18b3   : > { %v2987_v29 = vpop.xlane.xlu1 %2986 }
0x18b4   : > { %v2988_v53 = vmul.f32 %v2987_v29, %v2981_v33 }
0x18b6   : > { %v2989_v21 = vadd.f32 1e-05, %v2988_v53 }
0x18b8   : > { %3590 = vrsqrt.f32 %v2989_v21  ;;  %vm2996_vm12 = vweird.f32 %v2989_v21 }
0x18be   : > { %v3591_v30 = vpop.eup %3590 }
0x18bf   : > { %v2991_v24 = vmul.f32 %v3591_v30, %v2989_v21  ;;  %vm2997_vm1 = vweird.f32 %v3591_v30 }
0x18c0   : > { %vm2998_vm13 = vmor %vm2996_vm12, %vm2997_vm1 }
0x18c1   : > { %v2992_v38 = vmul.f32 %v3591_v30, %v2991_v24 }
0x18c3   : > { %v2993_v25 = vmul.f32 0.5, %v2992_v38 }
0x18c5   : > { %v2994_v27 = vsub.f32 1.5, %v2993_v25 }
0x18c7   : > { %v2995_v32 = vmul.f32 %v3591_v30, %v2994_v27 }
0x18c9   : > { %v2999_v42 = vsel %vm2998_vm13, %v3591_v30, %v2995_v32 }
0x18ca   : > { %v3000_v4 = vmul.f32 %v2999_v42, %v2983_v6 }
0x18cc   : > { %v3001_v44 = vmul.f32 %v3000_v4, %v2969_v39 }
0x18ce   : > { %v3002_v46 = vadd.f32 %v3001_v44, %v2970_v41 }
0x18d0   : > { %3311 = vmatmul.msk.f32.vlgmr.msra.gmra.mxu0 %vm3012_vm14, %v3002_v46 }
0x194d   : > { %v3033_v49 = vpop.f32.mrf.mxu0 }
0x194e   : > { %v3034_v20 = vadd.f32 %v3033_v49, %v3011_v48 }
0x1950   : > { %v3036_v51 = vmax.f32 %v3034_v20, 0.0 }
0x1952   : > { %3312 = vmatmul.msk.f32.vlgmr.msra.gmra.mxu2 %vm3012_vm14, %v3036_v51 }
0x19d5   : > { %v3066_v12 = vpop.f32.mrf.mxu2 }
0x19d6   : > { %v3067_v45 = vadd.f32 %v3066_v12, %v3045_v52 }
0x19d8   : > { %3070 = vst.msk [vmem:[%s786_s7] sm:$0x1] %vm3069_vm15, %v3067_v45 }
0x19d9   : > { %3619 = shalt.err (!%p3616_p3)
}
0x19da   : > { %3320 = dma.vmem_to_hbm [thread:$0]  (%p3850_p5), %s3091_s28, 16, %s3093_s11, %s3075_s18  }
0x19db PF: > { %s4959_s0 = sld [smem:[#allocation9_spill]] }
0x19dc   : > { %s4960_s5 = sld [smem:[#allocation6_spill]] }
0x19e1   : > { %p3326_p4 = scmp.ge.s32.totalorder %s4959_s0, 2 }
0x19e2   : > { %s3107_s8 = sand.u32 1, %s4960_s5  }
0x19e3   : > { %p3323_p7 = pnand %p3326_p4, %p3854_p6  ;;  %s3108_s7 = scalar_lea.sflag [#allocation4], %s3107_s8 }
0x19e5   : > { %p3324_p8 = pneg %p3323_p7 }
0x19e7   : > { %3637 = dma.done.wait (%p3324_p8), %s3108_s7, 16  }
0x19e8   : > { %3639 = vsyncadd (%p3324_p8), %s3108_s7, 4294967280  ;;  %s4962_s4 = sld [smem:[#allocation11_spill]] }
0x19e9   : > { %s4963_s7 = sld [smem:[#allocation7_spill]] }
0x19ea   : > { %s4964_s28 = sld [smem:[#allocation8_spill]] }
0x19eb   : > { %s4965_s8 = sld [smem:[#allocation12_spill]] }
0x19ee   : > { %p39_p9 = scmp.ge.s32.totalorder %s4962_s4, 4  }
0x19f0   :  { %41 = sbr.rel (!%p39_p9) target bundleno = 19 (0x13), region = 179 }
0x19f5   :  { %3121 = vsyncpa [#allocation4], 1 }
0x19f6   :  { %3123 = vsyncpa [#allocation4 + $0x1], 1 }

</bundles_post_ra>
